<compile_context>
chip_gen: v6e
topology: v6e:2x2x1
jax: 0.10.0
libtpu: 0.0.40
codegen_flags: <defaults>
</compile_context>

<pallas_src>
import math
from functools import partial

import jax
import jax.numpy as jnp
from jax.experimental import pallas as pl
from jax.experimental.pallas import tpu as pltpu


def _round_up(v, m):
    return ((v + m - 1) // m) * m


def _tpu_tuning():
    """(vmem_limit_bytes, target_matmul_rows_per_step) with a safe fallback."""
    try:
        kind = jax.devices()[0].device_kind.lower()
    except Exception:
        kind = ""
    if ("v5" in kind) or ("v6" in kind):
        # 128 MiB physical VMEM on v5e/v6e -> allow deep tiles and a high scoped limit.
        return 96 * 1024 * 1024, 1024
    # Conservative default (v7x has only 64 MiB physical VMEM per TensorCore).
    return 48 * 1024 * 1024, 512


def mixture_head_kernel(x_ref, w1_ref, b1_ref, w2_ref, b2_ref, out_ref, *,
                        Wp, M, KNC_PAD, sig_min, sig_max):
    """One (image, row-tile) grid step.

    x_ref  : (R_TILE, C)       bf16 padded activation rows, R_TILE >= (H_TILE+2)*Wp + 2
    w1_ref : (9, C, HIDP)      fused 3x3 tap weights (pi|mu|sg columns, zero-padded)
    b1_ref : (1, HIDP)         fused first-layer bias (f32)
    w2_ref : (HIDP, OUT_PAD)   block-diagonal fused 1x1 weights, slab-aligned columns
    b2_ref : (1, OUT_PAD)      fused second-layer bias; pi-slab padding lanes hold -1e30
    out_ref: (M, OUT_PAD)      M = H_TILE * Wp fused rows (incl. discarded garbage cols)
    """
    # ---- 3x3 conv: 9 shift-and-accumulate MXU matmuls on contiguous row windows ----
    # (each tap is just a static sublane offset dy*Wp + dx; no im2col, no relayouts)
    h = None
    t = 0
    for dy in range(3):
        for dx in range(3):
            shift = dy * Wp + dx                          # static Python int
            xt = x_ref[pl.ds(shift, M), :]                # contiguous (M, C) window
            p = jnp.dot(xt, w1_ref[t], preferred_element_type=jnp.float32)
            h = p if h is None else h + p
            t += 1
    h = jnp.maximum(h + b1_ref[...], 0.0)                 # bias + ReLU (f32)

    # ---- fused block-diagonal 1x1 conv for pi|mu|sigma, f32 accumulation ----
    raw = jnp.dot(h.astype(w2_ref.dtype), w2_ref[...],
                  preferred_element_type=jnp.float32) + b2_ref[...]

    # ---- slab-wise epilogue: transcendentals only on the 128-wide pi / sigma slabs ----
    pi_logits = raw[:, 0:128]                             # padding lanes == -1e30 (bias)
    m = jnp.max(pi_logits, axis=-1, keepdims=True)
    e = jnp.exp(pi_logits - m)                            # padding lanes underflow to 0
    pi = e / jnp.sum(e, axis=-1, keepdims=True)           # exact divide: rows sum to 1

    sg_off = 128 + KNC_PAD
    sg_logits = raw[:, sg_off:sg_off + 128]
    a = jnp.exp(-jnp.abs(sg_logits))                      # numerically stable sigmoid
    r = pl.reciprocal(1.0 + a, approx=True)               # per-element divide -> EUP slot
    sig01 = jnp.where(sg_logits >= 0, r, a * r)
    sigma = sig_min + (sig_max - sig_min) * sig01

    # ---- lane-dense, 128-aligned stores (unmasked vst) ----
    out_ref[:, 0:128] = pi.astype(out_ref.dtype)
    out_ref[:, 128:sg_off] = raw[:, 128:sg_off].astype(out_ref.dtype)   # mu (raw logits)
    out_ref[:, sg_off:sg_off + 128] = sigma.astype(out_ref.dtype)


def mixture_head_forward(x_nchw, params, *, k, num_classes,
                         sig_min=1.0, sig_max=10.0,
                         h_tile=None,
                         compute_dtype=jnp.bfloat16,
                         out_dtype=jnp.bfloat16,
                         expand_sigma=True):
    N, C, H, W = x_nchw.shape
    D = params["w2_pi"].shape[0]                   # hidden dim (= in_dim of the module)
    knc = k * num_classes
    assert k <= 128, "pi / sigma heads must each fit a single 128-lane slab"

    HID = 3 * D
    HIDP = _round_up(HID, 128)                     # full-lane MXU tiles on both matmuls
    KNC_PAD = _round_up(knc, 128)
    PI_OFF, MU_OFF, SG_OFF = 0, 128, 128 + KNC_PAD
    OUT_PAD = SG_OFF + 128                         # slab-aligned fused output width

    vmem_limit, target_rows = _tpu_tuning()

    # ---- spatial tiling: W folded into the row (sublane) dim, 1-row conv halo ----
    Wp = _round_up(W + 2, 8)                       # dense sublanes, 8-aligned tap strides
    if h_tile is None:
        h_tile = max(1, min(H, target_rows // Wp))
    G_R = -(-H // h_tile)
    H_pad = G_R * h_tile
    HT2 = h_tile + 2
    M = h_tile * Wp                                # matmul rows per step (incl. garbage cols)
    R_TILE = _round_up(HT2 * Wp + 2, 8)            # +2: max tap shift stays in-bounds

    # NCHW -> NHWC, bf16, zero-pad (1 for the 3x3 halo, extra rows/cols up to H_pad / Wp).
    x = jnp.transpose(x_nchw, (0, 2, 3, 1)).astype(compute_dtype)
    xp = jnp.pad(x, ((0, 0), (1, 1 + H_pad - H), (1, Wp - W - 1), (0, 0)))

    # Halo'd row tiles, flattened to (rows, C): tile r holds padded rows
    # [r*h_tile, r*h_tile + h_tile + 2).  Halo rows are duplicated wrapper-side so the
    # kernel sees a plain non-overlapping block (no overlapping-window BlockSpec needed).
    row_idx = jnp.arange(G_R)[:, None] * h_tile + jnp.arange(HT2)[None, :]
    tiles = xp[:, row_idx]                                         # (N, G_R, HT2, Wp, C)
    tiles = tiles.reshape(N, G_R, HT2 * Wp, C)
    tiles = jnp.pad(tiles, ((0, 0), (0, 0), (0, R_TILE - HT2 * Wp), (0, 0)))

    # ---- fused, padded weights (wrapper-side, done once) ----
    w1_cat = jnp.concatenate([params["w1_pi"], params["w1_mu"], params["w1_sg"]],
                             axis=-1)                              # (3, 3, C, 3D)
    w1_all = jnp.zeros((3, 3, C, HIDP), jnp.float32).at[..., :HID].set(w1_cat)
    w1_all = w1_all.reshape(9, C, HIDP).astype(compute_dtype)

    b1_all = jnp.zeros((1, HIDP), jnp.float32)
    b1_all = b1_all.at[:, 0:D].set(params["b1_pi"])
    b1_all = b1_all.at[:, D:2 * D].set(params["b1_mu"])
    b1_all = b1_all.at[:, 2 * D:3 * D].set(params["b1_sg"])

    w2_blk = jnp.zeros((HIDP, OUT_PAD), jnp.float32)
    w2_blk = w2_blk.at[0:D, PI_OFF:PI_OFF + k].set(params["w2_pi"])
    w2_blk = w2_blk.at[D:2 * D, MU_OFF:MU_OFF + knc].set(params["w2_mu"])
    w2_blk = w2_blk.at[2 * D:3 * D, SG_OFF:SG_OFF + k].set(params["w2_sg"])
    w2_blk = w2_blk.astype(compute_dtype)

    b2_all = jnp.zeros((1, OUT_PAD), jnp.float32)
    b2_all = b2_all.at[:, PI_OFF:PI_OFF + k].set(params["b2_pi"])
    b2_all = b2_all.at[:, PI_OFF + k:128].set(-1e30)   # softmax padding mask baked into bias
    b2_all = b2_all.at[:, MU_OFF:MU_OFF + knc].set(params["b2_mu"])
    b2_all = b2_all.at[:, SG_OFF:SG_OFF + k].set(params["b2_sg"])

    kernel = partial(mixture_head_kernel, Wp=Wp, M=M, KNC_PAD=KNC_PAD,
                     sig_min=float(sig_min), sig_max=float(sig_max))

    # Weight/bias specs are grid-invariant: the pipeline only re-fetches a block when its
    # index changes, so they are DMA'd once.  (pl.Buffered(1) would also drop their second
    # VMEM buffer; skipped here for version robustness — they total only a couple of MB.)
    fused = pl.pallas_call(
        kernel,
        out_shape=jax.ShapeDtypeStruct((N, G_R, M, OUT_PAD), out_dtype),
        grid_spec=pltpu.PrefetchScalarGridSpec(
            num_scalar_prefetch=0,
            grid=(N, G_R),
            in_specs=[
                pl.BlockSpec((None, None, R_TILE, C), lambda n, r: (n, r, 0, 0)),
                pl.BlockSpec((9, C, HIDP), lambda n, r: (0, 0, 0)),
                pl.BlockSpec((1, HIDP), lambda n, r: (0, 0)),
                pl.BlockSpec((HIDP, OUT_PAD), lambda n, r: (0, 0)),
                pl.BlockSpec((1, OUT_PAD), lambda n, r: (0, 0)),
            ],
            out_specs=pl.BlockSpec((None, None, M, OUT_PAD), lambda n, r: (n, r, 0, 0)),
        ),
        compiler_params=pltpu.CompilerParams(
            dimension_semantics=("parallel", "parallel"),   # batch x row-tiles -> megacore
            vmem_limit_bytes=vmem_limit,
        ),
    )(tiles, w1_all, b1_all, w2_blk, b2_all)

    # ---- wrapper glue back to the PyTorch (NCHW-style) layout ----
    fused = fused.reshape(N, G_R, h_tile, Wp, OUT_PAD)[:, :, :, :W, :]
    fused = fused.reshape(N, G_R * h_tile, W, OUT_PAD)[:, :H]            # (N, H, W, OUT_PAD)

    pi = jnp.transpose(fused[..., PI_OFF:PI_OFF + k], (0, 3, 1, 2))                  # [N,k,H,W]
    mu = jnp.transpose(fused[..., MU_OFF:MU_OFF + knc].reshape(N, H, W, k, num_classes),
                       (0, 3, 4, 1, 2))                                              # [N,k,nc,H,W]
    sigma_k = jnp.transpose(fused[..., SG_OFF:SG_OFF + k], (0, 3, 1, 2))             # [N,k,H,W]
    if expand_sigma:   # matches torch's .expand_as(mu); set False at real sizes (perf/OOM)
        sigma = jnp.broadcast_to(sigma_k[:, :, None, :, :], (N, k, num_classes, H, W))
    else:
        sigma = sigma_k[:, :, None, :, :]          # compact SHARE_SIG form (broadcastable)
    return {"pi": pi, "mu": mu, "sigma": sigma}


def mixture_head_reference(x_nchw, params, *, k, num_classes, sig_min=1.0, sig_max=10.0):
    """Pure-JAX f32 reference matching the PyTorch module (for validation)."""
    N, C, H, W = x_nchw.shape

    def head(w1, b1, w2, b2):
        y = jax.lax.conv_general_dilated(
            x_nchw, w1, window_strides=(1, 1), padding="SAME",
            dimension_numbers=("NCHW", "HWIO", "NCHW"))
        y = jnp.maximum(y + b1.reshape(1, -1, 1, 1), 0.0)
        return jnp.einsum("ndhw,do->nohw", y, w2) + b2.reshape(1, -1, 1, 1)

    pi = jax.nn.softmax(head(params["w1_pi"], params["b1_pi"],
                             params["w2_pi"], params["b2_pi"]), axis=1)
    mu = head(params["w1_mu"], params["b1_mu"],
              params["w2_mu"], params["b2_mu"]).reshape(N, k, num_classes, H, W)
    sg = head(params["w1_sg"], params["b1_sg"], params["w2_sg"], params["b2_sg"])
    sigma = sig_min + (sig_max - sig_min) * jax.nn.sigmoid(sg)
    sigma = jnp.broadcast_to(sigma[:, :, None], (N, k, num_classes, H, W))
    return {"pi": pi, "mu": mu, "sigma": sigma}


def init_params(key, cnv_dim, in_dim, k, num_classes):
    """Deterministic synthetic init; final mu/sigma biases = -2.19 as in the module."""
    keys = jax.random.split(key, 6)
    s1 = 1.0 / math.sqrt(9 * cnv_dim)
    s2 = 1.0 / math.sqrt(in_dim)

    def w(kk, shape, scale):
        return (scale * jax.random.normal(kk, shape)).astype(jnp.float32)

    return {
        "w1_pi": w(keys[0], (3, 3, cnv_dim, in_dim), s1),
        "b1_pi": jnp.zeros((1, in_dim), jnp.float32),
        "w2_pi": w(keys[1], (in_dim, k), s2),
        "b2_pi": jnp.zeros((1, k), jnp.float32),
        "w1_mu": w(keys[2], (3, 3, cnv_dim, in_dim), s1),
        "b1_mu": jnp.zeros((1, in_dim), jnp.float32),
        "w2_mu": w(keys[3], (in_dim, k * num_classes), s2),
        "b2_mu": jnp.full((1, k * num_classes), -2.19, jnp.float32),  # bias.data.fill_(-2.19)
        "w1_sg": w(keys[4], (3, 3, cnv_dim, in_dim), s1),
        "b1_sg": jnp.zeros((1, in_dim), jnp.float32),
        "w2_sg": w(keys[5], (in_dim, k), s2),
        "b2_sg": jnp.full((1, k), -2.19, jnp.float32),                # bias.data.fill_(-2.19)
    }


if __name__ == "__main__":
    # Small shapes consistent with the module (scaled down from 256/64/80/10).
    N, CNV_DIM, IN_DIM, K, NUM_CLASSES, H, W = 2, 32, 16, 4, 8, 16, 16

    key = jax.random.PRNGKey(0)
    kx, kp = jax.random.split(key)
    x = jax.random.normal(kx, (N, CNV_DIM, H, W), dtype=jnp.float32)  # NCHW like PyTorch
    params = init_params(kp, CNV_DIM, IN_DIM, K, NUM_CLASSES)

    # h_tile=8 -> 2 row tiles per image: exercises the halo'd spatial-tiling path.
    out = mixture_head_forward(x, params, k=K, num_classes=NUM_CLASSES,
                               sig_min=1.0, sig_max=10.0, h_tile=8)
    out = jax.block_until_ready(out)

    assert out["pi"].shape == (N, K, H, W)
    assert out["mu"].shape == (N, K, NUM_CLASSES, H, W)
    assert out["sigma"].shape == (N, K, NUM_CLASSES, H, W)

    # softmax over the mixture dim sums to 1 (exact divide; only bf16 output rounding)
    assert jnp.allclose(jnp.sum(out["pi"].astype(jnp.float32), axis=1), 1.0, atol=2e-2)
    # sigma stays within [sig_min, sig_max] (small slack for bf16 output rounding)
    assert bool(jnp.all(out["sigma"] >= 1.0 - 0.1))
    assert bool(jnp.all(out["sigma"] <= 10.0 + 0.1))
    assert bool(jnp.all(jnp.isfinite(out["mu"].astype(jnp.float32))))

    # compare against a pure-JAX f32 reference (bf16 compute -> loose tolerances)
    ref = mixture_head_reference(x, params, k=K, num_classes=NUM_CLASSES,
                                 sig_min=1.0, sig_max=10.0)
    assert float(jnp.max(jnp.abs(out["pi"].astype(jnp.float32) - ref["pi"]))) < 8e-2
    assert float(jnp.max(jnp.abs(out["mu"].astype(jnp.float32) - ref["mu"]))) < 2e-1
    assert float(jnp.max(jnp.abs(out["sigma"].astype(jnp.float32) - ref["sigma"]))) < 3.5e-1

    print("KERNEL_OK")
</pallas_src>

<mosaic_0001>
module attributes {stable_mosaic.version = 11 : i64} {
  func.func @mixture_head_kernel(%arg0: i32, %arg1: i32, %arg2: memref<1x1x248x32xbf16, #tpu.memory_space<vmem>>, %arg3: memref<9x32x128xbf16, #tpu.memory_space<vmem>>, %arg4: memref<1x128xf32, #tpu.memory_space<vmem>>, %arg5: memref<128x384xbf16, #tpu.memory_space<vmem>>, %arg6: memref<1x384xf32, #tpu.memory_space<vmem>>, %arg7: memref<1x1x192x384xbf16, #tpu.memory_space<vmem>>) attributes {dimension_semantics = [#tpu.dimension_semantics<parallel>, #tpu.dimension_semantics<parallel>], iteration_bounds = array<i64: 2, 2>, scalar_prefetch = 0 : i64, scratch_operands = 0 : i64, tpu.core_type = #tpu.core_type<tc>, window_params = [{transform_indices = @transform_0, window_bounds = array<i64: 1, 1, 248, 32>}, {pipeline_mode = #tpu.pipeline_mode<synchronous>, transform_indices = @transform_1, window_bounds = array<i64: 9, 32, 128>}, {pipeline_mode = #tpu.pipeline_mode<synchronous>, transform_indices = @transform_2, window_bounds = array<i64: 1, 128>}, {pipeline_mode = #tpu.pipeline_mode<synchronous>, transform_indices = @transform_3, window_bounds = array<i64: 128, 384>}, {pipeline_mode = #tpu.pipeline_mode<synchronous>, transform_indices = @transform_4, window_bounds = array<i64: 1, 384>}, {transform_indices = @transform_5, window_bounds = array<i64: 1, 1, 192, 384>}]} {
    %c0 = arith.constant 0 : index
    %c0_0 = arith.constant 0 : index
    %c0_1 = arith.constant 0 : index
    %c0_2 = arith.constant 0 : index
    %0 = vector.load %arg2[%c0, %c0_0, %c0_1, %c0_2] : memref<1x1x248x32xbf16, #tpu.memory_space<vmem>>, vector<1x1x192x32xbf16>
    %1 = vector.shape_cast %0 : vector<1x1x192x32xbf16> to vector<192x32xbf16>
    %c0_3 = arith.constant 0 : index
    %c0_4 = arith.constant 0 : index
    %c0_5 = arith.constant 0 : index
    %2 = vector.load %arg3[%c0_3, %c0_4, %c0_5] : memref<9x32x128xbf16, #tpu.memory_space<vmem>>, vector<1x32x128xbf16>
    %3 = vector.shape_cast %2 : vector<1x32x128xbf16> to vector<32x128xbf16>
    %cst = arith.constant dense<0.000000e+00> : vector<192x128xf32>
    %4 = tpu.matmul %1, %3, %cst {dimension_numbers = #tpu.dot_dimension_numbers<[1], [0], [0], [1], [0, 0, 1, 1], [], []>} : vector<192x32xbf16>, vector<32x128xbf16>, vector<192x128xf32> -> vector<192x128xf32>
    %c0_6 = arith.constant 0 : index
    %c0_7 = arith.constant 0 : index
    %c1 = arith.constant 1 : index
    %c0_8 = arith.constant 0 : index
    %5 = vector.load %arg2[%c0_6, %c0_7, %c1, %c0_8] : memref<1x1x248x32xbf16, #tpu.memory_space<vmem>>, vector<1x1x192x32xbf16>
    %6 = vector.shape_cast %5 : vector<1x1x192x32xbf16> to vector<192x32xbf16>
    %c1_9 = arith.constant 1 : index
    %c0_10 = arith.constant 0 : index
    %c0_11 = arith.constant 0 : index
    %7 = vector.load %arg3[%c1_9, %c0_10, %c0_11] : memref<9x32x128xbf16, #tpu.memory_space<vmem>>, vector<1x32x128xbf16>
    %8 = vector.shape_cast %7 : vector<1x32x128xbf16> to vector<32x128xbf16>
    %cst_12 = arith.constant dense<0.000000e+00> : vector<192x128xf32>
    %9 = tpu.matmul %6, %8, %cst_12 {dimension_numbers = #tpu.dot_dimension_numbers<[1], [0], [0], [1], [0, 0, 1, 1], [], []>} : vector<192x32xbf16>, vector<32x128xbf16>, vector<192x128xf32> -> vector<192x128xf32>
    %10 = arith.addf %4, %9 : vector<192x128xf32>
    %c0_13 = arith.constant 0 : index
    %c0_14 = arith.constant 0 : index
    %c2 = arith.constant 2 : index
    %c0_15 = arith.constant 0 : index
    %11 = vector.load %arg2[%c0_13, %c0_14, %c2, %c0_15] : memref<1x1x248x32xbf16, #tpu.memory_space<vmem>>, vector<1x1x192x32xbf16>
    %12 = vector.shape_cast %11 : vector<1x1x192x32xbf16> to vector<192x32xbf16>
    %c2_16 = arith.constant 2 : index
    %c0_17 = arith.constant 0 : index
    %c0_18 = arith.constant 0 : index
    %13 = vector.load %arg3[%c2_16, %c0_17, %c0_18] : memref<9x32x128xbf16, #tpu.memory_space<vmem>>, vector<1x32x128xbf16>
    %14 = vector.shape_cast %13 : vector<1x32x128xbf16> to vector<32x128xbf16>
    %cst_19 = arith.constant dense<0.000000e+00> : vector<192x128xf32>
    %15 = tpu.matmul %12, %14, %cst_19 {dimension_numbers = #tpu.dot_dimension_numbers<[1], [0], [0], [1], [0, 0, 1, 1], [], []>} : vector<192x32xbf16>, vector<32x128xbf16>, vector<192x128xf32> -> vector<192x128xf32>
    %16 = arith.addf %10, %15 : vector<192x128xf32>
    %c0_20 = arith.constant 0 : index
    %c0_21 = arith.constant 0 : index
    %c24 = arith.constant 24 : index
    %c0_22 = arith.constant 0 : index
    %17 = vector.load %arg2[%c0_20, %c0_21, %c24, %c0_22] : memref<1x1x248x32xbf16, #tpu.memory_space<vmem>>, vector<1x1x192x32xbf16>
    %18 = vector.shape_cast %17 : vector<1x1x192x32xbf16> to vector<192x32xbf16>
    %c3 = arith.constant 3 : index
    %c0_23 = arith.constant 0 : index
    %c0_24 = arith.constant 0 : index
    %19 = vector.load %arg3[%c3, %c0_23, %c0_24] : memref<9x32x128xbf16, #tpu.memory_space<vmem>>, vector<1x32x128xbf16>
    %20 = vector.shape_cast %19 : vector<1x32x128xbf16> to vector<32x128xbf16>
    %cst_25 = arith.constant dense<0.000000e+00> : vector<192x128xf32>
    %21 = tpu.matmul %18, %20, %cst_25 {dimension_numbers = #tpu.dot_dimension_numbers<[1], [0], [0], [1], [0, 0, 1, 1], [], []>} : vector<192x32xbf16>, vector<32x128xbf16>, vector<192x128xf32> -> vector<192x128xf32>
    %22 = arith.addf %16, %21 : vector<192x128xf32>
    %c0_26 = arith.constant 0 : index
    %c0_27 = arith.constant 0 : index
    %c25 = arith.constant 25 : index
    %c0_28 = arith.constant 0 : index
    %23 = vector.load %arg2[%c0_26, %c0_27, %c25, %c0_28] : memref<1x1x248x32xbf16, #tpu.memory_space<vmem>>, vector<1x1x192x32xbf16>
    %24 = vector.shape_cast %23 : vector<1x1x192x32xbf16> to vector<192x32xbf16>
    %c4 = arith.constant 4 : index
    %c0_29 = arith.constant 0 : index
    %c0_30 = arith.constant 0 : index
    %25 = vector.load %arg3[%c4, %c0_29, %c0_30] : memref<9x32x128xbf16, #tpu.memory_space<vmem>>, vector<1x32x128xbf16>
    %26 = vector.shape_cast %25 : vector<1x32x128xbf16> to vector<32x128xbf16>
    %cst_31 = arith.constant dense<0.000000e+00> : vector<192x128xf32>
    %27 = tpu.matmul %24, %26, %cst_31 {dimension_numbers = #tpu.dot_dimension_numbers<[1], [0], [0], [1], [0, 0, 1, 1], [], []>} : vector<192x32xbf16>, vector<32x128xbf16>, vector<192x128xf32> -> vector<192x128xf32>
    %28 = arith.addf %22, %27 : vector<192x128xf32>
    %c0_32 = arith.constant 0 : index
    %c0_33 = arith.constant 0 : index
    %c26 = arith.constant 26 : index
    %c0_34 = arith.constant 0 : index
    %29 = vector.load %arg2[%c0_32, %c0_33, %c26, %c0_34] : memref<1x1x248x32xbf16, #tpu.memory_space<vmem>>, vector<1x1x192x32xbf16>
    %30 = vector.shape_cast %29 : vector<1x1x192x32xbf16> to vector<192x32xbf16>
    %c5 = arith.constant 5 : index
    %c0_35 = arith.constant 0 : index
    %c0_36 = arith.constant 0 : index
    %31 = vector.load %arg3[%c5, %c0_35, %c0_36] : memref<9x32x128xbf16, #tpu.memory_space<vmem>>, vector<1x32x128xbf16>
    %32 = vector.shape_cast %31 : vector<1x32x128xbf16> to vector<32x128xbf16>
    %cst_37 = arith.constant dense<0.000000e+00> : vector<192x128xf32>
    %33 = tpu.matmul %30, %32, %cst_37 {dimension_numbers = #tpu.dot_dimension_numbers<[1], [0], [0], [1], [0, 0, 1, 1], [], []>} : vector<192x32xbf16>, vector<32x128xbf16>, vector<192x128xf32> -> vector<192x128xf32>
    %34 = arith.addf %28, %33 : vector<192x128xf32>
    %c0_38 = arith.constant 0 : index
    %c0_39 = arith.constant 0 : index
    %c48 = arith.constant 48 : index
    %c0_40 = arith.constant 0 : index
    %35 = vector.load %arg2[%c0_38, %c0_39, %c48, %c0_40] : memref<1x1x248x32xbf16, #tpu.memory_space<vmem>>, vector<1x1x192x32xbf16>
    %36 = vector.shape_cast %35 : vector<1x1x192x32xbf16> to vector<192x32xbf16>
    %c6 = arith.constant 6 : index
    %c0_41 = arith.constant 0 : index
    %c0_42 = arith.constant 0 : index
    %37 = vector.load %arg3[%c6, %c0_41, %c0_42] : memref<9x32x128xbf16, #tpu.memory_space<vmem>>, vector<1x32x128xbf16>
    %38 = vector.shape_cast %37 : vector<1x32x128xbf16> to vector<32x128xbf16>
    %cst_43 = arith.constant dense<0.000000e+00> : vector<192x128xf32>
    %39 = tpu.matmul %36, %38, %cst_43 {dimension_numbers = #tpu.dot_dimension_numbers<[1], [0], [0], [1], [0, 0, 1, 1], [], []>} : vector<192x32xbf16>, vector<32x128xbf16>, vector<192x128xf32> -> vector<192x128xf32>
    %40 = arith.addf %34, %39 : vector<192x128xf32>
    %c0_44 = arith.constant 0 : index
    %c0_45 = arith.constant 0 : index
    %c49 = arith.constant 49 : index
    %c0_46 = arith.constant 0 : index
    %41 = vector.load %arg2[%c0_44, %c0_45, %c49, %c0_46] : memref<1x1x248x32xbf16, #tpu.memory_space<vmem>>, vector<1x1x192x32xbf16>
    %42 = vector.shape_cast %41 : vector<1x1x192x32xbf16> to vector<192x32xbf16>
    %c7 = arith.constant 7 : index
    %c0_47 = arith.constant 0 : index
    %c0_48 = arith.constant 0 : index
    %43 = vector.load %arg3[%c7, %c0_47, %c0_48] : memref<9x32x128xbf16, #tpu.memory_space<vmem>>, vector<1x32x128xbf16>
    %44 = vector.shape_cast %43 : vector<1x32x128xbf16> to vector<32x128xbf16>
    %cst_49 = arith.constant dense<0.000000e+00> : vector<192x128xf32>
    %45 = tpu.matmul %42, %44, %cst_49 {dimension_numbers = #tpu.dot_dimension_numbers<[1], [0], [0], [1], [0, 0, 1, 1], [], []>} : vector<192x32xbf16>, vector<32x128xbf16>, vector<192x128xf32> -> vector<192x128xf32>
    %46 = arith.addf %40, %45 : vector<192x128xf32>
    %c0_50 = arith.constant 0 : index
    %c0_51 = arith.constant 0 : index
    %c50 = arith.constant 50 : index
    %c0_52 = arith.constant 0 : index
    %47 = vector.load %arg2[%c0_50, %c0_51, %c50, %c0_52] : memref<1x1x248x32xbf16, #tpu.memory_space<vmem>>, vector<1x1x192x32xbf16>
    %48 = vector.shape_cast %47 : vector<1x1x192x32xbf16> to vector<192x32xbf16>
    %c8 = arith.constant 8 : index
    %c0_53 = arith.constant 0 : index
    %c0_54 = arith.constant 0 : index
    %49 = vector.load %arg3[%c8, %c0_53, %c0_54] : memref<9x32x128xbf16, #tpu.memory_space<vmem>>, vector<1x32x128xbf16>
    %50 = vector.shape_cast %49 : vector<1x32x128xbf16> to vector<32x128xbf16>
    %cst_55 = arith.constant dense<0.000000e+00> : vector<192x128xf32>
    %51 = tpu.matmul %48, %50, %cst_55 {dimension_numbers = #tpu.dot_dimension_numbers<[1], [0], [0], [1], [0, 0, 1, 1], [], []>} : vector<192x32xbf16>, vector<32x128xbf16>, vector<192x128xf32> -> vector<192x128xf32>
    %52 = arith.addf %46, %51 : vector<192x128xf32>
    %c0_56 = arith.constant 0 : index
    %c0_57 = arith.constant 0 : index
    %53 = vector.load %arg4[%c0_56, %c0_57] : memref<1x128xf32, #tpu.memory_space<vmem>>, vector<1x128xf32>
    %54 = vector.broadcast %53 : vector<1x128xf32> to vector<192x128xf32>
    %55 = arith.addf %52, %54 : vector<192x128xf32>
    %cst_58 = arith.constant 0.000000e+00 : f32
    %56 = vector.broadcast %cst_58 : f32 to vector<192x128xf32>
    %57 = arith.maximumf %55, %56 : vector<192x128xf32>
    %58 = arith.truncf %57 : vector<192x128xf32> to vector<192x128xbf16>
    %c0_59 = arith.constant 0 : index
    %c0_60 = arith.constant 0 : index
    %59 = vector.load %arg5[%c0_59, %c0_60] : memref<128x384xbf16, #tpu.memory_space<vmem>>, vector<128x384xbf16>
    %cst_61 = arith.constant dense<0.000000e+00> : vector<192x384xf32>
    %60 = tpu.matmul %58, %59, %cst_61 {dimension_numbers = #tpu.dot_dimension_numbers<[1], [0], [0], [1], [0, 0, 1, 1], [], []>} : vector<192x128xbf16>, vector<128x384xbf16>, vector<192x384xf32> -> vector<192x384xf32>
    %c0_62 = arith.constant 0 : index
    %c0_63 = arith.constant 0 : index
    %61 = vector.load %arg6[%c0_62, %c0_63] : memref<1x384xf32, #tpu.memory_space<vmem>>, vector<1x384xf32>
    %62 = vector.broadcast %61 : vector<1x384xf32> to vector<192x384xf32>
    %63 = arith.addf %60, %62 : vector<192x384xf32>
    %64 = vector.extract_strided_slice %63 {offsets = [0, 0], sizes = [192, 128], strides = [1, 1]} : vector<192x384xf32> to vector<192x128xf32>
    %cst_64 = arith.constant dense<0xFF800000> : vector<192xf32>
    %65 = vector.multi_reduction <maximumf>, %64, %cst_64 [1] : vector<192x128xf32> to vector<192xf32>
    %66 = vector.shape_cast %65 : vector<192xf32> to vector<192x1xf32>
    %67 = vector.broadcast %66 : vector<192x1xf32> to vector<192x128xf32>
    %68 = arith.subf %64, %67 : vector<192x128xf32>
    %69 = math.exp %68 : vector<192x128xf32>
    %cst_65 = arith.constant dense<0.000000e+00> : vector<192xf32>
    %70 = vector.multi_reduction <add>, %69, %cst_65 [1] : vector<192x128xf32> to vector<192xf32>
    %71 = vector.shape_cast %70 : vector<192xf32> to vector<192x1xf32>
    %72 = vector.broadcast %71 : vector<192x1xf32> to vector<192x128xf32>
    %73 = arith.divf %69, %72 : vector<192x128xf32>
    %74 = vector.extract_strided_slice %63 {offsets = [0, 256], sizes = [192, 128], strides = [1, 1]} : vector<192x384xf32> to vector<192x128xf32>
    %75 = math.absf %74 : vector<192x128xf32>
    %cst_66 = arith.constant 0.000000e+00 : f32
    %76 = vector.broadcast %cst_66 : f32 to vector<192x128xf32>
    %77 = arith.subf %76, %75 : vector<192x128xf32>
    %78 = math.exp %77 : vector<192x128xf32>
    %cst_67 = arith.constant 1.000000e+00 : f32
    %79 = vector.broadcast %cst_67 : f32 to vector<192x128xf32>
    %80 = arith.addf %79, %78 : vector<192x128xf32>
    %81 = tpu.reciprocal %80 {approx = true} : vector<192x128xf32> -> vector<192x128xf32>
    %cst_68 = arith.constant 0.000000e+00 : f32
    %82 = vector.broadcast %cst_68 : f32 to vector<192x128xf32>
    %83 = arith.cmpf oge, %74, %82 : vector<192x128xf32>
    %84 = arith.mulf %78, %81 : vector<192x128xf32>
    %85 = arith.select %83, %81, %84 : vector<192x128xi1>, vector<192x128xf32>
    %cst_69 = arith.constant 9.000000e+00 : f32
    %86 = vector.broadcast %cst_69 : f32 to vector<192x128xf32>
    %87 = arith.mulf %86, %85 : vector<192x128xf32>
    %cst_70 = arith.constant 1.000000e+00 : f32
    %88 = vector.broadcast %cst_70 : f32 to vector<192x128xf32>
    %89 = arith.addf %88, %87 : vector<192x128xf32>
    %90 = arith.truncf %73 : vector<192x128xf32> to vector<192x128xbf16>
    %c0_71 = arith.constant 0 : index
    %c0_72 = arith.constant 0 : index
    %c0_73 = arith.constant 0 : index
    %c0_74 = arith.constant 0 : index
    %91 = vector.load %arg7[%c0_71, %c0_72, %c0_73, %c0_74] : memref<1x1x192x384xbf16, #tpu.memory_space<vmem>>, vector<1x1x192x128xbf16>
    %92 = vector.shape_cast %91 : vector<1x1x192x128xbf16> to vector<192x128xbf16>
    %93 = vector.shape_cast %90 : vector<192x128xbf16> to vector<1x1x192x128xbf16>
    tpu.vector_store %arg7[%c0_71, %c0_72, %c0_73, %c0_74], %93 {strides = array<i32>} : memref<1x1x192x384xbf16, #tpu.memory_space<vmem>>, vector<1x1x192x128xbf16>,
    %94 = vector.extract_strided_slice %63 {offsets = [0, 128], sizes = [192, 128], strides = [1, 1]} : vector<192x384xf32> to vector<192x128xf32>
    %95 = arith.truncf %94 : vector<192x128xf32> to vector<192x128xbf16>
    %c0_75 = arith.constant 0 : index
    %c0_76 = arith.constant 0 : index
    %c0_77 = arith.constant 0 : index
    %c128 = arith.constant 128 : index
    %96 = vector.load %arg7[%c0_75, %c0_76, %c0_77, %c128] : memref<1x1x192x384xbf16, #tpu.memory_space<vmem>>, vector<1x1x192x128xbf16>
    %97 = vector.shape_cast %96 : vector<1x1x192x128xbf16> to vector<192x128xbf16>
    %98 = vector.shape_cast %95 : vector<192x128xbf16> to vector<1x1x192x128xbf16>
    tpu.vector_store %arg7[%c0_75, %c0_76, %c0_77, %c128], %98 {strides = array<i32>} : memref<1x1x192x384xbf16, #tpu.memory_space<vmem>>, vector<1x1x192x128xbf16>,
    %99 = arith.truncf %89 : vector<192x128xf32> to vector<192x128xbf16>
    %c0_78 = arith.constant 0 : index
    %c0_79 = arith.constant 0 : index
    %c0_80 = arith.constant 0 : index
    %c256 = arith.constant 256 : index
    %100 = vector.load %arg7[%c0_78, %c0_79, %c0_80, %c256] : memref<1x1x192x384xbf16, #tpu.memory_space<vmem>>, vector<1x1x192x128xbf16>
    %101 = vector.shape_cast %100 : vector<1x1x192x128xbf16> to vector<192x128xbf16>
    %102 = vector.shape_cast %99 : vector<192x128xbf16> to vector<1x1x192x128xbf16>
    tpu.vector_store %arg7[%c0_78, %c0_79, %c0_80, %c256], %102 {strides = array<i32>} : memref<1x1x192x384xbf16, #tpu.memory_space<vmem>>, vector<1x1x192x128xbf16>,
    return
  }
  func.func @transform_0(%arg0: i32, %arg1: i32) -> (i32, i32, i32, i32) {
    %c0_i32 = arith.constant 0 : i32
    %c0_i32_0 = arith.constant 0 : i32
    %c0_i32_1 = arith.constant 0 : i32
    return %arg0, %arg1, %c0_i32, %c0_i32_0 : i32, i32, i32, i32
  }
  func.func @transform_1(%arg0: i32, %arg1: i32) -> (i32, i32, i32) {
    %c0_i32 = arith.constant 0 : i32
    %c0_i32_0 = arith.constant 0 : i32
    %c0_i32_1 = arith.constant 0 : i32
    %c0_i32_2 = arith.constant 0 : i32
    return %c0_i32, %c0_i32_0, %c0_i32_1 : i32, i32, i32
  }
  func.func @transform_2(%arg0: i32, %arg1: i32) -> (i32, i32) {
    %c0_i32 = arith.constant 0 : i32
    %c0_i32_0 = arith.constant 0 : i32
    %c0_i32_1 = arith.constant 0 : i32
    return %c0_i32, %c0_i32_0 : i32, i32
  }
  func.func @transform_3(%arg0: i32, %arg1: i32) -> (i32, i32) {
    %c0_i32 = arith.constant 0 : i32
    %c0_i32_0 = arith.constant 0 : i32
    %c0_i32_1 = arith.constant 0 : i32
    return %c0_i32, %c0_i32_0 : i32, i32
  }
  func.func @transform_4(%arg0: i32, %arg1: i32) -> (i32, i32) {
    %c0_i32 = arith.constant 0 : i32
    %c0_i32_0 = arith.constant 0 : i32
    %c0_i32_1 = arith.constant 0 : i32
    return %c0_i32, %c0_i32_0 : i32, i32
  }
  func.func @transform_5(%arg0: i32, %arg1: i32) -> (i32, i32, i32, i32) {
    %c0_i32 = arith.constant 0 : i32
    %c0_i32_0 = arith.constant 0 : i32
    %c0_i32_1 = arith.constant 0 : i32
    return %arg0, %arg1, %c0_i32, %c0_i32_0 : i32, i32, i32, i32
  }
}

</mosaic_0001>

<bundles_post_ra>
// kernel: tpu_custom_call.1
= control target key start
LH: loop header
LB: loop body
LE: loop exit
PB: predicated region body
PF: predicated region fallthrough
CT: control target
= control target key end

     0   :  { %10 = vsyncpa [#allocation3], 0  ;;  %s7441_s0 = inlined_call_operand.vmem [shape: bf16[2,2,248,32], index: 0, kind: input, shape index: {}]   ;;  %s7442_s1 = inlined_call_operand.vmem [shape: bf16[9,32,128], index: 1, kind: input, shape index: {}]   ;;  %s7443_s2 = inlined_call_operand.vmem [shape: f32[1,128], index: 2, kind: input, shape index: {}]   ;;  %s7444_s3 = inlined_call_operand.vmem [shape: bf16[128,384], index: 3, kind: input, shape index: {}]   ;;  %s7445_s4 = inlined_call_operand.vmem [shape: f32[1,384], index: 4, kind: input, shape index: {}]   ;;  %s7446_s5 = inlined_call_operand.hbm [shape: bf16[2,2,192,384], index: 5, kind: output, shape index: {}]  }
   0x1   :  { %12 = vsyncpa [#allocation3 + $0x1], 0  ;;  %s5689_s18 = smov 0   ;;  %s5691_s19 = smov 0  }
   0x2   :  { %s5693_s20 = smov 0   ;;  %s5695_s21 = smov 0  }
   0x3   :  { %s5697_s22 = smov 0   ;;  %s5699_s23 = smov 0  }
   0x4   :  { %s5701_s24 = smov 0   ;;  %s5703_s25 = smov 0  }
   0x5 LB: > { %s4334_s26 = sadd.s32 4294967295, %s5653_s25   ;;  %s4335_s27 = sadd.s32 4294967294, %s5653_s25   ;;  %s5653_s25 = sphi %s5703_s25, %s18_s25   ;;  %s5649_s24 = sphi %s5701_s24, %s7517_s24   ;;  %s5645_s23 = sphi %s5699_s23, %s7516_s23   ;;  %s5641_s22 = sphi %s5697_s22, %s7515_s22   ;;  %s5637_s21 = sphi %s5695_s21, %s7514_s21   ;;  %s5633_s20 = sphi %s5693_s20, %s7513_s20   ;;  %s5629_s19 = sphi %s5691_s19, %s7512_s19   ;;  %s5625_s18 = sphi %s5689_s18, %s7511_s18  }
   0x6   : > { %s27_s28 = sadd.s32 1, %s5645_s23  ;;  %s30_s29 = sadd.s32 1, %s5649_s24 }
   0x7   : > { %p28_p0 = scmp.ge.s32.totalorder %s27_s28, 2  ;;  %p161_p1 = scmp.ne.s32.totalorder %s5633_s20, %s5629_s19 }
   0x8   : > { %p162_p2 = scmp.eq.s32.totalorder %s4334_s26, 3  ;;  %p167_p5 = scmp.ne.s32.totalorder %s5629_s19, %s5625_s18 }
   0x9   : > { %s7519_s28 = smov (%p28_p0, %s27_s28), 0  ;;  %s7521_s29 = smov (!%p28_p0, %s30_s29), %s5649_s24 }
   0xa   : > { %s147_s30 = ssub.s32 %s5645_s23, %s7519_s28  ;;  %p5740_p3 = por %p162_p2, %p161_p1 }
   0xb   : > { %p32_p4 = scmp.ge.s32.totalorder %s7521_s29, 2  ;;  %p168_p6 = scmp.eq.s32.totalorder %s4335_s27, 3 }
   0xc   : > { %p4338_p7 = scmp.ge.s32.totalorder %s5653_s25, 1  ;;  %p210_p9 = scmp.lt.s32.totalorder %s5653_s25, 5 }
   0xd   : > { %s7523_s29 = smov (%p32_p4, %s7521_s29), 0  ;;  %p5749_p8 = por %p168_p6, %p167_p5 }
   0xe   : > { %7451 = sst [smem:[#allocation5_spill]] %s7523_s29  ;;  %s146_s8 = ssub.s32 %s5649_s24, %s7523_s29 }
   0xf   : > { %s151_s9 = sadd.s32 1, %s5633_s20  ;;  %s148_s10 = sor.u32 %s147_s30, %s146_s8 }
  0x10   : > { %p211_p10 = pnand %p4338_p7, %p210_p9  ;;  %p149_p11 = scmp.eq.s32.totalorder %s148_s10, 0 }
  0x12   : > { %s5758_s11 = scalar_select %p149_p11, %s5633_s20, %s151_s9  }
  0x13   : > { %214 = sbr.rel (%p211_p10) target bundleno = 1064 (0x428), region = 40 }
  0x18   : > { %v5253_v0 = vld [vmem:[%s7442_s1 + $0x18] sm:$0xff]   ;;  %p242_p12 = scmp.lt.s32.totalorder %s5641_s22, 1  ;;  %v5254_v1 = vld [vmem:[%s7442_s1 + $0x8] sm:$0xff]   ;;  %p244_p13 = scmp.lt.s32.totalorder %s5637_s21, 1  ;;  %v5255_v2 = vld [vmem:[%s7442_s1 + $0x10] sm:$0xff]   ;;  %vm462_vm0 = vcmask 261120  }
  0x19   : > { %4882 = vmatprep.subr.bf16.mxu0 %v5253_v0  ;;  %4910 = vmatprep.subr.bf16.mxu1 %v5254_v1  ;;  %v5256_v3 = vld [vmem:[%s7442_s1] sm:$0xff]   ;;  %v5259_v4 = vld [vmem:[%s7442_s1 + $0x28] sm:$0xff]   ;;  %v5272_v5 = vld [vmem:[%s7442_s1 + $0x38] sm:$0xff]   ;;  %vm349_vm1 = vsmask.f32 7424  ;;  %vm802_vm2 = vcmask 1046528  }
  0x1a   : > { %s243_s26 = scalar_select %p242_p12, %s5641_s22, 1  ;;  %4883 = vmatpush3.bf16.msra.mxu0 %v5253_v0  ;;  %4911 = vmatpush3.bf16.msra.mxu1 %v5254_v1  ;;  %v5273_v8 = vld [vmem:[%s7442_s1 + $0x30] sm:$0xff]   ;;  %v5266_v31 = vld [vmem:[%s7442_s1 + $0x20] sm:$0xff]   ;;  %v5839_v40 = vld [vmem:[%s7442_s1 + $0x48] sm:$0xff]  }
  0x1b   : > { %s245_s8 = scalar_select %p244_p13, %s5637_s21, 1  ;;  %4884 = vmatprep.subr.bf16.mxu0 %v5255_v2  ;;  %4912 = vmatprep.subr.bf16.mxu1 %v5256_v3 }
  0x1c   : > { %s5176_s9 = smul.u32 62, %s243_s26  ;;  %s5656_s27 = smov [#allocation2]  }
  0x1d   : > { %s5175_s10 = smul.u32 31, %s245_s8  ;;  %s5565_s30 = sshll.u32 %s5656_s27, 4  ;;  %s5566_s30 = int_to_ptr.vmem [resolvable:$false] %s5565_s30 }
  0x1e   : > { %4885 = vmatpush3.bf16.msra.mxu0 %v5255_v2  ;;  %4913 = vmatpush3.bf16.msra.mxu1 %v5256_v3 }
  0x1f   : > { %s248_s14 = sadd.s32 %s5176_s9, %s5175_s10  ;;  %4938 = vmatprep.subr.bf16.mxu0 %v5259_v4  ;;  %4966 = vmatprep.subr.bf16.mxu1 %v5272_v5  ;;  %s5177_s9 = smul.u32 72, %s5637_s21 }
  0x20   : > { %s4339_s17 = sshll.u32 %s248_s14, 2  ;;  %s5178_s10 = smul.u32 144, %s5641_s22 }
  0x21   : > { %s5785_s29 = scalar_lea.vmem %s7441_s0, %s4339_s17 }
  0x22   : > { %v252_v6 = vld [vmem:[%s5785_s29] sm:$0xf]  ;;  %v5789_v7 = vld [vmem:[%s5785_s29 + $0x4] sm:$0xf]  ;;  %v5796_v10 = vld [vmem:[%s5785_s29 + $0x8] sm:$0xff]   ;;  %s4246_s21 = sadd.s32 %s5178_s10, %s5177_s9 }
  0x23   : > { %v4344_v9 = vcombine.low %v252_v6, %v5789_v7  ;;  %v5799_v11 = vld [vmem:[%s5785_s29 + $0x10] sm:$0xff]   ;;  %v358_v14 = vshll.u32 %v5796_v10, 16  ;;  %v362_v15 = vshrl.u32 %v5796_v10, 16  ;;  %v5808_v17 = vld [vmem:[%s5785_s29 + $0x18] sm:$0xff]   ;;  %v5812_v19 = vld [vmem:[%s5785_s29 + $0x20] sm:$0xff]   ;;  %s4661_s12 = sshll.u32 %s4246_s21, 6 }
  0x24   : > { %v366_v16 = vshll.u32 %v5799_v11, 16  ;;  %v370_v18 = vshrl.u32 %v5799_v11, 16  ;;  %v374_v23 = vshll.u32 %v5808_v17, 16  ;;  %v382_v26 = vshll.u32 %v5812_v19, 16  ;;  %v5819_v27 = vld [vmem:[%s5785_s29 + $0x28] sm:$0xff]   ;;  %v5833_v38 = vld [vmem:[%s5785_s29 + $0x30] sm:$0xff]   ;;  %s7385_s15 = scalar_lea.hbm %s7446_s5, %s4661_s12 }
  0x25   : > { %v351_v12 = vshrl.u32 %v4344_v9, 16  ;;  %v353_v13 = vshll.u32 %v4344_v9, 16  ;;  %4914 = vmatprep.mubr.msk.bf16.mxu1 %vm462_vm0, %v4344_v9  ;;  %v360_v21 = vrot.slane %v358_v14, 1  ;;  %v378_v30 = vshrl.u32 %v5808_v17, 16  ;;  %v5844_v43 = vld [vmem:[%s5785_s29 + $0x38] sm:$0xff]   ;;  %v5857_v51 = vld [vmem:[%s5785_s29 + $0x40] sm:$0xff]  }
  0x26   : > { %4915 = vmatmul.mubr.msk.bf16.vlgmr.msra.gmra.mxu1 %vm462_vm0, %v5796_v10  ;;  %v368_v22 = vrot.slane %v366_v16, 1  ;;  %v376_v29 = vrot.slane %v374_v23, 1  ;;  %v386_v34 = vshrl.u32 %v5812_v19, 16  ;;  %v390_v35 = vshll.u32 %v5819_v27, 16  ;;  %v5863_v55 = vld [vmem:[%s5785_s29 + $0x48] sm:$0xff]   ;;  %v5875_v63 = vld [vmem:[%s5785_s29 + $0x50] sm:$0xff]  }
  0x27   : > { %v355_v20 = vrot.slane %v353_v13, 1  ;;  %4918 = vmatprep.mubr.msk.bf16.mxu1 %vm462_vm0, %v5799_v11  ;;  %4967 = vmatpush3.bf16.msra.mxu1 %v5272_v5  ;;  %v364_v25 = vor.u32 %v362_v15, %v360_v21  ;;  %v384_v37 = vrot.slane %v382_v26, 1  ;;  %v398_v44 = vshll.u32 %v5833_v38, 16  ;;  %v5881_v3 = vld [vmem:[%s5785_s29 + $0x58] sm:$0xff]  }
  0x28   : > { %4968 = vmatprep.subr.bf16.mxu1 %v5273_v8  ;;  %v372_v28 = vor.u32 %v370_v18, %v368_v22  ;;  %v380_v39 = vor.u32 %v378_v30, %v376_v29  ;;  %v392_v42 = vrot.slane %v390_v35, 1  ;;  %v394_v46 = vshrl.u32 %v5819_v27, 16  ;;  %v5289_v5 = vld [vmem:[%s7442_s1 + $0x58] sm:$0xff]   ;;  %v5897_v16 = vld [vmem:[%s5785_s29 + $0x60] ss:$0 sps:$4 sm:$0x11]  }
  0x29   : > { %v356_v24 = vor.u32 %v355_v20, %v351_v12  ;;  %v369_v33 = vsel %vm349_vm1, %v364_v25, %v368_v22  ;;  %v388_v41 = vor.u32 %v386_v34, %v384_v37  ;;  %v402_v48 = vshrl.u32 %v5833_v38, 16  ;;  %v5277_v34 = vld [vmem:[%s5785_s29 + $0x14] sm:$0xff]   ;;  %v5278_v35 = vld [vmem:[%s5785_s29 + $0x1c] sm:$0xff]  }
  0x2a   : > { %v377_v36 = vsel %vm349_vm1, %v372_v28, %v376_v29  ;;  %v385_v45 = vsel %vm349_vm1, %v380_v39, %v384_v37  ;;  %v406_v49 = vshll.u32 %v5844_v43, 16  ;;  %v400_v50 = vrot.slane %v398_v44, 1  ;;  %v5276_v28 = vld [vmem:[%s5785_s29 + $0xc] sm:$0xff]   ;;  %v5932_v39 = vld [vmem:[%s7442_s1 + $0x78] sm:$0xff]   ;;  %v5279_v44 = vld [vmem:[%s5785_s29 + $0x24] sm:$0xff]  }
  0x2b   : > { %v361_v32 = vsel %vm349_vm1, %v356_v24, %v360_v21  ;;  %4969 = vmatpush3.bf16.msra.mxu1 %v5273_v8  ;;  %v393_v47 = vsel %vm349_vm1, %v388_v41, %v392_v42  ;;  %v396_v52 = vor.u32 %v394_v46, %v392_v42  ;;  %v414_v56 = vshll.u32 %v5857_v51, 16  ;;  %v793_v21 = vld [vmem:[%s5785_s29] sm:$0xe] }
  0x2c   : > { %4886 = vmatprep.mubr.msk.bf16.mxu0 %vm462_vm0, %v361_v32  ;;  %v404_v53 = vor.u32 %v402_v48, %v400_v50  ;;  %v408_v54 = vrot.slane %v406_v49, 1  ;;  %v410_v58 = vshrl.u32 %v5844_v43, 16  ;;  %v418_v60 = vshrl.u32 %v5857_v51, 16  ;;  %5022 = vmatprep.subr.bf16.mxu1 %v5289_v5  ;;  %v5283_v49 = vld [vmem:[%s5785_s29 + $0x3c] sm:$0xff]  }
  0x2d   : > { %4887 = vmatmul.mubr.msk.bf16.vlgmr.msra.gmra.mxu0 %vm462_vm0, %v369_v33  ;;  %v401_v57 = vsel %vm349_vm1, %v396_v52, %v400_v50  ;;  %v422_v61 = vshll.u32 %v5863_v55, 16  ;;  %v416_v62 = vrot.slane %v414_v56, 1  ;;  %v426_v8 = vshrl.u32 %v5863_v55, 16  ;;  %v5285_v56 = vld [vmem:[%s5785_s29 + $0x4c] sm:$0xff]  }
  0x2e   : > { %4939 = vmatpush3.bf16.msra.mxu0 %v5259_v4  ;;  %4890 = vmatprep.mubr.msk.bf16.mxu0 %vm462_vm0, %v377_v36  ;;  %v409_v59 = vsel %vm349_vm1, %v404_v53, %v408_v54  ;;  %v412_v0 = vor.u32 %v410_v58, %v408_v54  ;;  %v430_v4 = vshll.u32 %v5875_v63, 16  ;;  %v434_v12 = vshrl.u32 %v5875_v63, 16  ;;  %v5290_v36 = vld [vmem:[%s7442_s1 + $0x50] sm:$0xff]   ;;  %v5284_v54 = vld [vmem:[%s5785_s29 + $0x44] sm:$0xff]  }
  0x2f   : > { %4919 = vmatmul.mubr.msk.bf16.gmra.mxu1 %vm462_vm0, %v5808_v17  ;;  %4940 = vmatprep.subr.bf16.mxu0 %v5266_v31  ;;  %v420_v1 = vor.u32 %v418_v60, %v416_v62  ;;  %v424_v2 = vrot.slane %v422_v61, 1  ;;  %v438_v13 = vshll.u32 %v5881_v3, 16  ;;  %v442_v23 = vshrl.u32 %v5881_v3, 16  ;;  %v1320_v58 = vld [vmem:[%s5785_s29 + $0x10] sm:$0xf] }
  0x30   : > { %4922 = vmatprep.mubr.msk.bf16.mxu1 %vm462_vm0, %v5812_v19  ;;  %v417_v6 = vsel %vm349_vm1, %v412_v0, %v416_v62  ;;  %v432_v14 = vrot.slane %v430_v4, 1  ;;  %v446_v24 = vshll.u32 %v5897_v16, 16  ;;  %v4389_v26 = vcombine.low %v793_v21, %v5789_v7  ;;  %v1713_v60 = vld [vmem:[%s5785_s29 + $0xc] sm:$0xe]  ;;  %v5286_v62 = vld [vmem:[%s5785_s29 + $0x54] sm:$0xff]   ;;  %v5296_v21 = vld [vmem:[%s5785_s29 + $0x24] sm:$0xff]  }
  0x31   : > { %v425_v9 = vsel %vm349_vm1, %v420_v1, %v424_v2  ;;  %v428_v15 = vor.u32 %v426_v8, %v424_v2  ;;  %v440_v20 = vrot.slane %v438_v13, 1  ;;  %v804_v32 = vrot.slane %v5796_v10, 1  ;;  %v5292_v2 = vld [vmem:[%s5785_s29 + $0x14] sm:$0xff]  }
  0x32   : > { %4941 = vmatpush3.bf16.msra.mxu0 %v5266_v31  ;;  %v436_v18 = vor.u32 %v434_v12, %v432_v14  ;;  %v448_v30 = vrot.slane %v446_v24, 1  ;;  %v803_v31 = vrot.slane %v4389_v26, 1  ;;  %v806_v10 = vrot.slane %v5799_v11, 1  ;;  %v5282_v11 = vld [vmem:[%s7442_s1 + $0x40] sm:$0xff]  }
  0x33   : > { %4994 = vmatprep.subr.bf16.mxu0 %v5839_v40  ;;  %v433_v22 = vsel %vm349_vm1, %v428_v15, %v432_v14  ;;  %v444_v29 = vor.u32 %v442_v23, %v440_v20  ;;  %v808_v37 = vrot.slane %v5808_v17, 1  ;;  %v5280_v17 = vld [vmem:[%s5785_s29 + $0x2c] sm:$0xff]   ;;  %v812_v46 = vrot.slane %v5819_v27, 1  ;;  %v5288_v12 = vld [vmem:[%s5785_s29 + $0x64] sm:$0xff]  }
  0x34   : > { %v441_v25 = vsel %vm349_vm1, %v436_v18, %v440_v20  ;;  %v805_v7 = vsel %vm802_vm2, %v803_v31, %v804_v32  ;;  %v807_v41 = vsel %vm802_vm2, %v804_v32, %v806_v10  ;;  %v816_v50 = vrot.slane %v5844_v43, 1 }
  0x35   : > { %4891 = vmatmul.mubr.msk.bf16.gmra.mxu0 %vm462_vm0, %v385_v45  ;;  %v449_v33 = vsel %vm349_vm1, %v444_v29, %v448_v30  ;;  %v809_v42 = vsel %vm802_vm2, %v806_v10, %v808_v37  ;;  %v810_v45 = vrot.slane %v5812_v19, 1  ;;  %v5281_v19 = vld [vmem:[%s5785_s29 + $0x34] sm:$0xff]   ;;  %v4469_v1 = vcombine.low %v1713_v60, %v1320_v58 }
  0x36   : > { %4894 = vmatprep.mubr.msk.bf16.mxu0 %vm462_vm0, %v393_v47  ;;  %v5951_v47 = vld [vmem:[%s7442_s1 + $0x68] sm:$0xff]   ;;  %v824_v4 = vrot.slane %v5881_v3, 1  ;;  %v1723_v8 = vrot.slane %v5292_v2, 1  ;;  %v1420_v18 = vshll.u32 %v5292_v2, 16  ;;  %v1727_v26 = vrot.slane %v5296_v21, 1 }
  0x37   : > { %4923 = vmatmul.mubr.msk.bf16.gmra.mxu1 %vm462_vm0, %v5819_v27  ;;  %v813_v48 = vsel %vm802_vm2, %v810_v45, %v812_v46  ;;  %v814_v27 = vrot.slane %v5833_v38, 1  ;;  %v1424_v29 = vshrl.u32 %v5292_v2, 16  ;;  %v1436_v32 = vshll.u32 %v5296_v21, 16 }
  0x38   : > { %4926 = vmatprep.mubr.msk.bf16.mxu1 %vm462_vm0, %v5833_v38  ;;  %v820_v38 = vrot.slane %v5863_v55, 1  ;;  %v1422_v23 = vrot.slane %v1420_v18, 1  ;;  %v6047_v18 = vld [vmem:[%s5785_s29 + $0x1c] sm:$0xf] }
  0x39   : > { %v815_v52 = vsel %vm802_vm2, %v812_v46, %v814_v27  ;;  %v817_v53 = vsel %vm802_vm2, %v814_v27, %v816_v50  ;;  %v5299_v27 = vld [vmem:[%s5785_s29 + $0x3c] sm:$0xff]  }
  0x3d   : > { %4895 = vmatmul.mubr.msk.bf16.gmra.mxu0 %vm462_vm0, %v401_v57  ;;  %v818_v57 = vrot.slane %v5857_v51, 1 }
  0x3e   : > { %4898 = vmatprep.mubr.msk.bf16.mxu0 %vm462_vm0, %v409_v59 }
  0x3f   : > { %4927 = vmatmul.mubr.msk.bf16.gmra.mxu1 %vm462_vm0, %v5844_v43  ;;  %v1319_v43 = vld [vmem:[%s5785_s29 + $0xc] sm:$0xf]  ;;  %v819_v59 = vsel %vm802_vm2, %v816_v50, %v818_v57  ;;  %v821_v61 = vsel %vm802_vm2, %v818_v57, %v820_v38 }
  0x40   : > { %4930 = vmatprep.mubr.msk.bf16.mxu1 %vm462_vm0, %v5857_v51  ;;  %v4438_v0 = vcombine.low %v1319_v43, %v1320_v58  ;;  %v5287_v51 = vld [vmem:[%s5785_s29 + $0x5c] sm:$0xff]   ;;  %v6030_v57 = vld [vmem:[%s7442_s1 + $0x88] sm:$0xff]   ;;  %v1460_v43 = vshll.u32 %v5299_v27, 16 }
  0x42   : > { %v1413_v13 = vshrl.u32 %v4438_v0, 16 }
  0x45   : > { %4899 = vmatmul.mubr.msk.bf16.gmra.mxu0 %vm462_vm0, %v417_v6  ;;  %v1722_v6 = vrot.slane %v4469_v1, 1  ;;  %v5302_v1 = vld [vmem:[%s5785_s29 + $0x4c] sm:$0xff]  }
  0x46   : > { %4902 = vmatprep.mubr.msk.bf16.mxu0 %vm462_vm0, %v425_v9 }
  0x47   : > { %4931 = vmatmul.mubr.msk.bf16.gmra.mxu1 %vm462_vm0, %v5863_v55  ;;  %v822_v55 = vrot.slane %v5875_v63, 1  ;;  %v1724_v20 = vsel %vm802_vm2, %v1722_v6, %v1723_v8  ;;  %v5303_v6 = vld [vmem:[%s5785_s29 + $0x54] sm:$0xff]  }
  0x48   : > { %4934 = vmatprep.mubr.msk.bf16.mxu1 %vm462_vm0, %v5875_v63  ;;  %v5294_v63 = vld [vmem:[%s5785_s29 + $0x1c] sm:$0xff]  }
  0x49   : > { %v823_v9 = vsel %vm802_vm2, %v820_v38, %v822_v55  ;;  %v825_v14 = vsel %vm802_vm2, %v822_v55, %v824_v4  ;;  %v1725_v24 = vrot.slane %v5294_v63, 1  ;;  %v1432_v31 = vshrl.u32 %v5294_v63, 16 }
  0x4a   : > { %v1733_v38 = vrot.slane %v5299_v27, 1 }
  0x4d   : > { %4903 = vmatmul.mubr.msk.bf16.gmra.mxu0 %vm462_vm0, %v433_v22 }
  0x4e   : > { %4906 = vmatprep.mubr.msk.bf16.mxu0 %vm462_vm0, %v441_v25  ;;  %v1428_v25 = vshll.u32 %v5294_v63, 16 }
  0x4f   : > { %4935 = vmatmul.mubr.msk.bf16.gmra.mxu1 %vm462_vm0, %v5881_v3  ;;  %v826_v3 = vrot.slane %v5897_v16, 1  ;;  %v1726_v16 = vsel %vm802_vm2, %v1723_v8, %v1725_v24  ;;  %v1737_v8 = vrot.slane %v5302_v1, 1 }
  0x50   : > { %4970 = vmatprep.mubr.msk.bf16.mxu1 %vm462_vm0, %v5276_v28 }
  0x51   : > { %v827_v28 = vsel %vm802_vm2, %v824_v4, %v826_v3 }
  0x55   : > { %4907 = vmatmul.mubr.msk.bf16.gmra.mxu0 %vm462_vm0, %v449_v33  ;;  %v1430_v33 = vrot.slane %v1428_v25, 1 }
  0x56   : > { %4942 = vmatprep.mubr.msk.bf16.mxu0 %vm462_vm0, %v805_v7  ;;  %v5297_v7 = vld [vmem:[%s5785_s29 + $0x2c] sm:$0xff]  }
  0x57   : > { %4971 = vmatmul.mubr.msk.bf16.vlgmr.msra.gmra.mxu1 %vm462_vm0, %v5277_v34  ;;  %v1728_v34 = vsel %vm802_vm2, %v1725_v24, %v1727_v26  ;;  %v1434_v10 = vor.u32 %v1432_v31, %v1430_v33 }
  0x58   : > { %4974 = vmatprep.mubr.msk.bf16.mxu1 %vm462_vm0, %v5278_v35  ;;  %5023 = vmatpush3.bf16.msra.mxu1 %v5289_v5  ;;  %v1415_v5 = vshll.u32 %v4438_v0, 16  ;;  %v5308_v35 = vld [vmem:[%s7442_s1 + $0x70] sm:$0xff]  }
  0x59   : > { %5024 = vmatprep.subr.bf16.mxu1 %v5290_v36 }
  0x5a   : > { %v1417_v15 = vrot.slane %v1415_v5, 1 }
  0x5c   : > { %5025 = vmatpush3.bf16.msra.mxu1 %v5290_v36  ;;  %v1418_v22 = vor.u32 %v1417_v15, %v1413_v13  ;;  %v1426_v36 = vor.u32 %v1424_v29, %v1422_v23  ;;  %v2238_v15 = vld [vmem:[%s5785_s29 + $0x18] sm:$0xf] }
  0x5d   : > { %4943 = vmatmul.mubr.msk.bf16.vlgmr.msra.gmra.mxu0 %vm462_vm0, %v807_v41  ;;  %5078 = vmatprep.subr.bf16.mxu1 %v5932_v39  ;;  %v5298_v41 = vld [vmem:[%s5785_s29 + $0x34] sm:$0xff]   ;;  %v4518_v25 = vcombine.low %v2238_v15, %v6047_v18 }
  0x5e   : > { %4995 = vmatpush3.bf16.msra.mxu0 %v5839_v40  ;;  %4946 = vmatprep.mubr.msk.bf16.mxu0 %vm462_vm0, %v809_v42  ;;  %v811_v40 = vsel %vm802_vm2, %v808_v37, %v810_v45  ;;  %v1423_v30 = vsel %vm349_vm1, %v1418_v22, %v1422_v23  ;;  %v1438_v37 = vrot.slane %v1436_v32, 1  ;;  %v1729_v42 = vrot.slane %v5297_v7, 1  ;;  %v5304_v22 = vld [vmem:[%s5785_s29 + $0x5c] sm:$0xff]  }
  0x5f   : > { %4975 = vmatmul.mubr.msk.bf16.gmra.mxu1 %vm462_vm0, %v5279_v44  ;;  %4996 = vmatprep.subr.bf16.mxu0 %v5282_v11  ;;  %v1444_v44 = vshll.u32 %v5297_v7, 16  ;;  %v1440_v45 = vshrl.u32 %v5296_v21, 16  ;;  %v1484_v21 = vshll.u32 %v5303_v6, 16  ;;  %v1492_v31 = vshll.u32 %v5304_v22, 16 }
  0x60   : > { %4978 = vmatprep.mubr.msk.bf16.mxu1 %vm462_vm0, %v5280_v17  ;;  %v1431_v17 = vsel %vm349_vm1, %v1426_v36, %v1430_v33  ;;  %v1439_v46 = vsel %vm349_vm1, %v1434_v10, %v1438_v37  ;;  %v1741_v32 = vrot.slane %v5304_v22, 1  ;;  %v6060_v33 = vld [vmem:[%s5785_s29 + $0x20] sm:$0xff]   ;;  %v1496_v10 = vshrl.u32 %v5304_v22, 16 }
  0x61   : > { %v1486_v29 = vrot.slane %v1484_v21, 1  ;;  %v6108_v21 = vld [vmem:[%s5785_s29 + $0x48] sm:$0xff]   ;;  %v5311_v22 = vld [vmem:[%s5785_s29 + $0x20] sm:$0xff]  }
  0x62   : > { %4997 = vmatpush3.bf16.msra.mxu0 %v5282_v11  ;;  %v1731_v11 = vrot.slane %v5298_v41, 1 }
  0x63   : > { %5050 = vmatprep.subr.bf16.mxu0 %v5951_v47 }
  0x64   : > { %v1732_v50 = vsel %vm802_vm2, %v1729_v42, %v1731_v11  ;;  %v1734_v0 = vsel %vm802_vm2, %v1731_v11, %v1733_v38  ;;  %v2332_v11 = vshrl.u32 %v4518_v25, 16 }
  0x65   : > { %4947 = vmatmul.mubr.msk.bf16.gmra.mxu0 %vm462_vm0, %v811_v40  ;;  %v1448_v40 = vshrl.u32 %v5297_v7, 16  ;;  %v2334_v7 = vshll.u32 %v4518_v25, 16  ;;  %v6113_v25 = vld [vmem:[%s5785_s29 + $0x50] sm:$0xff]  }
  0x66   : > { %4950 = vmatprep.mubr.msk.bf16.mxu0 %vm462_vm0, %v813_v48  ;;  %v1452_v48 = vshll.u32 %v5298_v41, 16 }
  0x67   : > { %4979 = vmatmul.mubr.msk.bf16.gmra.mxu1 %vm462_vm0, %v5281_v19  ;;  %v5301_v19 = vld [vmem:[%s7442_s1 + $0x60] sm:$0xff]  }
  0x68   : > { %4982 = vmatprep.mubr.msk.bf16.mxu1 %vm462_vm0, %v5283_v49  ;;  %v1730_v49 = vsel %vm802_vm2, %v1727_v26, %v1729_v42 }
  0x6d   : > { %4951 = vmatmul.mubr.msk.bf16.gmra.mxu0 %vm462_vm0, %v815_v52  ;;  %v1442_v52 = vor.u32 %v1440_v45, %v1438_v37  ;;  %v2339_v45 = vshll.u32 %v6060_v33, 16 }
  0x6e   : > { %4954 = vmatprep.mubr.msk.bf16.mxu0 %vm462_vm0, %v817_v53 }
  0x6f   : > { %4983 = vmatmul.mubr.msk.bf16.gmra.mxu1 %vm462_vm0, %v5284_v54  ;;  %v1454_v54 = vrot.slane %v1452_v48, 1 }
  0x70   : > { %4986 = vmatprep.mubr.msk.bf16.mxu1 %vm462_vm0, %v5285_v56  ;;  %v5300_v56 = vld [vmem:[%s5785_s29 + $0x44] sm:$0xff]  }
  0x75   : > { %4955 = vmatmul.mubr.msk.bf16.gmra.mxu0 %vm462_vm0, %v819_v59  ;;  %v1456_v59 = vshrl.u32 %v5298_v41, 16  ;;  %v1494_v41 = vrot.slane %v1492_v31, 1 }
  0x76   : > { %4958 = vmatprep.mubr.msk.bf16.mxu0 %vm462_vm0, %v821_v61  ;;  %v1464_v61 = vshrl.u32 %v5299_v27, 16 }
  0x77   : > { %4987 = vmatmul.mubr.msk.bf16.gmra.mxu1 %vm462_vm0, %v5286_v62  ;;  %v1468_v62 = vshll.u32 %v5300_v56, 16  ;;  %v1458_v2 = vor.u32 %v1456_v59, %v1454_v54  ;;  %v1498_v48 = vor.u32 %v1496_v10, %v1494_v41  ;;  %v5316_v10 = vld [vmem:[%s5785_s29 + $0x30] sm:$0xff]  }
  0x78   : > { %4990 = vmatprep.mubr.msk.bf16.mxu1 %vm462_vm0, %v5287_v51  ;;  %v1462_v51 = vrot.slane %v1460_v43, 1 }
  0x79   : > { %v1470_v5 = vrot.slane %v1468_v62, 1 }
  0x7a   : > { %v1466_v4 = vor.u32 %v1464_v61, %v1462_v51  ;;  %v1463_v13 = vsel %vm349_vm1, %v1458_v2, %v1462_v51 }
  0x7c   : > { %v1471_v63 = vsel %vm349_vm1, %v1466_v4, %v1470_v5 }
  0x7d   : > { %4959 = vmatmul.mubr.msk.bf16.gmra.mxu0 %vm462_vm0, %v823_v9  ;;  %v1476_v9 = vshll.u32 %v5302_v1, 16 }
  0x7e   : > { %4962 = vmatprep.mubr.msk.bf16.mxu0 %vm462_vm0, %v825_v14  ;;  %v1472_v14 = vshrl.u32 %v5300_v56, 16 }
  0x7f   : > { %4991 = vmatmul.mubr.msk.bf16.gmra.mxu1 %vm462_vm0, %v5288_v12  ;;  %v1739_v12 = vrot.slane %v5303_v6, 1  ;;  %v1478_v23 = vrot.slane %v1476_v9, 1 }
  0x80   : > { %5026 = vmatprep.mubr.msk.bf16.mxu1 %vm462_vm0, %v1724_v20  ;;  %v1480_v20 = vshrl.u32 %v5302_v1, 16  ;;  %v1474_v26 = vor.u32 %v1472_v14, %v1470_v5  ;;  %v6090_v1 = vld [vmem:[%s5785_s29 + $0x38] sm:$0xff]   ;;  %v6094_v5 = vld [vmem:[%s5785_s29 + $0x40] sm:$0xff]  }
  0x81   : > { %v1740_v24 = vsel %vm802_vm2, %v1737_v8, %v1739_v12  ;;  %v1742_v42 = vsel %vm802_vm2, %v1739_v12, %v1741_v32  ;;  %v2363_v9 = vshll.u32 %v6090_v1, 16  ;;  %v2367_v15 = vshrl.u32 %v6090_v1, 16 }
  0x82   : > { %v2375_v31 = vshrl.u32 %v6094_v5, 16 }
  0x85   : > { %4963 = vmatmul.mubr.msk.bf16.gmra.mxu0 %vm462_vm0, %v827_v28  ;;  %v1482_v28 = vor.u32 %v1480_v20, %v1478_v23  ;;  %v2365_v20 = vrot.slane %v2363_v9, 1 }
  0x86   : > { %4998 = vmatprep.mubr.msk.bf16.mxu0 %vm462_vm0, %v1423_v30  ;;  %v5305_v30 = vld [vmem:[%s5785_s29 + $0x64] sm:$0xff]  }
  0x87   : > { %5027 = vmatmul.mubr.msk.bf16.vlgmr.msra.gmra.mxu1 %vm462_vm0, %v1726_v16  ;;  %v1743_v16 = vrot.slane %v5305_v30, 1  ;;  %v1487_v36 = vsel %vm349_vm1, %v1482_v28, %v1486_v29  ;;  %v1500_v37 = vshll.u32 %v5305_v30, 16  ;;  %v2379_v28 = vshll.u32 %v6108_v21, 16 }
  0x88   : > { %5030 = vmatprep.mubr.msk.bf16.mxu1 %vm462_vm0, %v1728_v34  ;;  %5079 = vmatpush3.bf16.msra.mxu1 %v5932_v39  ;;  %v1446_v39 = vrot.slane %v1444_v44, 1  ;;  %v1479_v34 = vsel %vm349_vm1, %v1474_v26, %v1478_v23  ;;  %v2369_v23 = vor.u32 %v2367_v15, %v2365_v20  ;;  %v5315_v26 = vld [vmem:[%s5785_s29 + $0x28] sm:$0xff]   ;;  %v2632_v15 = vld [vmem:[%s5785_s29 + $0x18] sm:$0xe] }
  0x89   : > { %5080 = vmatprep.subr.bf16.mxu1 %v5308_v35  ;;  %v1744_v44 = vsel %vm802_vm2, %v1741_v32, %v1743_v16 }
  0x8a   : > { %v1450_v53 = vor.u32 %v1448_v40, %v1446_v39  ;;  %v1447_v58 = vsel %vm349_vm1, %v1442_v52, %v1446_v39  ;;  %v5306_v40 = vld [vmem:[%s5785_s29 + $0x6c] ss:$0 sps:$4 sm:$0x11]   ;;  %v6076_v52 = vld [vmem:[%s5785_s29 + $0x30] sm:$0xff]  }
  0x8b   : > { %v1745_v39 = vrot.slane %v5306_v40, 1  ;;  %v2355_v61 = vshll.u32 %v6076_v52, 16 }
  0x8c   : > { %5081 = vmatpush3.bf16.msra.mxu1 %v5308_v35  ;;  %v1455_v60 = vsel %vm349_vm1, %v1450_v53, %v1454_v54  ;;  %v1488_v35 = vshrl.u32 %v5303_v6, 16  ;;  %v1504_v54 = vshrl.u32 %v5305_v30, 16 }
  0x8d   : > { %4999 = vmatmul.mubr.msk.bf16.vlgmr.msra.gmra.mxu0 %vm462_vm0, %v1431_v17  ;;  %v2336_v17 = vrot.slane %v2334_v7, 1  ;;  %v2357_v4 = vrot.slane %v2355_v61, 1  ;;  %v2387_v7 = vshll.u32 %v6113_v25, 16 }
  0x8e   : > { %5051 = vmatpush3.bf16.msra.mxu0 %v5951_v47  ;;  %5002 = vmatprep.mubr.msk.bf16.mxu0 %vm462_vm0, %v1439_v46  ;;  %v1735_v47 = vrot.slane %v5300_v56, 1  ;;  %v1490_v46 = vor.u32 %v1488_v35, %v1486_v29  ;;  %v1508_v56 = vshll.u32 %v5306_v40, 16  ;;  %v5324_v29 = vld [vmem:[%s7442_s1 + $0x80] sm:$0xff]   ;;  %v6130_v35 = vld [vmem:[%s5785_s29 + $0x58] sm:$0xff]  }
  0x8f   : > { %5031 = vmatmul.mubr.msk.bf16.gmra.mxu1 %vm462_vm0, %v1730_v49  ;;  %5052 = vmatprep.subr.bf16.mxu0 %v5301_v19  ;;  %v6072_v49 = vld [vmem:[%s5785_s29 + $0x28] sm:$0xff]   ;;  %v2337_v27 = vor.u32 %v2336_v17, %v2332_v11  ;;  %v2391_v17 = vshrl.u32 %v6113_v25, 16 }
  0x90   : > { %5034 = vmatprep.mubr.msk.bf16.mxu1 %vm462_vm0, %v1732_v50  ;;  %v1736_v55 = vsel %vm802_vm2, %v1733_v38, %v1735_v47  ;;  %v1738_v3 = vsel %vm802_vm2, %v1735_v47, %v1737_v8  ;;  %v2341_v50 = vrot.slane %v2339_v45, 1  ;;  %v1495_v53 = vsel %vm349_vm1, %v1490_v46, %v1494_v41  ;;  %v5309_v8 = vld [vmem:[%s5785_s29 + $0x18] sm:$0xff]  }
  0x91   : > { %v2347_v43 = vshll.u32 %v6072_v49, 16  ;;  %v1746_v47 = vsel %vm802_vm2, %v1743_v16, %v1745_v39  ;;  %v2383_v16 = vshrl.u32 %v6108_v21, 16  ;;  %v2389_v41 = vrot.slane %v2387_v7, 1 }
  0x92   : > { %5053 = vmatpush3.bf16.msra.mxu0 %v5301_v19  ;;  %v1502_v19 = vrot.slane %v1500_v37, 1  ;;  %v2342_v59 = vsel %vm349_vm1, %v2337_v27, %v2341_v50  ;;  %v2399_v46 = vshrl.u32 %v6130_v35, 16  ;;  %v5320_v27 = vld [vmem:[%s5785_s29 + $0x40] sm:$0xff]  }
  0x93   : > { %5106 = vmatprep.subr.bf16.mxu0 %v6030_v57  ;;  %v2349_v51 = vrot.slane %v2347_v43, 1  ;;  %v2393_v39 = vor.u32 %v2391_v17, %v2389_v41 }
  0x94   : > { %v1503_v38 = vsel %vm349_vm1, %v1498_v48, %v1502_v19  ;;  %v1506_v62 = vor.u32 %v1504_v54, %v1502_v19  ;;  %v6148_v19 = vld [vmem:[%s5785_s29 + $0x68] sm:$0xff]   ;;  %v6153_v54 = vld [vmem:[%s5785_s29 + $0x70] sm:$0xff]  }
  0x95   : > { %5003 = vmatmul.mubr.msk.bf16.gmra.mxu0 %vm462_vm0, %v1447_v58  ;;  %v2343_v58 = vshrl.u32 %v6060_v33, 16 }
  0x96   : > { %5006 = vmatprep.mubr.msk.bf16.mxu0 %vm462_vm0, %v1455_v60  ;;  %v2351_v60 = vshrl.u32 %v6072_v49, 16 }
  0x97   : > { %5035 = vmatmul.mubr.msk.bf16.gmra.mxu1 %vm462_vm0, %v1734_v0  ;;  %v1510_v0 = vrot.slane %v1508_v56, 1  ;;  %v5323_v56 = vld [vmem:[%s5785_s29 + $0x48] sm:$0xff]  }
  0x98   : > { %5038 = vmatprep.mubr.msk.bf16.mxu1 %vm462_vm0, %v1736_v55  ;;  %v2345_v55 = vor.u32 %v2343_v58, %v2341_v50  ;;  %v2353_v2 = vor.u32 %v2351_v60, %v2349_v51  ;;  %v2419_v60 = vshll.u32 %v6153_v54, 16 }
  0x99   : > { %v1511_v6 = vsel %vm349_vm1, %v1506_v62, %v1510_v0  ;;  %v6167_v0 = vld [vmem:[%s5785_s29 + $0x78] ss:$0 sps:$4 sm:$0x11]  }
  0x9a   : > { %v2350_v12 = vsel %vm349_vm1, %v2345_v55, %v2349_v51  ;;  %v2358_v14 = vsel %vm349_vm1, %v2353_v2, %v2357_v4  ;;  %v5325_v51 = vld [vmem:[%s5785_s29 + $0x50] sm:$0xff]   ;;  %v2421_v2 = vrot.slane %v2419_v60, 1  ;;  %v2427_v9 = vshll.u32 %v6167_v0, 16 }
  0x9d   : > { %5007 = vmatmul.mubr.msk.bf16.gmra.mxu0 %vm462_vm0, %v1463_v13  ;;  %v2359_v13 = vshrl.u32 %v6076_v52, 16 }
  0x9e   : > { %5010 = vmatprep.mubr.msk.bf16.mxu0 %vm462_vm0, %v1471_v63  ;;  %v2371_v63 = vshll.u32 %v6094_v5, 16 }
  0x9f   : > { %5039 = vmatmul.mubr.msk.bf16.gmra.mxu1 %vm462_vm0, %v1738_v3  ;;  %v2361_v3 = vor.u32 %v2359_v13, %v2357_v4  ;;  %v5328_v4 = vld [vmem:[%s5785_s29 + $0x58] sm:$0xff]  }
  0xa0   : > { %5042 = vmatprep.mubr.msk.bf16.mxu1 %vm462_vm0, %v1740_v24  ;;  %v2373_v24 = vrot.slane %v2371_v63, 1  ;;  %v5329_v63 = vld [vmem:[%s5785_s29 + $0x60] sm:$0xff]  }
  0xa1   : > { %v2366_v30 = vsel %vm349_vm1, %v2361_v3, %v2365_v20  ;;  %v5332_v20 = vld [vmem:[%s5785_s29 + $0x68] sm:$0xff]   ;;  %v4549_v3 = vcombine.low %v2632_v15, %v6047_v18  ;;  %v2644_v18 = vrot.slane %v6072_v49, 1 }
  0xa2   : > { %v2374_v32 = vsel %vm349_vm1, %v2369_v23, %v2373_v24 }
  0xa3   : > { %v2641_v23 = vrot.slane %v4549_v3, 1 }
  0xa5   : > { %5011 = vmatmul.mubr.msk.bf16.gmra.mxu0 %vm462_vm0, %v1479_v34  ;;  %v2381_v34 = vrot.slane %v2379_v28, 1 }
  0xa6   : > { %5014 = vmatprep.mubr.msk.bf16.mxu0 %vm462_vm0, %v1487_v36  ;;  %v2377_v36 = vor.u32 %v2375_v31, %v2373_v24  ;;  %v2642_v24 = vrot.slane %v6060_v33, 1 }
  0xa7   : > { %5043 = vmatmul.mubr.msk.bf16.gmra.mxu1 %vm462_vm0, %v1742_v42  ;;  %v2385_v37 = vor.u32 %v2383_v16, %v2381_v34  ;;  %v6135_v42 = vld [vmem:[%s5785_s29 + $0x60] sm:$0xff]  }
  0xa8   : > { %5046 = vmatprep.mubr.msk.bf16.mxu1 %vm462_vm0, %v1744_v44  ;;  %v5319_v44 = vld [vmem:[%s5785_s29 + $0x38] sm:$0xff]   ;;  %v2382_v11 = vsel %vm349_vm1, %v2377_v36, %v2381_v34  ;;  %v2403_v40 = vshll.u32 %v6135_v42, 16  ;;  %v2643_v28 = vsel %vm802_vm2, %v2641_v23, %v2642_v24 }
  0xa9   : > { %v2390_v45 = vsel %vm349_vm1, %v2385_v37, %v2389_v41 }
  0xad   : > { %5015 = vmatmul.mubr.msk.bf16.gmra.mxu0 %vm462_vm0, %v1495_v53  ;;  %v2405_v53 = vrot.slane %v2403_v40, 1 }
  0xae   : > { %5018 = vmatprep.mubr.msk.bf16.mxu0 %vm462_vm0, %v1503_v38  ;;  %v2411_v38 = vshll.u32 %v6148_v19, 16 }
  0xaf   : > { %5047 = vmatmul.mubr.msk.bf16.gmra.mxu1 %vm462_vm0, %v1746_v47  ;;  %v2407_v47 = vshrl.u32 %v6135_v42, 16 }
  0xb0   : > { %5082 = vmatprep.mubr.msk.bf16.mxu1 %vm462_vm0, %v2342_v59  ;;  %v2415_v59 = vshrl.u32 %v6148_v19, 16  ;;  %v2413_v61 = vrot.slane %v2411_v38, 1 }
  0xb1   : > { %v2409_v62 = vor.u32 %v2407_v47, %v2405_v53 }
  0xb2   : > { %v2417_v55 = vor.u32 %v2415_v59, %v2413_v61 }
  0xb5   : > { %5019 = vmatmul.mubr.msk.bf16.gmra.mxu0 %vm462_vm0, %v1511_v6  ;;  %v2414_v6 = vsel %vm349_vm1, %v2409_v62, %v2413_v61 }
  0xb6   : > { %5054 = vmatprep.mubr.msk.bf16.mxu0 %vm462_vm0, %v5309_v8  ;;  %v2423_v8 = vshrl.u32 %v6153_v54, 16 }
  0xb7   : > { %5083 = vmatmul.mubr.msk.bf16.vlgmr.msra.gmra.mxu1 %vm462_vm0, %v2350_v12  ;;  %v2422_v12 = vsel %vm349_vm1, %v2417_v55, %v2421_v2 }
  0xb8   : > { %5086 = vmatprep.mubr.msk.bf16.mxu1 %vm462_vm0, %v2358_v14  ;;  %v2425_v13 = vor.u32 %v2423_v8, %v2421_v2  ;;  %v2429_v14 = vrot.slane %v2427_v9, 1 }
  0xbd   : > { %5055 = vmatmul.mubr.msk.bf16.vlgmr.msra.gmra.mxu0 %vm462_vm0, %v5311_v22  ;;  %v2430_v22 = vsel %vm349_vm1, %v2425_v13, %v2429_v14 }
  0xbe   : > { %5107 = vmatpush3.bf16.msra.mxu0 %v6030_v57  ;;  %5058 = vmatprep.mubr.msk.bf16.mxu0 %vm462_vm0, %v5315_v26  ;;  %v2395_v57 = vshll.u32 %v6130_v35, 16  ;;  %v5333_v26 = vld [vmem:[%s5785_s29 + $0x70] sm:$0xff]   ;;  %s239_s29 = sand.u32 1, %s5629_s19  }
  0xbf   : > { %5087 = vmatmul.mubr.msk.bf16.gmra.mxu1 %vm462_vm0, %v2366_v30  ;;  %5108 = vmatprep.subr.bf16.mxu0 %v5324_v29  ;;  %v2646_v30 = vrot.slane %v6076_v52, 1  ;;  %v2650_v52 = vrot.slane %v6094_v5, 1  ;;  %v2652_v5 = vrot.slane %v6108_v21, 1  ;;  %s5174_s26 = smul.u32 288, %s239_s29  ;;  %s7390_s16 = scalar_lea.sflag [#allocation3], %s239_s29 }
  0xc0   : > { %5090 = vmatprep.mubr.msk.bf16.mxu1 %vm462_vm0, %v2374_v32  ;;  %v2397_v48 = vrot.slane %v2395_v57, 1  ;;  %v2645_v32 = vsel %vm802_vm2, %v2642_v24, %v2644_v18  ;;  %v2662_v24 = vrot.slane %v6153_v54, 1  ;;  %v5339_v54 = vld [vmem:[%s7444_s3 + $0xac] ss:$12 sps:$4 sm:$0xff]  }
  0xc1   : > { %v2647_v7 = vsel %vm802_vm2, %v2644_v18, %v2646_v30  ;;  %3111 = vmatprep.subr.bf16.mxu1 %v5339_v54  ;;  %s6774_s8 = scalar_lea.vmem [#allocation2], %s5174_s26  ;;  %s5567_s26 = scalar_lea.vmem %s5566_s30, 9216 }
  0xc2   : > { %5109 = vmatpush3.bf16.msra.mxu0 %v5324_v29  ;;  %v2401_v50 = vor.u32 %v2399_v46, %v2397_v48  ;;  %v2398_v43 = vsel %vm349_vm1, %v2393_v39, %v2397_v48  ;;  %s4249_s22 = sshll.u32 %s6774_s8, 4  ;;  %s7380_s22 = int_to_ptr.vmem [resolvable:$true] %s4249_s22 }
  0xc3   : > { %s5561_s17 = scalar_lea.vmem %s7380_s22, 4608  ;;  %p5568_p4 = scmp.lt.s32.totalorder %s7380_s22, %s5566_s30 }
  0xc4   : > { %v2406_v58 = vsel %vm349_vm1, %v2401_v50, %v2405_v53  ;;  %v2654_v53 = vrot.slane %v6113_v25, 1  ;;  %v2656_v25 = vrot.slane %v6130_v35, 1  ;;  %p5562_p0 = scmp.ne.s32.totalorder %s7380_s22, %s5561_s17  ;;  %p5569_p5 = scmp.lt.s32.totalorder %s5567_s26, %s5561_s17 }
  0xc5   : > { %5059 = vmatmul.mubr.msk.bf16.gmra.mxu0 %vm462_vm0, %v5316_v10  ;;  %v2648_v10 = vrot.slane %v6090_v1, 1 }
  0xc6   : > { %5062 = vmatprep.mubr.msk.bf16.mxu0 %vm462_vm0, %v5319_v44  ;;  %v2655_v61 = vsel %vm802_vm2, %v2652_v5, %v2654_v53  ;;  %v2657_v13 = vsel %vm802_vm2, %v2654_v53, %v2656_v25  ;;  %p5563_p1 = pnand %p5562_p0, %p5740_p3  ;;  %p5570_p6 = por %p5569_p5, %p5568_p4 }
  0xc7   : > { %5091 = vmatmul.mubr.msk.bf16.gmra.mxu1 %vm462_vm0, %v2382_v11  ;;  %v2649_v17 = vsel %vm802_vm2, %v2646_v30, %v2648_v10  ;;  %v2651_v40 = vsel %vm802_vm2, %v2648_v10, %v2650_v52 }
  0xc8   : > { %5094 = vmatprep.mubr.msk.bf16.mxu1 %vm462_vm0, %v2390_v45  ;;  %p5564_p2 = pneg %p5563_p1 }
  0xca   : > { %p5571_p7 = pnand %p5570_p6, %p5564_p2 }
  0xcd   : > { %5063 = vmatmul.mubr.msk.bf16.gmra.mxu0 %vm462_vm0, %v5320_v27 }
  0xce   : > { %5066 = vmatprep.mubr.msk.bf16.mxu0 %vm462_vm0, %v5323_v56 }
  0xcf   : > { %5095 = vmatmul.mubr.msk.bf16.gmra.mxu1 %vm462_vm0, %v2398_v43 }
  0xd0   : > { %5098 = vmatprep.mubr.msk.bf16.mxu1 %vm462_vm0, %v2406_v58  ;;  %v2653_v58 = vsel %vm802_vm2, %v2650_v52, %v2652_v5 }
  0xd5   : > { %5067 = vmatmul.mubr.msk.bf16.gmra.mxu0 %vm462_vm0, %v5325_v51 }
  0xd6   : > { %5070 = vmatprep.mubr.msk.bf16.mxu0 %vm462_vm0, %v5328_v4  ;;  %v2658_v4 = vrot.slane %v6135_v42, 1  ;;  %v2660_v42 = vrot.slane %v6148_v19, 1  ;;  %v5337_v19 = vld [vmem:[%s7444_s3 + $0xa8] ss:$12 sps:$4 sm:$0xff]  }
  0xd7   : > { %5099 = vmatmul.mubr.msk.bf16.gmra.mxu1 %vm462_vm0, %v2414_v6 }
  0xd8   : > { %5102 = vmatprep.mubr.msk.bf16.mxu1 %vm462_vm0, %v2422_v12  ;;  %v2661_v30 = vsel %vm802_vm2, %v2658_v4, %v2660_v42  ;;  %3112 = vmatpush1.bf16.msra.mxu1 %v5337_v19 }
  0xdd   : > { %5071 = vmatmul.mubr.msk.bf16.gmra.mxu0 %vm462_vm0, %v5329_v63  ;;  %v2659_v63 = vsel %vm802_vm2, %v2656_v25, %v2658_v4 }
  0xde   : > { %5074 = vmatprep.mubr.msk.bf16.mxu0 %vm462_vm0, %v5332_v20 }
  0xdf   : > { %5103 = vmatmul.mubr.msk.bf16.gmra.mxu1 %vm462_vm0, %v2430_v22 }
  0xe5   : > { %5075 = vmatmul.mubr.msk.bf16.gmra.mxu0 %vm462_vm0, %v5333_v26 }
  0xe6   : > { %5110 = vmatprep.mubr.msk.bf16.mxu0 %vm462_vm0, %v2643_v28  ;;  %v4916_v29 = vpop.f32.mrf.mxu1 }
  0xe8   : > { %v698_v31 = vpop.f32.mrf.mxu1 }
  0xea   : > { %v4917_v16 = vpop.f32.mrf.mxu1 }
  0xec   : > { %v6196_v34 = vpop.f32.mrf.mxu1 }
  0xed   : > { %v4888_v33 = vpop.f32.mrf.mxu0  ;;  %5111 = vmatmul.mubr.msk.bf16.vlgmr.msra.gmra.mxu0 %vm462_vm0, %v2645_v32 }
  0xee   : > { %v6199_v36 = vadd.f32 %v4916_v29, %v4888_v33  ;;  %5114 = vmatprep.mubr.msk.bf16.mxu0 %vm462_vm0, %v2647_v7 }
  0xef   : > { %v533_v49 = vpop.f32.mrf.mxu0  ;;  %v4920_v37 = vpop.f32.mrf.mxu1 }
  0xf0   : > { %v6204_v41 = vadd.f32 %v698_v31, %v533_v49  ;;  %v2664_v49 = vrot.slane %v6167_v0, 1  ;;  %v5342_v0 = vld [vmem:[%s7444_s3 + $0x94] ss:$12 sps:$4 sm:$0xff]  }
  0xf1   : > { %v4889_v44 = vpop.f32.mrf.mxu0  ;;  %v714_v57 = vpop.f32.mrf.mxu1  ;;  %3113 = vmatprep.subr.bf16.mxu1 %v5342_v0 }
  0xf2   : > { %v6206_v11 = vadd.f32 %v4917_v16, %v4889_v44  ;;  %v2663_v16 = vsel %vm802_vm2, %v2660_v42, %v2662_v24  ;;  %v5348_v42 = vld [vmem:[%s7444_s3 + $0x64] ss:$12 sps:$4 sm:$0xff]  }
  0xf3   : > { %v6209_v45 = vpop.f32.mrf.mxu0  ;;  %v4921_v46 = vpop.f32.mrf.mxu1 }
  0xf5   : > { %v4892_v48 = vpop.f32.mrf.mxu0  ;;  %5115 = vmatmul.mubr.msk.bf16.gmra.mxu0 %vm462_vm0, %v2649_v17  ;;  %v6213_v1 = vpop.f32.mrf.mxu1 }
  0xf6   : > { %v6215_v39 = vadd.f32 %v4920_v37, %v4892_v48  ;;  %5118 = vmatprep.mubr.msk.bf16.mxu0 %vm462_vm0, %v2651_v40  ;;  %v2665_v40 = vsel %vm802_vm2, %v2662_v24, %v2664_v49  ;;  %v5340_v48 = vld [vmem:[%s7444_s3 + $0x90] ss:$12 sps:$4 sm:$0xff]   ;;  %v5350_v24 = vld [vmem:[%s7444_s3 + $0x98] ss:$12 sps:$4 sm:$0xff]   ;;  %v5351_v49 = vld [vmem:[%s7444_s3 + $0x48] ss:$12 sps:$4 sm:$0xff]  }
  0xf7   : > { %v549_v27 = vpop.f32.mrf.mxu0  ;;  %v4924_v50 = vpop.f32.mrf.mxu1  ;;  %3114 = vmatpush1.bf16.msra.mxu1 %v5340_v48  ;;  %v5358_v48 = vld [vmem:[%s7444_s3 + $0x68] ss:$12 sps:$4 sm:$0xff]  }
  0xf8   : > { %v6220_v56 = vadd.f32 %v714_v57, %v549_v27 }
  0xf9   : > { %v4893_v38 = vpop.f32.mrf.mxu0  ;;  %v730_v43 = vpop.f32.mrf.mxu1 }
  0xfa   : > { %v6222_v47 = vadd.f32 %v4921_v46, %v4893_v38 }
  0xfb   : > { %v6225_v59 = vpop.f32.mrf.mxu0  ;;  %v4925_v60 = vpop.f32.mrf.mxu1 }
  0xfd   : > { %v4896_v62 = vpop.f32.mrf.mxu0  ;;  %5119 = vmatmul.mubr.msk.bf16.gmra.mxu0 %vm462_vm0, %v2653_v58  ;;  %v6229_v21 = vpop.f32.mrf.mxu1 }
  0xfe   : > { %v6231_v51 = vadd.f32 %v4924_v50, %v4896_v62  ;;  %5122 = vmatprep.mubr.msk.bf16.mxu0 %vm462_vm0, %v2655_v61  ;;  %v5343_v61 = vld [vmem:[%s7444_s3 + $0x78] ss:$12 sps:$4 sm:$0xff]   ;;  %v5345_v62 = vld [vmem:[%s7444_s3 + $0x7c] ss:$12 sps:$4 sm:$0xff]  }
  0xff   : > { %v565_v55 = vpop.f32.mrf.mxu0  ;;  %v4928_v2 = vpop.f32.mrf.mxu1  ;;  %3115 = vmatprep.subr.bf16.mxu1 %v5345_v62  ;;  %v5357_v62 = vld [vmem:[%s7444_s3 + $0x34] ss:$12 sps:$4 sm:$0xff]  }
 0x100   : > { %v6236_v6 = vadd.f32 %v730_v43, %v565_v55  ;;  %3116 = vmatpush1.bf16.msra.mxu1 %v5343_v61 }
 0x101   : > { %v4897_v8 = vpop.f32.mrf.mxu0  ;;  %v746_v9 = vpop.f32.mrf.mxu1  ;;  %3117 = vmatprep.subr.bf16.mxu1 %v5348_v42  ;;  %v5363_v42 = vld [vmem:[%s7444_s3 + $0x38] ss:$12 sps:$4 sm:$0xff]  }
 0x102   : > { %v6238_v12 = vadd.f32 %v4925_v60, %v4897_v8 }
 0x103   : > { %v6241_v14 = vpop.f32.mrf.mxu0  ;;  %v4929_v15 = vpop.f32.mrf.mxu1 }
 0x105   : > { %v4900_v20 = vpop.f32.mrf.mxu0  ;;  %5123 = vmatmul.mubr.msk.bf16.gmra.mxu0 %vm462_vm0, %v2657_v13  ;;  %v6245_v35 = vpop.f32.mrf.mxu1 }
 0x106   : > { %v6247_v3 = vadd.f32 %v4928_v2, %v4900_v20  ;;  %5126 = vmatprep.mubr.msk.bf16.mxu0 %vm462_vm0, %v2659_v63  ;;  %v5346_v20 = vld [vmem:[%s7444_s3 + $0x60] ss:$12 sps:$4 sm:$0xff]  }
 0x107   : > { %v581_v22 = vpop.f32.mrf.mxu0  ;;  %v4932_v23 = vpop.f32.mrf.mxu1  ;;  %3118 = vmatpush1.bf16.msra.mxu1 %v5346_v20 }
 0x108   : > { %v6252_v26 = vadd.f32 %v746_v9, %v581_v22  ;;  %v5349_v9 = vld [vmem:[%s7444_s3 + $0xb0] ss:$12 sps:$4 sm:$0xff]  }
 0x109   : > { %v4901_v28 = vpop.f32.mrf.mxu0  ;;  %v762_v29 = vpop.f32.mrf.mxu1  ;;  %5134 = vmatprep.subr.bf16.mxu0 %v5349_v9 }
 0x10a   : > { %v6254_v18 = vadd.f32 %v4929_v15, %v4901_v28  ;;  %5135 = vmatpush3.bf16.msra.mxu0 %v5349_v9 }
 0x10b   : > { %v6257_v31 = vpop.f32.mrf.mxu0  ;;  %v4933_v32 = vpop.f32.mrf.mxu1  ;;  %5136 = vmatprep.subr.bf16.mxu0 %v5350_v24 }
 0x10d   : > { %v4904_v7 = vpop.f32.mrf.mxu0  ;;  %5127 = vmatmul.mubr.msk.bf16.gmra.mxu0 %vm462_vm0, %v2661_v30  ;;  %v6267_v33 = vpop.f32.mrf.mxu1 }
 0x10e   : > { %v6269_v10 = vadd.f32 %v4932_v23, %v4904_v7  ;;  %5130 = vmatprep.mubr.msk.bf16.mxu0 %vm462_vm0, %v2663_v16  ;;  %5137 = vmatpush3.bf16.msra.mxu0 %v5350_v24  ;;  %v5354_v7 = vld [vmem:[%s7444_s3 + $0x80] ss:$12 sps:$4 sm:$0xff]  }
 0x10f   : > { %v597_v37 = vpop.f32.mrf.mxu0  ;;  %v4936_v52 = vpop.f32.mrf.mxu1  ;;  %5138 = vmatprep.subr.bf16.mxu0 %v5354_v7 }
 0x110   : > { %v6273_v44 = vadd.f32 %v762_v29, %v597_v37 }
 0x111   : > { %v4905_v57 = vpop.f32.mrf.mxu0  ;;  %v778_v17 = vpop.f32.mrf.mxu1 }
 0x112   : > { %v6275_v46 = vadd.f32 %v4933_v32, %v4905_v57  ;;  %5139 = vmatpush3.bf16.msra.mxu0 %v5354_v7 }
 0x113   : > { %v6284_v5 = vpop.f32.mrf.mxu0  ;;  %v4937_v27 = vpop.f32.mrf.mxu1  ;;  %5140 = vmatprep.subr.bf16.mxu0 %v5358_v48 }
 0x115   : > { %v4908_v50 = vpop.f32.mrf.mxu0  ;;  %5131 = vmatmul.mubr.msk.bf16.gmra.mxu0 %vm462_vm0, %v2665_v40  ;;  %v6287_v53 = vpop.f32.mrf.mxu1 }
 0x116   : > { %v6289_v38 = vadd.f32 %v4936_v52, %v4908_v50  ;;  %5141 = vmatpush3.bf16.msra.mxu0 %v5358_v48 }
 0x117   : > { %v613_v43 = vpop.f32.mrf.mxu0  ;;  %v4972_v58 = vpop.f32.mrf.mxu1 }
 0x118   : > { %v6291_v60 = vadd.f32 %v778_v17, %v613_v43 }
 0x119   : > { %v4909_v25 = vpop.f32.mrf.mxu0  ;;  %v1200_v55 = vpop.f32.mrf.mxu1 }
 0x11a   : > { %v6299_v2 = vadd.f32 %v4937_v27, %v4909_v25 }
 0x11b   : > { %v6301_v4 = vpop.f32.mrf.mxu0  ;;  %v4973_v8 = vpop.f32.mrf.mxu1 }
 0x11d   : > { %v4944_v13 = vpop.f32.mrf.mxu0  ;;  %v6306_v15 = vpop.f32.mrf.mxu1 }
 0x11e   : > { %v1007_v63 = vadd.f32 %v4944_v13, %v6199_v36 }
 0x11f   : > { %v910_v22 = vpop.f32.mrf.mxu0  ;;  %v4976_v23 = vpop.f32.mrf.mxu1 }
 0x120   : > { %v1005_v28 = vadd.f32 %v910_v22, %v6204_v41  ;;  %v6319_v29 = vadd.f32 %v4972_v58, %v1007_v63 }
 0x121   : > { %v4945_v36 = vpop.f32.mrf.mxu0  ;;  %v1216_v30 = vpop.f32.mrf.mxu1 }
 0x122   : > { %v1008_v32 = vadd.f32 %v4945_v36, %v6206_v11  ;;  %v6322_v16 = vadd.f32 %v1200_v55, %v1005_v28  ;;  %v5353_v11 = vld [vmem:[%s7444_s3 + $0x4c] ss:$12 sps:$4 sm:$0xff]   ;;  %v5359_v55 = vld [vmem:[%s7444_s3 + $0x50] ss:$12 sps:$4 sm:$0xff]   ;;  %v734_v36 = vadd.f32 %v6229_v21, %v6241_v14 }
 0x123   : > { %v6324_v19 = vpop.f32.mrf.mxu0  ;;  %v4977_v54 = vpop.f32.mrf.mxu1  ;;  %3119 = vmatprep.subr.bf16.mxu1 %v5353_v11  ;;  %5142 = vmatprep.subr.bf16.mxu0 %v5359_v55 }
 0x124   : > { %v6329_v41 = vadd.f32 %v4973_v8, %v1008_v32  ;;  %3120 = vmatpush1.bf16.msra.mxu1 %v5351_v49  ;;  %5143 = vmatpush3.bf16.msra.mxu0 %v5359_v55  ;;  %v5362_v32 = vld [vmem:[%s7444_s3 + $0x1c] ss:$12 sps:$4 sm:$0xff]   ;;  %v5367_v49 = vld [vmem:[%s7444_s3 + $0x20] ss:$12 sps:$4 sm:$0xff]  }
 0x125   : > { %v4948_v37 = vpop.f32.mrf.mxu0  ;;  %v6337_v52 = vpop.f32.mrf.mxu1  ;;  %3121 = vmatprep.subr.bf16.mxu1 %v5357_v62  ;;  %5144 = vmatprep.subr.bf16.mxu0 %v5363_v42  ;;  %v750_v62 = vadd.f32 %v6245_v35, %v6257_v31 }
 0x126   : > { %v1011_v57 = vadd.f32 %v4948_v37, %v6215_v39  ;;  %v5355_v39 = vld [vmem:[%s7444_s3 + $0x30] ss:$12 sps:$4 sm:$0xff]  }
 0x127   : > { %v926_v17 = vpop.f32.mrf.mxu0  ;;  %v4980_v40 = vpop.f32.mrf.mxu1 }
 0x128   : > { %v1009_v0 = vadd.f32 %v926_v17, %v6220_v56  ;;  %v6344_v27 = vadd.f32 %v4976_v23, %v1011_v57  ;;  %3122 = vmatpush1.bf16.msra.mxu1 %v5355_v39  ;;  %5145 = vmatpush3.bf16.msra.mxu0 %v5363_v42  ;;  %v5366_v17 = vld [vmem:[%s7444_s3 + $0x4] ss:$12 sps:$4 sm:$0xff]  }
 0x129   : > { %v4949_v50 = vpop.f32.mrf.mxu0  ;;  %v1232_v43 = vpop.f32.mrf.mxu1  ;;  %3123 = vmatprep.subr.bf16.mxu1 %v5362_v32  ;;  %5146 = vmatprep.subr.bf16.mxu0 %v5367_v49  ;;  %v766_v32 = vadd.f32 %v6267_v33, %v6284_v5 }
 0x12a   : > { %v1012_v58 = vadd.f32 %v4949_v50, %v6222_v47  ;;  %v6347_v61 = vadd.f32 %v1216_v30, %v1009_v0  ;;  %v5364_v0 = vld [vmem:[%s7444_s3] ss:$12 sps:$4 sm:$0xff]   ;;  %v5368_v50 = vld [vmem:[%s7444_s3 + $0x8] ss:$12 sps:$4 sm:$0xff]  }
 0x12b   : > { %v6355_v25 = vpop.f32.mrf.mxu0  ;;  %v4981_v56 = vpop.f32.mrf.mxu1 }
 0x12c   : > { %v6360_v8 = vadd.f32 %v4977_v54, %v1012_v58  ;;  %5147 = vmatpush3.bf16.msra.mxu0 %v5367_v49 }
 0x12d   : > { %v4952_v47 = vpop.f32.mrf.mxu0  ;;  %v1235_v9 = vpop.f32.mrf.mxu1  ;;  %5148 = vmatprep.subr.bf16.mxu0 %v5368_v50 }
 0x12e   : > { %v1015_v13 = vadd.f32 %v4952_v47, %v6231_v51 }
 0x12f   : > { %v942_v63 = vpop.f32.mrf.mxu0  ;;  %v4984_v20 = vpop.f32.mrf.mxu1 }
 0x130   : > { %v1013_v22 = vadd.f32 %v942_v63, %v6236_v6  ;;  %v6367_v23 = vadd.f32 %v4980_v40, %v1015_v13  ;;  %v5360_v6 = vld [vmem:[%s7444_s3 + $0x18] ss:$12 sps:$4 sm:$0xff]   ;;  %5149 = vmatpush3.bf16.msra.mxu0 %v5368_v50  ;;  %v7448_v13 = vmov 0  }
 0x131   : > { %v4953_v24 = vpop.f32.mrf.mxu0  ;;  %v1248_v28 = vpop.f32.mrf.mxu1  ;;  %3124 = vmatpush1.bf16.msra.mxu1 %v5360_v6  ;;  %3143 = vmatprep.mubr.bf16.mxu1 %v7448_v13 }
 0x132   : > { %v1016_v30 = vadd.f32 %v4953_v24, %v6238_v12  ;;  %v6372_v51 = vadd.f32 %v1232_v43, %v1013_v22  ;;  %3125 = vmatprep.subr.bf16.mxu1 %v5366_v17 }
 0x133   : > { %v945_v54 = vpop.f32.mrf.mxu0  ;;  %v4985_v7 = vpop.f32.mrf.mxu1 }
 0x134   : > { %v1014_v21 = vadd.f32 %v945_v54, %v734_v36  ;;  %v6383_v14 = vadd.f32 %v4981_v56, %v1016_v30 }
 0x135   : > { %v4956_v12 = vpop.f32.mrf.mxu0  ;;  %v1251_v11 = vpop.f32.mrf.mxu1  ;;  %3126 = vmatpush1.bf16.msra.mxu1 %v5364_v0  ;;  %v782_v0 = vadd.f32 %v6287_v53, %v6301_v4 }
 0x136   : > { %v1019_v37 = vadd.f32 %v4956_v12, %v6247_v3  ;;  %v6386_v57 = vadd.f32 %v1235_v9, %v1014_v21 }
 0x137   : > { %v958_v40 = vpop.f32.mrf.mxu0  ;;  %v4988_v48 = vpop.f32.mrf.mxu1 }
 0x138   : > { %v1017_v43 = vadd.f32 %v958_v40, %v6252_v26  ;;  %v6398_v3 = vadd.f32 %v4984_v20, %v1019_v37 }
 0x139   : > { %v4957_v58 = vpop.f32.mrf.mxu0  ;;  %v1264_v39 = vpop.f32.mrf.mxu1 }
 0x13a   : > { %v1020_v56 = vadd.f32 %v4957_v58, %v6254_v18  ;;  %v6403_v55 = vadd.f32 %v1248_v28, %v1017_v43 }
 0x13b   : > { %v961_v47 = vpop.f32.mrf.mxu0  ;;  %v4989_v9 = vpop.f32.mrf.mxu1 }
 0x13c   : > { %v1018_v26 = vadd.f32 %v961_v47, %v750_v62  ;;  %v6406_v63 = vadd.f32 %v4985_v7, %v1020_v56 }
 0x13d   : > { %v4960_v20 = vpop.f32.mrf.mxu0  ;;  %v1267_v42 = vpop.f32.mrf.mxu1 }
 0x13e   : > { %v1023_v22 = vadd.f32 %v4960_v20, %v6269_v10  ;;  %v6409_v24 = vadd.f32 %v1251_v11, %v1018_v26 }
 0x13f   : > { %v974_v35 = vpop.f32.mrf.mxu0  ;;  %v4992_v31 = vpop.f32.mrf.mxu1 }
 0x140   : > { %v1021_v18 = vadd.f32 %v974_v35, %v6273_v44  ;;  %v6412_v28 = vadd.f32 %v4988_v48, %v1023_v22 }
 0x141   : > { %v4961_v36 = vpop.f32.mrf.mxu0  ;;  %v1280_v30 = vpop.f32.mrf.mxu1 }
 0x142   : > { %v1024_v54 = vadd.f32 %v4961_v36, %v6275_v46  ;;  %v6417_v7 = vadd.f32 %v1264_v39, %v1021_v18  ;;  %v702_v39 = vadd.f32 %v6196_v34, %v6209_v45 }
 0x143   : > { %v977_v6 = vpop.f32.mrf.mxu0  ;;  %v4993_v49 = vpop.f32.mrf.mxu1 }
 0x144   : > { %v1022_v10 = vadd.f32 %v977_v6, %v766_v32  ;;  %v6419_v21 = vadd.f32 %v4989_v9, %v1024_v54  ;;  %v1006_v9 = vadd.f32 %v6324_v19, %v702_v39 }
 0x145   : > { %v4964_v12 = vpop.f32.mrf.mxu0  ;;  %v1283_v11 = vpop.f32.mrf.mxu1 }
 0x146   : > { %v1027_v44 = vadd.f32 %v4964_v12, %v6289_v38  ;;  %v6422_v37 = vadd.f32 %v1267_v42, %v1022_v10  ;;  %v1296_v42 = vadd.f32 %v6306_v15, %v1006_v9 }
 0x147   : > { %v990_v17 = vpop.f32.mrf.mxu0  ;;  %v6424_v40 = vpop.f32.mrf.mxu1 }
 0x148   : > { %v1025_v33 = vadd.f32 %v990_v17, %v6291_v60  ;;  %v6427_v5 = vadd.f32 %v4992_v31, %v1027_v44 }
 0x149   : > { %v4965_v46 = vpop.f32.mrf.mxu0  ;;  %v6429_v48 = vpop.f32.mrf.mxu1 }
 0x14a   : > { %v1028_v50 = vadd.f32 %v4965_v46, %v6299_v2  ;;  %v6434_v43 = vadd.f32 %v1280_v30, %v1025_v33 }
 0x14b   : > { %v993_v38 = vpop.f32.mrf.mxu0  ;;  %v6436_v58 = vpop.f32.mrf.mxu1 }
 0x14c   : > { %v1026_v62 = vadd.f32 %v993_v38, %v782_v0  ;;  %v6440_v60 = vadd.f32 %v4993_v49, %v1028_v50 }
 0x14d   : > { %v5000_v56 = vpop.f32.mrf.mxu0  ;;  %v6442_v47 = vpop.f32.mrf.mxu1 }
 0x14e   : > { %v6445_v26 = vadd.f32 %v1283_v11, %v1026_v62  ;;  %v6448_v53 = vadd.f32 %v5000_v56, %v6319_v29  ;;  %v718_v29 = vadd.f32 %v6213_v1, %v6225_v59 }
 0x14f   : > { %v1594_v2 = vpop.f32.mrf.mxu0  ;;  %v6450_v4 = vpop.f32.mrf.mxu1 }
 0x150   : > { %v6453_v20 = vadd.f32 %v1594_v2, %v6322_v16  ;;  %v1010_v16 = vadd.f32 %v6355_v25, %v718_v29 }
 0x151   : > { %v5001_v34 = vpop.f32.mrf.mxu0  ;;  %v6455_v45 = vpop.f32.mrf.mxu1 }
 0x152   : > { %v6459_v22 = vadd.f32 %v5001_v34, %v6329_v41  ;;  %v1300_v1 = vadd.f32 %v6337_v52, %v1010_v16 }
 0x153   : > { %v1597_v19 = vpop.f32.mrf.mxu0  ;;  %v6461_v35 = vpop.f32.mrf.mxu1 }
 0x154   : > { %v6465_v31 = vadd.f32 %v1597_v19, %v1296_v42 }
 0x155   : > { %v5004_v18 = vpop.f32.mrf.mxu0  ;;  %v6467_v36 = vpop.f32.mrf.mxu1 }
 0x156   : > { %v6471_v30 = vadd.f32 %v5004_v18, %v6344_v27 }
 0x157   : > { %v1610_v15 = vpop.f32.mrf.mxu0  ;;  %v6473_v32 = vpop.f32.mrf.mxu1 }
 0x158   : > { %v6476_v41 = vadd.f32 %v1610_v15, %v6347_v61 }
 0x159   : > { %v5005_v54 = vpop.f32.mrf.mxu0  ;;  %v6478_v6 = vpop.f32.mrf.mxu1 }
 0x15a   : > { %v6482_v59 = vadd.f32 %v5005_v54, %v6360_v8 }
 0x15b   : > { %v1613_v49 = vpop.f32.mrf.mxu0  ;;  %v6484_v10 = vpop.f32.mrf.mxu1 }
 0x15c   : > { %v6486_v25 = vadd.f32 %v1613_v49, %v1300_v1 }
 0x15d   : > { %v5008_v27 = vpop.f32.mrf.mxu0  ;;  %v6488_v12 = vpop.f32.mrf.mxu1 }
 0x15e   : > { %v6491_v11 = vadd.f32 %v5008_v27, %v6367_v23 }
 0x15f   : > { %v1626_v61 = vpop.f32.mrf.mxu0  ;;  %v6493_v44 = vpop.f32.mrf.mxu1 }
 0x160   : > { %v6496_v17 = vadd.f32 %v1626_v61, %v6372_v51 }
 0x161   : > { %v5009_v52 = vpop.f32.mrf.mxu0  ;;  %v6498_v8 = vpop.f32.mrf.mxu1 }
 0x162   : > { %v6501_v33 = vadd.f32 %v5009_v52, %v6383_v14 }
 0x163   : > { %v1629_v46 = vpop.f32.mrf.mxu0  ;;  %v6503_v0 = vpop.f32.mrf.mxu1 }
 0x164   : > { %v6506_v50 = vadd.f32 %v1629_v46, %v6386_v57 }
 0x165   : > { %v5012_v23 = vpop.f32.mrf.mxu0  ;;  %v6508_v38 = vpop.f32.mrf.mxu1 }
 0x166   : > { %7453 = vst [vmem:[#allocation6_spill] sm:$0xff] %v6508_v38  ;;  %v6511_v39 = vadd.f32 %v5012_v23, %v6398_v3 }
 0x167   : > { %v1642_v51 = vpop.f32.mrf.mxu0  ;;  %v6513_v62 = vpop.f32.mrf.mxu1 }
 0x168   : > { %7454 = vst [vmem:[#allocation7_spill] sm:$0xff] %v6513_v62  ;;  %v6516_v56 = vadd.f32 %v1642_v51, %v6403_v55 }
 0x169   : > { %v5013_v14 = vpop.f32.mrf.mxu0  ;;  %v6518_v9 = vpop.f32.mrf.mxu1 }
 0x16a   : > { %7455 = vst [vmem:[#allocation8_spill] sm:$0xff] %v6518_v9  ;;  %v6521_v2 = vadd.f32 %v5013_v14, %v6406_v63 }
 0x16b   : > { %v1645_v57 = vpop.f32.mrf.mxu0  ;;  %v6523_v34 = vpop.f32.mrf.mxu1 }
 0x16c   : > { %7456 = vst [vmem:[#allocation9_spill] sm:$0xff] %v6523_v34  ;;  %v6526_v42 = vadd.f32 %v1645_v57, %v6409_v24 }
 0x16d   : > { %v5016_v3 = vpop.f32.mrf.mxu0  ;;  %v6528_v19 = vpop.f32.mrf.mxu1 }
 0x16e   : > { %7457 = vst [vmem:[#allocation10_spill] sm:$0xff] %v6526_v42  ;;  %7458 = vst [vmem:[#allocation11_spill] sm:$0xff] %v6528_v19  ;;  %v6531_v29 = vadd.f32 %v5016_v3, %v6412_v28 }
 0x16f   : > { %v1658_v55 = vpop.f32.mrf.mxu0  ;;  %v6533_v18 = vpop.f32.mrf.mxu1 }
 0x170   : > { %7459 = vst [vmem:[#allocation12_spill] sm:$0xff] %v6531_v29  ;;  %7460 = vst [vmem:[#allocation13_spill] sm:$0xff] %v6533_v18  ;;  %v6536_v16 = vadd.f32 %v1658_v55, %v6417_v7 }
 0x171   : > { %v5017_v63 = vpop.f32.mrf.mxu0  ;;  %v6538_v15 = vpop.f32.mrf.mxu1 }
 0x172   : > { %7461 = vst [vmem:[#allocation14_spill] sm:$0xff] %v6536_v16  ;;  %7462 = vst [vmem:[#allocation15_spill] sm:$0xff] %v6538_v15  ;;  %v6541_v54 = vadd.f32 %v5017_v63, %v6419_v21 }
 0x173   : > { %v1661_v24 = vpop.f32.mrf.mxu0  ;;  %v6543_v1 = vpop.f32.mrf.mxu1 }
 0x174   : > { %7463 = vst [vmem:[#allocation16_spill] sm:$0xff] %v6541_v54  ;;  %7464 = vst [vmem:[#allocation17_spill] sm:$0xff] %v6543_v1  ;;  %v6546_v49 = vadd.f32 %v1661_v24, %v6422_v37 }
 0x175   : > { %v5020_v28 = vpop.f32.mrf.mxu0  ;;  %v6551_v52 = vpop.f32.mrf.mxu1 }
 0x176   : > { %7465 = vst [vmem:[#allocation18_spill] sm:$0xff] %v6546_v49  ;;  %v6549_v27 = vadd.f32 %v5020_v28, %v6427_v5  ;;  %7467 = vst [vmem:[#allocation20_spill] sm:$0xff] %v6551_v52 }
 0x177   : > { %v1674_v61 = vpop.f32.mrf.mxu0  ;;  %v5084_v51 = vpop.f32.mrf.mxu1 }
 0x178   : > { %7466 = vst [vmem:[#allocation19_spill] sm:$0xff] %v6549_v27  ;;  %v6554_v7 = vadd.f32 %v1674_v61, %v6434_v43 }
 0x179   : > { %v5021_v46 = vpop.f32.mrf.mxu0  ;;  %v2513_v3 = vpop.f32.mrf.mxu1 }
 0x17a   : > { %7468 = vst [vmem:[#allocation21_spill] sm:$0xff] %v6554_v7  ;;  %v6557_v21 = vadd.f32 %v5021_v46, %v6440_v60 }
 0x17b   : > { %v1677_v23 = vpop.f32.mrf.mxu0  ;;  %v5085_v63 = vpop.f32.mrf.mxu1 }
 0x17c   : > { %7469 = vst [vmem:[#allocation22_spill] sm:$0xff] %v6557_v21  ;;  %v6560_v14 = vadd.f32 %v1677_v23, %v6445_v26 }
 0x17d   : > { %v5056_v37 = vpop.f32.mrf.mxu0  ;;  %v2516_v28 = vpop.f32.mrf.mxu1 }
 0x17e   : > { %7470 = vst [vmem:[#allocation23_spill] sm:$0xff] %v6560_v14 }
 0x17f   : > { %v2119_v57 = vpop.f32.mrf.mxu0  ;;  %v5088_v61 = vpop.f32.mrf.mxu1 }
 0x181   : > { %v5057_v5 = vpop.f32.mrf.mxu0  ;;  %v2529_v60 = vpop.f32.mrf.mxu1 }
 0x183   : > { %v2122_v55 = vpop.f32.mrf.mxu0  ;;  %v6568_v26 = vpop.f32.mrf.mxu1 }
 0x185   : > { %v5060_v24 = vpop.f32.mrf.mxu0  ;;  %v6574_v15 = vpop.f32.mrf.mxu1 }
 0x187   : > { %v2135_v13 = vpop.f32.mrf.mxu0  ;;  %v6580_v27 = vpop.f32.mrf.mxu1 }
 0x189   : > { %v5061_v43 = vpop.f32.mrf.mxu0  ;;  %v6586_v34 = vpop.f32.mrf.mxu1 }
 0x18b   : > { %v2138_v52 = vpop.f32.mrf.mxu0  ;;  %v6592_v16 = vpop.f32.mrf.mxu1 }
 0x18d   : > { %v6562_v1 = vpop.f32.mrf.mxu0  ;;  %v6600_v38 = vpop.f32.mrf.mxu1 }
 0x18e   : > { %7479 = vst [vmem:[#allocation32_spill] sm:$0xff] %v6600_v38 }
 0x18f   : > { %v6564_v46 = vpop.f32.mrf.mxu0 }
 0x191   : > { %v6566_v21 = vpop.f32.mrf.mxu0 }
 0x193   : > { %v6570_v23 = vpop.f32.mrf.mxu0 }
 0x195   : > { %v6572_v14 = vpop.f32.mrf.mxu0 }
 0x197   : > { %v6576_v7 = vpop.f32.mrf.mxu0 }
 0x198   : > { %7471 = vst [vmem:[#allocation24_spill] sm:$0xff] %v6576_v7 }
 0x199   : > { %v6578_v18 = vpop.f32.mrf.mxu0 }
 0x19a   : > { %7472 = vst [vmem:[#allocation25_spill] sm:$0xff] %v6578_v18  ;;  %v1926_v18 = vadd.f32 %v6424_v40, %v6448_v53  ;;  %v1925_v40 = vadd.f32 %v6442_v47, %v6465_v31 }
 0x19b   : > { %v6582_v19 = vpop.f32.mrf.mxu0 }
 0x19c   : > { %7473 = vst [vmem:[#allocation26_spill] sm:$0xff] %v6582_v19  ;;  %v2216_v42 = vadd.f32 %v5056_v37, %v1926_v18  ;;  %v2215_v18 = vadd.f32 %v2122_v55, %v1925_v40 }
 0x19d   : > { %v6584_v49 = vpop.f32.mrf.mxu0 }
 0x19e   : > { %7474 = vst [vmem:[#allocation27_spill] sm:$0xff] %v6584_v49  ;;  %v1924_v49 = vadd.f32 %v6429_v48, %v6453_v20  ;;  %v2610_v53 = vadd.f32 %v5084_v51, %v2216_v42  ;;  %v1930_v48 = vadd.f32 %v6450_v4, %v6471_v30  ;;  %v1931_v4 = vadd.f32 %v6461_v35, %v6482_v59 }
 0x19f   : > { %v6588_v54 = vpop.f32.mrf.mxu0 }
 0x1a0   : > { %7475 = vst [vmem:[#allocation28_spill] sm:$0xff] %v6588_v54  ;;  %v2214_v7 = vadd.f32 %v2119_v57, %v1924_v49  ;;  %v6625_v49 = vld [vmem:[%s7443_s2] ss:$0 sm:$0xff]  ;;  %v2221_v57 = vadd.f32 %v5061_v43, %v1931_v4  ;;  %v1932_v43 = vadd.f32 %v6478_v6, %v6496_v17 }
 0x1a1   : > { %v6590_v9 = vpop.f32.mrf.mxu0 }
 0x1a2   : > { %7476 = vst [vmem:[#allocation29_spill] sm:$0xff] %v6590_v9  ;;  %v1927_v9 = vadd.f32 %v6436_v58, %v6459_v22  ;;  %v2608_v20 = vadd.f32 %v2513_v3, %v2214_v7  ;;  %v1928_v58 = vadd.f32 %v6455_v45, %v6476_v41  ;;  %v1929_v41 = vadd.f32 %v6467_v36, %v6486_v25 }
 0x1a3   : > { %v6594_v62 = vpop.f32.mrf.mxu0 }
 0x1a4   : > { %7477 = vst [vmem:[#allocation30_spill] sm:$0xff] %v6594_v62  ;;  %v6610_v62 = vpop.f32.mrf.mxu1  ;;  %v2217_v38 = vadd.f32 %v5057_v5, %v1927_v9  ;;  %v2220_v9 = vadd.f32 %v5060_v24, %v1930_v48  ;;  %v2218_v30 = vadd.f32 %v2135_v13, %v1928_v58  ;;  %v1934_v13 = vadd.f32 %v6473_v32, %v6491_v11 }
 0x1a5   : > { %v6596_v29 = vpop.f32.mrf.mxu0  ;;  %v2219_v59 = vadd.f32 %v2138_v52, %v1929_v41  ;;  %v2222_v58 = vadd.f32 %v6564_v46, %v1932_v43  ;;  %v1936_v41 = vadd.f32 %v6498_v8, %v6516_v56 }
 0x1a6   : > { %7478 = vst [vmem:[#allocation31_spill] sm:$0xff] %v6596_v29  ;;  %v6620_v22 = vpop.f32.mrf.mxu1  ;;  %v2611_v31 = vadd.f32 %v5085_v63, %v2217_v38  ;;  %v2614_v55 = vadd.f32 %v5088_v61, %v2220_v9  ;;  %v2612_v35 = vadd.f32 %v2529_v60, %v2218_v30  ;;  %v2615_v61 = vadd.f32 %v6568_v26, %v2221_v57 }
 0x1a7   : > { %v6602_v19 = vpop.f32.mrf.mxu0  ;;  %v2224_v48 = vadd.f32 %v6562_v1, %v1934_v13  ;;  %v1935_v60 = vadd.f32 %v6484_v10, %v6501_v33  ;;  %v1933_v1 = vadd.f32 %v6488_v12, %v6506_v50 }
 0x1a8   : > { %7480 = vst [vmem:[#allocation33_spill] sm:$0xff] %v6602_v19  ;;  %v6632_v3 = vpop.f32.mrf.mxu1 }
 0x1a9   : > { %v6606_v54 = vpop.f32.mrf.mxu0  ;;  %v2618_v9 = vadd.f32 %v6580_v27, %v2224_v48  ;;  %v2223_v12 = vadd.f32 %v6570_v23, %v1933_v1  ;;  %v7481_v27 = vmov 0   ;;  %v7490_v1 = vld [vmem:[#allocation14_spill] sm:$0xff] }
 0x1ab   : > { %v6612_v29 = vpop.f32.mrf.mxu0 }
 0x1ad   : > { %v5112_v19 = vpop.f32.mrf.mxu0 }
 0x1ae   : > { %v2845_v37 = vadd.f32 %v5112_v19, %v2610_v53  ;;  %v2609_v19 = vadd.f32 %v2516_v28, %v2215_v18 }
 0x1af   : > { %v2748_v47 = vpop.f32.mrf.mxu0 }
 0x1b0   : > { %v2843_v42 = vadd.f32 %v2748_v47, %v2608_v20  ;;  %v2876_v51 = vadd.f32 %v6625_v49, %v2845_v37  ;;  %v6643_v20 = vpop.f32.mrf.mxu1 }
 0x1b1   : > { %v5113_v7 = vpop.f32.mrf.mxu0 }
 0x1b2   : > { %v2846_v45 = vadd.f32 %v5113_v7, %v2611_v31  ;;  %v2874_v38 = vadd.f32 %v6625_v49, %v2843_v42  ;;  %v2900_v40 = vmax.f32 %v2876_v51, 0.0  ;;  %v2613_v31 = vadd.f32 %v6574_v15, %v2219_v59  ;;  %v6654_v4 = vpop.f32.mrf.mxu1  ;;  %v7483_v59 = vld [vmem:[#allocation32_spill] sm:$0xff] }
 0x1b3   : > { %v2751_v5 = vpop.f32.mrf.mxu0  ;;  %v2225_v42 = vadd.f32 %v6566_v21, %v1935_v60  ;;  %v1938_v15 = vadd.f32 %v6493_v44, %v6511_v39  ;;  %v2616_v7 = vadd.f32 %v6586_v34, %v2222_v58  ;;  %v7489_v58 = vld [vmem:[#allocation26_spill] sm:$0xff] }
 0x1b4   : > { %v2877_v63 = vadd.f32 %v6625_v49, %v2846_v45  ;;  %v2844_v24 = vadd.f32 %v2751_v5, %v2609_v19  ;;  %v2898_v37 = vmax.f32 %v2874_v38, 0.0  ;;  %v2577_v39 = vpop.f32.mrf.mxu1 }
 0x1b5   : > { %v5116_v28 = vpop.f32.mrf.mxu0  ;;  %v2619_v57 = vadd.f32 %v6592_v16, %v2225_v42  ;;  %v2228_v44 = vadd.f32 %v6572_v14, %v1938_v15  ;;  %v7484_v14 = vld [vmem:[#allocation10_spill] sm:$0xff] }
 0x1b6   : > { %v2901_v53 = vmax.f32 %v2877_v63, 0.0  ;;  %v2875_v36 = vadd.f32 %v6625_v49, %v2844_v24  ;;  %v2849_v25 = vadd.f32 %v5116_v28, %v2614_v55  ;;  %v1939_v63 = vadd.f32 %v6503_v0, %v6521_v2  ;;  %v7482_v24 = vld [vmem:[#allocation24_spill] sm:$0xff] }
 0x1b7   : > { %v2764_v18 = vpop.f32.mrf.mxu0  ;;  %v2226_v13 = vadd.f32 %v7482_v24, %v1936_v41  ;;  %v2617_v28 = vadd.f32 %v7483_v59, %v2223_v12  ;;  %v7498_v24 = vld [vmem:[#allocation29_spill] sm:$0xff] }
 0x1b8   : > { %v2923_v32 = vpack.c.bf16 %v2901_v53, %v2900_v40  ;;  %v2899_v11 = vmax.f32 %v2875_v36, 0.0  ;;  %v2847_v52 = vadd.f32 %v2764_v18, %v2612_v35  ;;  %v2880_v17 = vadd.f32 %v6625_v49, %v2849_v25  ;;  %v7485_v40 = vld [vmem:[#allocation6_spill] sm:$0xff]  ;;  %v7486_v25 = vld [vmem:[#allocation25_spill] sm:$0xff] }
 0x1b9   : > { %v5117_v47 = vpop.f32.mrf.mxu0  ;;  %v1937_v53 = vadd.f32 %v7485_v40, %v7484_v14  ;;  %v2622_v36 = vadd.f32 %v6610_v62, %v2228_v44  ;;  %v2229_v43 = vadd.f32 %v7486_v25, %v1939_v63  ;;  %v2620_v60 = vadd.f32 %v6620_v22, %v2226_v13  ;;  %v7500_v14 = vld [vmem:[#allocation13_spill] sm:$0xff] }
 0x1ba   : > { %v2922_v6 = vpack.c.bf16 %v2899_v11, %v2898_v37  ;;  %v2850_v26 = vadd.f32 %v5117_v47, %v2615_v61  ;;  %v2878_v10 = vadd.f32 %v6625_v49, %v2847_v52  ;;  %v2904_v21 = vmax.f32 %v2880_v17, 0.0  ;;  %v5101_v61 = vpop.f32.mrf.mxu1  ;;  %v7487_v37 = vld [vmem:[#allocation12_spill] sm:$0xff]  ;;  %v7488_v11 = vld [vmem:[#allocation7_spill] sm:$0xff] }
 0x1bb   : > { %v2767_v30 = vpop.f32.mrf.mxu0  ;;  %v1942_v52 = vadd.f32 %v7488_v11, %v7487_v37  ;;  %v2227_v47 = vadd.f32 %v7489_v58, %v1937_v53  ;;  %v2623_v42 = vadd.f32 %v6632_v3, %v2229_v43 }
 0x1bc   : > { %v2881_v33 = vadd.f32 %v6625_v49, %v2850_v26  ;;  %v2848_v46 = vadd.f32 %v2767_v30, %v2613_v31  ;;  %3144 = vmatmul.mubr.bf16.vlgmr.msra.gmra.mxu1 %v2922_v6  ;;  %5150 = vmatprep.mubr.bf16.mxu0 %v2922_v6  ;;  %v2902_v5 = vmax.f32 %v2878_v10, 0.0  ;;  %v7492_v30 = vld [vmem:[#allocation27_spill] sm:$0xff]  ;;  %v2580_v22 = vpop.f32.mrf.mxu1 }
 0x1bd   : > { %v5120_v50 = vpop.f32.mrf.mxu0  ;;  %5151 = vmatmul.mubr.bf16.vlgmr.msra.gmra.mxu0 %v2923_v32  ;;  %3153 = vmatprep.mubr.bf16.mxu1 %v7481_v27  ;;  %v2232_v10 = vadd.f32 %v7492_v30, %v1942_v52  ;;  %v7504_v52 = vld [vmem:[#allocation31_spill] sm:$0xff] }
 0x1be   : > { %v2905_v19 = vmax.f32 %v2881_v33, 0.0  ;;  %v2879_v51 = vadd.f32 %v6625_v49, %v2848_v46  ;;  %v2853_v45 = vadd.f32 %v5120_v50, %v2618_v9  ;;  %v7493_v50 = vld [vmem:[#allocation16_spill] sm:$0xff] }
 0x1bf   : > { %v2780_v34 = vpop.f32.mrf.mxu0  ;;  %v2626_v63 = vadd.f32 %v6654_v4, %v2232_v10 }
 0x1c0   : > { %v6668_v23 = vpack.c.bf16 %v2905_v19, %v2904_v21  ;;  %v2903_v55 = vmax.f32 %v2879_v51, 0.0  ;;  %v2851_v38 = vadd.f32 %v2780_v34, %v2616_v7  ;;  %v2884_v8 = vadd.f32 %v6625_v49, %v2853_v45  ;;  %v7494_v21 = vld [vmem:[#allocation9_spill] sm:$0xff]  ;;  %v7495_v51 = vld [vmem:[#allocation28_spill] sm:$0xff] }
 0x1c1   : > { %v5121_v35 = vpop.f32.mrf.mxu0  ;;  %v1943_v19 = vadd.f32 %v7494_v21, %v7493_v50 }
 0x1c2   : > { %v2854_v56 = vadd.f32 %v5121_v35, %v2619_v57  ;;  %v2924_v16 = vpack.c.bf16 %v2903_v55, %v2902_v5  ;;  %v2882_v0 = vadd.f32 %v6625_v49, %v2851_v38  ;;  %v2908_v62 = vmax.f32 %v2884_v8, 0.0  ;;  %v7496_v5 = vld [vmem:[#allocation18_spill] sm:$0xff]  ;;  %v7497_v55 = vld [vmem:[#allocation11_spill] sm:$0xff]  ;;  %v5104_v35 = vpop.f32.mrf.mxu1 }
 0x1c3   : > { %v2783_v48 = vpop.f32.mrf.mxu0  ;;  %v2621_v57 = vadd.f32 %v6643_v20, %v2227_v47  ;;  %v1941_v38 = vadd.f32 %v7497_v55, %v7496_v5  ;;  %v2233_v13 = vadd.f32 %v7498_v24, %v1943_v19  ;;  %v7499_v20 = vld [vmem:[#allocation19_spill] sm:$0xff] }
 0x1c4   : > { %v2885_v2 = vadd.f32 %v6625_v49, %v2854_v56  ;;  %v2852_v18 = vadd.f32 %v2783_v48, %v2617_v28  ;;  %3154 = vmatmul.mubr.bf16.gmra.mxu1 %v2923_v32  ;;  %5154 = vmatprep.mubr.bf16.mxu0 %v2924_v16  ;;  %v7491_v32 = vld [vmem:[#allocation8_spill] sm:$0xff]  ;;  %v2906_v46 = vmax.f32 %v2882_v0, 0.0  ;;  %v1946_v40 = vadd.f32 %v7500_v14, %v7499_v20  ;;  %v2593_v58 = vpop.f32.mrf.mxu1 }
 0x1c5   : > { %v5124_v31 = vpop.f32.mrf.mxu0  ;;  %5155 = vmatmul.mubr.bf16.gmra.mxu0 %v6668_v23  ;;  %3163 = vmatprep.mubr.bf16.mxu1 %v7481_v27  ;;  %v1940_v9 = vadd.f32 %v7491_v32, %v7490_v1  ;;  %v2627_v11 = vadd.f32 %v5101_v61, %v2233_v13  ;;  %v7507_v32 = vld [vmem:[#allocation33_spill] sm:$0xff]  ;;  %v7508_v61 = vld [vmem:[#allocation23_spill] sm:$0xff] }
 0x1c6   : > { %v2909_v6 = vmax.f32 %v2885_v2, 0.0  ;;  %v2883_v17 = vadd.f32 %v6625_v49, %v2852_v18  ;;  %v2857_v26 = vadd.f32 %v5124_v31, %v2622_v36  ;;  %v7501_v36 = vld [vmem:[#allocation30_spill] sm:$0xff]  ;;  %v7502_v18 = vld [vmem:[#allocation21_spill] sm:$0xff]  ;;  %v5105_v19 = vpop.f32.mrf.mxu1 }
 0x1c7   : > { %v2796_v33 = vpop.f32.mrf.mxu0  ;;  %v2230_v45 = vadd.f32 %v7495_v51, %v1940_v9  ;;  %v2231_v25 = vadd.f32 %v7501_v36, %v1941_v38 }
 0x1c8   : > { %v6692_v15 = vpack.c.bf16 %v2909_v6, %v2908_v62  ;;  %v2907_v7 = vmax.f32 %v2883_v17, 0.0  ;;  %v2855_v12 = vadd.f32 %v2796_v33, %v2620_v60  ;;  %v2888_v44 = vadd.f32 %v6625_v49, %v2857_v26  ;;  %v7505_v17 = vld [vmem:[#allocation22_spill] sm:$0xff]  ;;  %v7506_v26 = vld [vmem:[#allocation17_spill] sm:$0xff]  ;;  %v2596_v24 = vpop.f32.mrf.mxu1 }
 0x1c9   : > { %v5125_v41 = vpop.f32.mrf.mxu0  ;;  %v2624_v53 = vadd.f32 %v2577_v39, %v2230_v45  ;;  %v2236_v60 = vadd.f32 %v7504_v52, %v1946_v40  ;;  %v1947_v1 = vadd.f32 %v7506_v26, %v7505_v17  ;;  %v2625_v30 = vadd.f32 %v2580_v22, %v2231_v25 }
 0x1ca   : > { %v2858_v3 = vadd.f32 %v5125_v41, %v2623_v42  ;;  %v6699_v34 = vpack.c.bf16 %v2907_v7, %v2906_v46  ;;  %v2886_v28 = vadd.f32 %v6625_v49, %v2855_v12  ;;  %v2912_v4 = vmax.f32 %v2888_v44, 0.0  ;;  %v7509_v7 = vld [vmem:[#allocation20_spill] sm:$0xff] }
 0x1cb   : > { %v2799_v59 = vpop.f32.mrf.mxu0  ;;  %v1945_v12 = vadd.f32 %v7509_v7, %v7508_v61  ;;  %v2630_v50 = vadd.f32 %v5104_v35, %v2236_v60  ;;  %v2237_v21 = vadd.f32 %v6606_v54, %v1947_v1 }
 0x1cc   : > { %v2889_v8 = vadd.f32 %v6625_v49, %v2858_v3  ;;  %v2856_v56 = vadd.f32 %v2799_v59, %v2621_v57  ;;  %3164 = vmatmul.mubr.bf16.gmra.mxu1 %v2924_v16  ;;  %5158 = vmatprep.mubr.bf16.mxu0 %v6699_v34  ;;  %v7503_v16 = vld [vmem:[#allocation15_spill] sm:$0xff]  ;;  %v2910_v47 = vmax.f32 %v2886_v28, 0.0 }
 0x1cd   : > { %v5128_v43 = vpop.f32.mrf.mxu0  ;;  %5159 = vmatmul.mubr.bf16.gmra.mxu0 %v6692_v15  ;;  %3173 = vmatprep.mubr.bf16.mxu1 %v7481_v27  ;;  %v1944_v37 = vadd.f32 %v7503_v16, %v7502_v18  ;;  %v2235_v44 = vadd.f32 %v6612_v29, %v1945_v12 }
 0x1ce   : > { %v2913_v48 = vmax.f32 %v2889_v8, 0.0  ;;  %v2887_v0 = vadd.f32 %v6625_v49, %v2856_v56  ;;  %v2861_v2 = vadd.f32 %v5128_v43, %v2626_v63  ;;  %v2631_v63 = vadd.f32 %v5105_v19, %v2237_v21 }
 0x1cf   : > { %v2812_v39 = vpop.f32.mrf.mxu0  ;;  %v2234_v9 = vadd.f32 %v7507_v32, %v1944_v37  ;;  %v2629_v56 = vadd.f32 %v2596_v24, %v2235_v44  ;;  %v2966_v37 = vld [vmem:[%s7445_s4] sm:$0x7] }
 0x1d0   : > { %v2929_v31 = vpack.c.bf16 %v2913_v48, %v2912_v4  ;;  %v2911_v62 = vmax.f32 %v2887_v0, 0.0  ;;  %v2859_v6 = vadd.f32 %v2812_v39, %v2624_v53  ;;  %v2892_v10 = vadd.f32 %v6625_v49, %v2861_v2 }
 0x1d1   : > { %v5129_v42 = vpop.f32.mrf.mxu0  ;;  %v2628_v22 = vadd.f32 %v2593_v58, %v2234_v9 }
 0x1d2   : > { %v2862_v33 = vadd.f32 %v5129_v42, %v2627_v11  ;;  %v2928_v46 = vpack.c.bf16 %v2911_v62, %v2910_v47  ;;  %v2890_v45 = vadd.f32 %v6625_v49, %v2859_v6  ;;  %v2916_v5 = vmax.f32 %v2892_v10, 0.0 }
 0x1d3   : > { %v2815_v51 = vpop.f32.mrf.mxu0 }
 0x1d4   : > { %v2893_v41 = vadd.f32 %v6625_v49, %v2862_v33  ;;  %v2860_v57 = vadd.f32 %v2815_v51, %v2625_v30  ;;  %3174 = vmatmul.mubr.bf16.gmra.mxu1 %v6668_v23  ;;  %5162 = vmatprep.mubr.bf16.mxu0 %v2928_v46  ;;  %v2914_v35 = vmax.f32 %v2890_v45, 0.0 }
 0x1d5   : > { %v5132_v3 = vpop.f32.mrf.mxu0  ;;  %5163 = vmatmul.mubr.bf16.gmra.mxu0 %v2929_v31  ;;  %3183 = vmatprep.mubr.bf16.mxu1 %v7481_v27 }
 0x1d6   : > { %v2917_v55 = vmax.f32 %v2893_v41, 0.0  ;;  %v2891_v54 = vadd.f32 %v6625_v49, %v2860_v57  ;;  %v2865_v38 = vadd.f32 %v5132_v3, %v2630_v50 }
 0x1d7   : > { %v2828_v13 = vpop.f32.mrf.mxu0 }
 0x1d8   : > { %v2931_v59 = vpack.c.bf16 %v2917_v55, %v2916_v5  ;;  %v2915_v28 = vmax.f32 %v2891_v54, 0.0  ;;  %v2863_v23 = vadd.f32 %v2828_v13, %v2628_v22  ;;  %v2896_v29 = vadd.f32 %v6625_v49, %v2865_v38 }
 0x1d9   : > { %v5133_v8 = vpop.f32.mrf.mxu0 }
 0x1da   : > { %v2866_v20 = vadd.f32 %v5133_v8, %v2631_v63  ;;  %v2930_v14 = vpack.c.bf16 %v2915_v28, %v2914_v35  ;;  %v2894_v53 = vadd.f32 %v6625_v49, %v2863_v23  ;;  %v2920_v43 = vmax.f32 %v2896_v29, 0.0 }
 0x1db   : > { %v2831_v40 = vpop.f32.mrf.mxu0 }
 0x1dc   : > { %v2897_v36 = vadd.f32 %v6625_v49, %v2866_v20  ;;  %v2864_v25 = vadd.f32 %v2831_v40, %v2629_v56  ;;  %3184 = vmatmul.mubr.bf16.gmra.mxu1 %v6699_v34  ;;  %5166 = vmatprep.mubr.bf16.mxu0 %v2930_v14  ;;  %v2918_v0 = vmax.f32 %v2894_v53, 0.0 }
 0x1dd   : > { %5167 = vmatmul.mubr.bf16.gmra.mxu0 %v2931_v59  ;;  %3193 = vmatprep.mubr.bf16.mxu1 %v7481_v27 }
 0x1de   : > { %v2921_v4 = vmax.f32 %v2897_v36, 0.0  ;;  %v2895_v48 = vadd.f32 %v6625_v49, %v2864_v25  ;;  %v2968_v49 = vlaneseq }
 0x1e0   : > { %v2933_v2 = vpack.c.bf16 %v2921_v4, %v2920_v43  ;;  %v2919_v18 = vmax.f32 %v2895_v48, 0.0 }
 0x1e2   : > { %v2932_v16 = vpack.c.bf16 %v2919_v18, %v2918_v0 }
 0x1e4   : > { %3194 = vmatmul.mubr.bf16.gmra.mxu1 %v6692_v15  ;;  %5170 = vmatprep.mubr.bf16.mxu0 %v2932_v16  ;;  %v2969_v15 = vshrl.u32 %v2968_v49, 7 }
 0x1e5   : > { %5171 = vmatmul.mubr.bf16.gmra.mxu0 %v2933_v2  ;;  %3203 = vmatprep.mubr.bf16.mxu1 %v7481_v27 }
 0x1e6   : > { %v2970_v34 = vsub.s32 0, %v2969_v15  ;;  %v2978_v11 = vsub.s32 2, %v2969_v15  ;;  %v2974_v52 = vsub.s32 1, %v2969_v15 }
 0x1e8   : > { %v6746_v60 = vrot.slane %v2966_v37, %v2970_v34  ;;  %v6749_v58 = vrot.slane %v2966_v37, %v2978_v11  ;;  %v6751_v39 = vrot.slane %v2966_v37, %v2974_v52 }
 0x1ec   : > { %3204 = vmatmul.mubr.bf16.gmra.mxu1 %v2928_v46 }
 0x1ed   : > { %3213 = vmatprep.mubr.bf16.mxu1 %v7481_v27 }
 0x1f4   : > { %3214 = vmatmul.mubr.bf16.gmra.mxu1 %v2929_v31 }
 0x1f5   : > { %3223 = vmatprep.mubr.bf16.mxu1 %v7481_v27 }
 0x1fc   : > { %3224 = vmatmul.mubr.bf16.gmra.mxu1 %v2930_v14 }
 0x1fd   : > { %3233 = vmatprep.mubr.bf16.mxu1 %v7481_v27 }
 0x204   : > { %3234 = vmatmul.mubr.bf16.gmra.mxu1 %v2931_v59 }
 0x205   : > { %3243 = vmatprep.mubr.bf16.mxu1 %v7481_v27 }
 0x20c   : > { %3244 = vmatmul.mubr.bf16.gmra.mxu1 %v2932_v16 }
 0x20d   : > { %3253 = vmatprep.mubr.bf16.mxu1 %v7481_v27 }
 0x214   : > { %3254 = vmatmul.mubr.bf16.gmra.mxu1 %v2933_v2 }
 0x27c   : > { %v3145_v47 = vpop.f32.mrf.mxu1 }
 0x27d   : > { %v6756_v27 = vadd.f32 %v3145_v47, %v6746_v60  ;;  %v5152_v31 = vpop.f32.mrf.mxu0 }
 0x27e   : > { %v6759_v62 = vadd.f32 %v5152_v31, %v6749_v58  ;;  %v3147_v6 = vpop.f32.mrf.mxu1 }
 0x27f   : > { %v3148_v17 = vadd.f32 %v3147_v6, %v6751_v39  ;;  %3393 = vmax.xlane.f32.xlu0 %v6756_v27  ;;  %v3298_v26 = vpop.f32.mrf.mxu0 }
 0x280   : > { %v3611_v1 = vand.u32 2147483647, %v6759_v62  ;;  %v6765_v32 = vadd.f32 %v3298_v26, %v6749_v58  ;;  %v3149_v9 = vpop.f32.mrf.mxu1  ;;  %vm3755_vm3 = vcmp.ge.f32.partialorder %v6759_v62, 0.0 }
 0x281   : > { %v4688_v42 = vpack.c.bf16 %v3148_v17, %v3148_v17  ;;  %v6768_v30 = vadd.f32 %v3149_v9, %v6746_v60  ;;  %v5153_v10 = vpop.f32.mrf.mxu0 }
 0x282   : > { %v3635_v33 = vsub.f32 0.0, %v3611_v1  ;;  %v3609_v46 = vand.u32 2147483647, %v6765_v32  ;;  %v6772_v61 = vadd.f32 %v5153_v10, %v6749_v58  ;;  %v3151_v7 = vpop.f32.mrf.mxu1  ;;  %vm3753_vm4 = vcmp.ge.f32.partialorder %v6765_v32, 0.0 }
 0x283   : > { %4089 = vst [vmem:[%s6774_s8 + $0x4] sm:$0xf] %v4688_v42  ;;  %v3152_v12 = vadd.f32 %v3151_v7, %v6751_v39  ;;  %3395 = vmax.xlane.f32.xlu0 %v6768_v30  ;;  %v3301_v50 = vpop.f32.mrf.mxu0 }
 0x284   : > { %v3661_v21 = vmul.f32 1.442695, %v3635_v33  ;;  %v3633_v19 = vsub.f32 0.0, %v3609_v46  ;;  %v3612_v51 = vand.u32 2147483647, %v6772_v61  ;;  %v3155_v45 = vpop.f32.mrf.mxu1  ;;  %v6781_v57 = vadd.f32 %v3301_v50, %v6749_v58 }
 0x285   : > { %v4689_v41 = vpack.c.bf16 %v3152_v12, %v3152_v12  ;;  %v6784_v22 = vadd.f32 %v3155_v45, %v6746_v60  ;;  %v5156_v44 = vpop.f32.mrf.mxu0  ;;  %vm3756_vm5 = vcmp.ge.f32.partialorder %v6772_v61, 0.0 }
 0x286   : > { %5369 = vpow2.f32 %v3661_v21  ;;  %v3657_v3 = vmul.f32 1.442695, %v3633_v19  ;;  %v3636_v5 = vsub.f32 0.0, %v3612_v51  ;;  %v6787_v55 = vadd.f32 %v5156_v44, %v6749_v58  ;;  %v3157_v54 = vpop.f32.mrf.mxu1 }
 0x287   : > { %4090 = vst [vmem:[%s6774_s8 + $0x10] sm:$0xf] %v4689_v41  ;;  %v3610_v38 = vand.u32 2147483647, %v6781_v57  ;;  %v3158_v63 = vadd.f32 %v3157_v54, %v6751_v39  ;;  %3397 = vmax.xlane.f32.xlu1 %v6784_v22  ;;  %v3314_v24 = vpop.f32.mrf.mxu0  ;;  %vm3754_vm6 = vcmp.ge.f32.partialorder %v6781_v57, 0.0 }
 0x288   : > { %5371 = vpow2.f32 %v3657_v3  ;;  %v3663_v13 = vmul.f32 1.442695, %v3636_v5  ;;  %v3615_v35 = vand.u32 2147483647, %v6787_v55  ;;  %v3159_v59 = vpop.f32.mrf.mxu1  ;;  %v6795_v8 = vadd.f32 %v3314_v24, %v6749_v58 }
 0x289   : > { %v3634_v28 = vsub.f32 0.0, %v3610_v38  ;;  %v4690_v23 = vpack.c.bf16 %v3158_v63, %v3158_v63  ;;  %v6798_v56 = vadd.f32 %v3159_v59, %v6746_v60  ;;  %v5157_v29 = vpop.f32.mrf.mxu0  ;;  %vm3759_vm7 = vcmp.ge.f32.partialorder %v6787_v55, 0.0 }
 0x28a   : > { %5373 = vpow2.f32 %v3663_v13  ;;  %v3639_v20 = vsub.f32 0.0, %v3615_v35  ;;  %v6801_v14 = vadd.f32 %v5157_v29, %v6749_v58  ;;  %v3161_v40 = vpop.f32.mrf.mxu1  ;;  %v3613_v36 = vand.u32 2147483647, %v6795_v8 }
 0x28b   : > { %v3659_v53 = vmul.f32 1.442695, %v3634_v28  ;;  %4091 = vst [vmem:[%s6774_s8 + $0x1c] sm:$0xf] %v4690_v23  ;;  %v3162_v25 = vadd.f32 %v3161_v40, %v6751_v39  ;;  %3399 = vmax.xlane.f32.xlu1 %v6798_v56  ;;  %v3317_v43 = vpop.f32.mrf.mxu0  ;;  %vm3757_vm8 = vcmp.ge.f32.partialorder %v6795_v8, 0.0 }
 0x28c   : > { %v3669_v4 = vmul.f32 1.442695, %v3639_v20  ;;  %v3616_v48 = vand.u32 2147483647, %v6801_v14  ;;  %v6809_v0 = vadd.f32 %v3317_v43, %v6749_v58  ;;  %v3165_v2 = vpop.f32.mrf.mxu1  ;;  %v3637_v18 = vsub.f32 0.0, %v3613_v36 }
 0x28d   : > { %5375 = vpow2.f32 %v3659_v53  ;;  %v4691_v16 = vpack.c.bf16 %v3162_v25, %v3162_v25  ;;  %v6812_v49 = vadd.f32 %v3165_v2, %v6746_v60  ;;  %v5160_v15 = vpop.f32.mrf.mxu0  ;;  %vm3760_vm9 = vcmp.ge.f32.partialorder %v6801_v14, 0.0 }
 0x28e   : > { %5377 = vpow2.f32 %v3669_v4  ;;  %v3640_v34 = vsub.f32 0.0, %v3616_v48  ;;  %v3614_v37 = vand.u32 2147483647, %v6809_v0  ;;  %v3167_v11 = vpop.f32.mrf.mxu1  ;;  %v3665_v52 = vmul.f32 1.442695, %v3637_v18 }
 0x28f   : > { %4092 = vst [vmem:[%s6774_s8 + $0x28] sm:$0xf] %v4691_v16  ;;  %v6817_v47 = vadd.f32 %v5160_v15, %v6749_v58  ;;  %v3168_v31 = vadd.f32 %v3167_v11, %v6751_v39  ;;  %3401 = vmax.xlane.f32.xlu0 %v6812_v49  ;;  %v3330_v6 = vpop.f32.mrf.mxu0  ;;  %vm3758_vm10 = vcmp.ge.f32.partialorder %v6809_v0, 0.0 }
 0x290   : > { %v3671_v17 = vmul.f32 1.442695, %v3640_v34  ;;  %v3638_v26 = vsub.f32 0.0, %v3614_v37  ;;  %v6822_v1 = vadd.f32 %v3330_v6, %v6749_v58  ;;  %v3169_v9 = vpop.f32.mrf.mxu1  ;;  %5379 = vpow2.f32 %v3665_v52 }
 0x291   : > { %v3619_v42 = vand.u32 2147483647, %v6817_v47  ;;  %v4692_v10 = vpack.c.bf16 %v3168_v31, %v3168_v31  ;;  %v5161_v33 = vpop.f32.mrf.mxu0  ;;  %v6830_v19 = vadd.f32 %v3169_v9, %v6746_v60  ;;  %vm3763_vm11 = vcmp.ge.f32.partialorder %v6817_v47, 0.0 }
 0x292   : > { %5381 = vpow2.f32 %v3671_v17  ;;  %v3667_v46 = vmul.f32 1.442695, %v3638_v26  ;;  %v3617_v7 = vand.u32 2147483647, %v6822_v1  ;;  %v3171_v12 = vpop.f32.mrf.mxu1  ;;  %v6833_v51 = vadd.f32 %v5161_v33, %v6749_v58 }
 0x293   : > { %v6826_v50 = vpop.eup %5369  ;;  %v3643_v21 = vsub.f32 0.0, %v3619_v42  ;;  %4093 = vst [vmem:[%s6774_s8 + $0x34] sm:$0xf] %v4692_v10  ;;  %v3172_v45 = vadd.f32 %v3171_v12, %v6751_v39  ;;  %v3333_v41 = vpop.f32.mrf.mxu0  ;;  %3403 = vmax.xlane.f32.xlu1 %v6830_v19  ;;  %vm3761_vm12 = vcmp.ge.f32.partialorder %v6822_v1, 0.0 }
 0x294   : > { %v3707_v44 = vadd.f32 1.0, %v6826_v50  ;;  %5383 = vpow2.f32 %v3667_v46  ;;  %v3641_v3 = vsub.f32 0.0, %v3617_v7  ;;  %v6838_v5 = vadd.f32 %v3333_v41, %v6749_v58  ;;  %v3175_v54 = vpop.f32.mrf.mxu1 }
 0x295   : > { %v6840_v38 = vpop.eup %5371  ;;  %v3677_v63 = vmul.f32 1.442695, %v3643_v21  ;;  %v3620_v24 = vand.u32 2147483647, %v6833_v51  ;;  %v4693_v13 = vpack.c.bf16 %v3172_v45, %v3172_v45  ;;  %v5164_v35 = vpop.f32.mrf.mxu0  ;;  %v6850_v53 = vadd.f32 %v3175_v54, %v6746_v60 }
 0x296   : > { %5385 = vrcp.f32 %v3707_v44  ;;  %v3705_v59 = vadd.f32 1.0, %v6840_v38  ;;  %v3673_v28 = vmul.f32 1.442695, %v3641_v3  ;;  %v3618_v23 = vand.u32 2147483647, %v6838_v5  ;;  %v3177_v29 = vpop.f32.mrf.mxu1 }
 0x297   : > { %v6846_v20 = vpop.eup %5373  ;;  %5387 = vpow2.f32 %v3677_v63  ;;  %v3644_v40 = vsub.f32 0.0, %v3620_v24  ;;  %4094 = vst [vmem:[%s6774_s8 + $0x40] sm:$0xf] %v4693_v13  ;;  %v3346_v36 = vpop.f32.mrf.mxu0  ;;  %v6854_v4 = vadd.f32 %v5164_v35, %v6749_v58  ;;  %v3178_v18 = vadd.f32 %v3177_v29, %v6751_v39  ;;  %3405 = vmax.xlane.f32.xlu0 %v6850_v53 }
 0x298   : > { %5389 = vrcp.f32 %v3705_v59  ;;  %v3708_v25 = vadd.f32 1.0, %v6846_v20  ;;  %v3642_v43 = vsub.f32 0.0, %v3618_v23  ;;  %v3179_v48 = vpop.f32.mrf.mxu1  ;;  %v6859_v16 = vadd.f32 %v3346_v36, %v6749_v58 }
 0x299   : > { %5391 = vpow2.f32 %v3673_v28  ;;  %v3679_v2 = vmul.f32 1.442695, %v3644_v40  ;;  %v5165_v15 = vpop.f32.mrf.mxu0  ;;  %v3623_v11 = vand.u32 2147483647, %v6854_v4  ;;  %v4694_v17 = vpack.c.bf16 %v3178_v18, %v3178_v18 }
 0x29a   : > { %v6861_v34 = vpop.eup %5375  ;;  %5393 = vrcp.f32 %v3708_v25  ;;  %v3675_v37 = vmul.f32 1.442695, %v3642_v43  ;;  %v3181_v52 = vpop.f32.mrf.mxu1  ;;  %v3621_v26 = vand.u32 2147483647, %v6859_v16  ;;  %v6872_v7 = vadd.f32 %v3179_v48, %v6746_v60 }
 0x29b   : > { %v6864_v31 = vpop.eup %5377  ;;  %v3706_v6 = vadd.f32 1.0, %v6861_v34  ;;  %5395 = vpow2.f32 %v3679_v2  ;;  %v3349_v9 = vpop.f32.mrf.mxu0  ;;  %v3647_v10 = vsub.f32 0.0, %v3623_v11  ;;  %4095 = vst [vmem:[%s6774_s8 + $0x4c] sm:$0xf] %v4694_v17  ;;  %v6875_v12 = vadd.f32 %v5165_v15, %v6749_v58 }
 0x29c   : > { %v3711_v42 = vadd.f32 1.0, %v6864_v31  ;;  %5397 = vpow2.f32 %v3675_v37  ;;  %v3185_v33 = vpop.f32.mrf.mxu1  ;;  %v3645_v46 = vsub.f32 0.0, %v3621_v26  ;;  %v3182_v44 = vadd.f32 %v3181_v52, %v6751_v39  ;;  %3407 = vmax.xlane.f32.xlu1 %v6872_v7 }
 0x29d   : > { %5399 = vrcp.f32 %v3706_v6  ;;  %v5168_v21 = vpop.f32.mrf.mxu0  ;;  %v6877_v45 = vpop.eup %5379  ;;  %v3685_v41 = vmul.f32 1.442695, %v3647_v10  ;;  %v6881_v3 = vadd.f32 %v3349_v9, %v6749_v58  ;;  %v3624_v35 = vand.u32 2147483647, %v6875_v12 }
 0x29e   : > { %5401 = vrcp.f32 %v3711_v42  ;;  %v3187_v54 = vpop.f32.mrf.mxu1  ;;  %v3709_v24 = vadd.f32 1.0, %v6877_v45  ;;  %v3681_v13 = vmul.f32 1.442695, %v3645_v46  ;;  %v4695_v28 = vpack.c.bf16 %v3182_v44, %v3182_v44 }
 0x29f   : > { %v6883_v63 = vpop.eup %5381  ;;  %5403 = vpow2.f32 %v3685_v41  ;;  %v3622_v23 = vand.u32 2147483647, %v6881_v3  ;;  %v3362_v29 = vpop.f32.mrf.mxu0  ;;  %v3648_v25 = vsub.f32 0.0, %v3624_v35  ;;  %v6897_v43 = vadd.f32 %v3185_v33, %v6746_v60 }
 0x2a0   : > { %v3712_v59 = vadd.f32 1.0, %v6883_v63  ;;  %v6891_v40 = vpop.f32.mrf.mxu1  ;;  %5405 = vrcp.f32 %v3709_v24  ;;  %4096 = vst [vmem:[%s6774_s8 + $0x58] sm:$0xf] %v4695_v28  ;;  %v6902_v18 = vadd.f32 %v5168_v21, %v6749_v58  ;;  %v3188_v52 = vadd.f32 %v3187_v54, %v6751_v39 }
 0x2a1   : > { %v6893_v36 = vpop.eup %5383  ;;  %v3646_v2 = vsub.f32 0.0, %v3622_v23  ;;  %v3687_v11 = vmul.f32 1.442695, %v3648_v25  ;;  %3409 = vmax.xlane.f32.xlu0 %v6897_v43  ;;  %v6909_v6 = vadd.f32 %v3362_v29, %v6749_v58  ;;  %vm3764_vm13 = vcmp.ge.f32.partialorder %v6833_v51, 0.0 }
 0x2a2   : > { %5407 = vrcp.f32 %v3712_v59  ;;  %v3710_v48 = vadd.f32 1.0, %v6893_v36  ;;  %v6904_v15 = vpop.f32.mrf.mxu1  ;;  %v3627_v42 = vand.u32 2147483647, %v6902_v18  ;;  %v4696_v21 = vpack.c.bf16 %v3188_v52, %v3188_v52 }
 0x2a3   : > { %v5386_v37 = vpop.eup %5385  ;;  %5409 = vpow2.f32 %v3681_v13  ;;  %v3683_v9 = vmul.f32 1.442695, %v3646_v2  ;;  %v3625_v28 = vand.u32 2147483647, %v6909_v6  ;;  %vm3762_vm14 = vcmp.ge.f32.partialorder %v6838_v5, 0.0 }
 0x2a4   : > { %v6911_v17 = vpop.eup %5387  ;;  %v3779_v26 = vmul.f32 %v5386_v37, %v6826_v50  ;;  %5411 = vrcp.f32 %v3710_v48  ;;  %v6916_v10 = vpop.f32.mrf.mxu1  ;;  %v3651_v54 = vsub.f32 0.0, %v3627_v42  ;;  %4097 = vst [vmem:[%s6774_s8 + $0x64] sm:$0xf] %v4696_v21  ;;  %vm3767_vm15 = vcmp.ge.f32.partialorder %v6854_v4, 0.0 }
 0x2a5   : > { %v5390_v33 = vpop.eup %5389  ;;  %v3715_v46 = vadd.f32 1.0, %v6911_v17  ;;  %5413 = vpow2.f32 %v3687_v11  ;;  %vm3765_vm0 = vcmp.ge.f32.partialorder %v6859_v16, 0.0  ;;  %vm3768_vm1 = vcmp.ge.f32.partialorder %v6875_v12, 0.0 }
 0x2a6   : > { %v6920_v41 = vpop.eup %5391  ;;  %v3803_v50 = vsel %vm3755_vm3, %v5386_v37, %v3779_v26  ;;  %v3777_v44 = vmul.f32 %v5390_v33, %v6840_v38  ;;  %5415 = vpow2.f32 %v3683_v9  ;;  %v6925_v24 = vpop.f32.mrf.mxu1  ;;  %v3693_v38 = vmul.f32 1.442695, %v3651_v54 }
 0x2a7   : > { %v5394_v13 = vpop.eup %5393  ;;  %v3827_v35 = vmul.f32 9.0, %v3803_v50  ;;  %5417 = vrcp.f32 %v3715_v46  ;;  %v3713_v59 = vadd.f32 1.0, %v6920_v41  ;;  %v3649_v26 = vsub.f32 0.0, %v3625_v28 }
 0x2a8   : > { %v6930_v23 = vpop.eup %5395  ;;  %v3801_v62 = vsel %vm3753_vm4, %v5390_v33, %v3777_v44  ;;  %v3780_v29 = vmul.f32 %v5394_v13, %v6846_v20  ;;  %v6936_v25 = vpop.f32.mrf.mxu1  ;;  %v6952_v54 = vadd.f32 %v6891_v40, %v6746_v60  ;;  %vm3766_vm2 = vcmp.ge.f32.partialorder %v6881_v3, 0.0 }
 0x2a9   : > { %v6938_v48 = vpop.eup %5397  ;;  %v3851_v2 = vadd.f32 1.0, %v3827_v35  ;;  %v3825_v37 = vmul.f32 9.0, %v3801_v62  ;;  %5419 = vrcp.f32 %v3713_v59  ;;  %v3716_v11 = vadd.f32 1.0, %v6930_v23 }
 0x2aa   : > { %v5400_v52 = vpop.eup %5399  ;;  %v3804_v32 = vsel %vm3756_vm5, %v5394_v13, %v3780_v29  ;;  %v3714_v20 = vadd.f32 1.0, %v6938_v48  ;;  %5421 = vpow2.f32 %v3693_v38  ;;  %v6945_v9 = vpop.f32.mrf.mxu1  ;;  %v3689_v61 = vmul.f32 1.442695, %v3649_v26  ;;  %3411 = vmax.xlane.f32.xlu1 %v6952_v54 }
 0x2ab   : > { %v5402_v42 = vpop.eup %5401  ;;  %v4714_v33 = vpack.c.bf16 %v3851_v2, %v3851_v2  ;;  %v3849_v46 = vadd.f32 1.0, %v3825_v37  ;;  %v3828_v21 = vmul.f32 9.0, %v3804_v32  ;;  %v3778_v50 = vmul.f32 %v5400_v52, %v6861_v34  ;;  %v5169_v13 = vpop.f32.mrf.mxu0 }
 0x2ac   : > { %v3783_v44 = vmul.f32 %v5402_v42, %v6864_v31  ;;  %5423 = vrcp.f32 %v3716_v11  ;;  %v6954_v35 = vpop.f32.mrf.mxu1  ;;  %v6956_v59 = vpop.eup %5403  ;;  %v6971_v32 = vadd.f32 %v5169_v13, %v6749_v58  ;;  %vm3771_vm3 = vcmp.ge.f32.partialorder %v6902_v18, 0.0 }
 0x2ad   : > { %4211 = vst [vmem:[%s6774_s8 + $0x20] sm:$0xf] %v4714_v33  ;;  %v4712_v28 = vpack.c.bf16 %v3849_v46, %v3849_v46  ;;  %v3852_v62 = vadd.f32 1.0, %v3828_v21  ;;  %v3802_v34 = vsel %vm3754_vm6, %v5400_v52, %v3778_v50  ;;  %5425 = vrcp.f32 %v3714_v20  ;;  %v5406_v31 = vpop.eup %5405 }
 0x2ae   : > { %v3826_v29 = vmul.f32 9.0, %v3802_v34  ;;  %v3807_v38 = vsel %vm3759_vm7, %v5402_v42, %v3783_v44  ;;  %v3719_v40 = vadd.f32 1.0, %v6956_v59  ;;  %5427 = vpow2.f32 %v3689_v61  ;;  %v6966_v2 = vpop.f32.mrf.mxu1 }
 0x2af   : > { %v5408_v37 = vpop.eup %5407  ;;  %4209 = vst [vmem:[%s6774_s8 + $0x8] sm:$0xf] %v4712_v28  ;;  %v4715_v57 = vpack.c.bf16 %v3852_v62, %v3852_v62  ;;  %v3831_v11 = vmul.f32 9.0, %v3807_v38  ;;  %v3781_v52 = vmul.f32 %v5406_v31, %v6877_v45  ;;  %v6979_v42 = vadd.f32 %v6904_v15, %v6751_v39 }
 0x2b0   : > { %v6973_v55 = vpop.eup %5409  ;;  %v3850_v20 = vadd.f32 1.0, %v3826_v29  ;;  %v3784_v26 = vmul.f32 %v5408_v37, %v6883_v63  ;;  %5429 = vrcp.f32 %v3719_v40  ;;  %v6981_v33 = vpop.f32.mrf.mxu1  ;;  %v3628_v63 = vand.u32 2147483647, %v6971_v32 }
 0x2b1   : > { %v5412_v46 = vpop.eup %5411  ;;  %4212 = vst [vmem:[%s6774_s8 + $0x2c] sm:$0xf] %v4715_v57  ;;  %v3855_v45 = vadd.f32 1.0, %v3831_v11  ;;  %v3805_v21 = vsel %vm3757_vm8, %v5406_v31, %v3781_v52  ;;  %v3717_v50 = vadd.f32 1.0, %v6973_v55  ;;  %v3365_v57 = vpop.f32.mrf.mxu0  ;;  %vm3769_vm4 = vcmp.ge.f32.partialorder %v6909_v6, 0.0 }
 0x2b2   : > { %v6988_v44 = vpop.eup %5413  ;;  %v4713_v61 = vpack.c.bf16 %v3850_v20, %v3850_v20  ;;  %v3829_v13 = vmul.f32 9.0, %v3805_v21  ;;  %v3808_v15 = vsel %vm3760_vm9, %v5408_v37, %v3784_v26  ;;  %v3782_v28 = vmul.f32 %v5412_v46, %v6893_v36  ;;  %v6993_v62 = vpop.f32.mrf.mxu1 }
 0x2b3   : > { %v6995_v34 = vpop.eup %5415  ;;  %v4718_v8 = vpack.c.bf16 %v3855_v45, %v3855_v45  ;;  %v3832_v31 = vmul.f32 9.0, %v3808_v15  ;;  %5431 = vrcp.f32 %v3717_v50  ;;  %v3720_v29 = vadd.f32 1.0, %v6988_v44 }
 0x2b4   : > { %v5418_v38 = vpop.eup %5417  ;;  %4210 = vst [vmem:[%s6774_s8 + $0x14] sm:$0xf] %v4713_v61  ;;  %v3853_v40 = vadd.f32 1.0, %v3829_v13  ;;  %v3806_v14 = vsel %vm3758_vm10, %v5412_v46, %v3782_v28  ;;  %v3718_v36 = vadd.f32 1.0, %v6995_v34  ;;  %v3652_v37 = vsub.f32 0.0, %v3628_v63  ;;  %v7003_v11 = vpop.f32.mrf.mxu1 }
 0x2b5   : > { %4215 = vst [vmem:[%s6774_s8 + $0x50] sm:$0xf] %v4718_v8  ;;  %v3856_v52 = vadd.f32 1.0, %v3832_v31  ;;  %v3830_v20 = vmul.f32 9.0, %v3806_v14  ;;  %v3787_v26 = vmul.f32 %v5418_v38, %v6911_v17  ;;  %5433 = vrcp.f32 %v3720_v29  ;;  %v5172_v31 = vpop.f32.mrf.mxu0 }
 0x2b6   : > { %v5420_v45 = vpop.eup %5419  ;;  %v4716_v21 = vpack.c.bf16 %v3853_v40, %v3853_v40  ;;  %5435 = vrcp.f32 %v3718_v36  ;;  %v3695_v0 = vmul.f32 1.442695, %v3652_v37  ;;  %v7008_v46 = vpop.f32.mrf.mxu1  ;;  %v4697_v8 = vpack.c.bf16 %v6979_v42, %v6979_v42 }
 0x2b7   : > { %v7010_v50 = vpop.eup %5421  ;;  %v4719_v63 = vpack.c.bf16 %v3856_v52, %v3856_v52  ;;  %v3854_v61 = vadd.f32 1.0, %v3830_v20  ;;  %v3811_v13 = vsel %vm3763_vm11, %v5418_v38, %v3787_v26  ;;  %v3785_v15 = vmul.f32 %v5420_v45, %v6920_v41 }
 0x2b8   : > { %4213 = vst [vmem:[%s6774_s8 + $0x38] sm:$0xf] %v4716_v21  ;;  %v3835_v17 = vmul.f32 9.0, %v3811_v13  ;;  %v3723_v28 = vadd.f32 1.0, %v7010_v50  ;;  %5437 = vpow2.f32 %v3695_v0  ;;  %v7020_v29 = vpop.f32.mrf.mxu1  ;;  %v7026_v38 = vadd.f32 %v3365_v57, %v6749_v58  ;;  %4098 = vst [vmem:[%s6774_s8 + $0x70] sm:$0xf] %v4697_v8 }
 0x2b9   : > { %v5424_v40 = vpop.eup %5423  ;;  %4216 = vst [vmem:[%s6774_s8 + $0x5c] sm:$0xf] %v4719_v63  ;;  %v4717_v47 = vpack.c.bf16 %v3854_v61, %v3854_v61  ;;  %v3809_v41 = vsel %vm3761_vm12, %v5420_v45, %v3785_v15  ;;  %v7030_v14 = vadd.f32 %v6916_v10, %v6746_v60  ;;  %v7043_v57 = vadd.f32 %v5172_v31, %v6749_v58 }
 0x2ba   : > { %v5426_v36 = vpop.eup %5425  ;;  %v3859_v37 = vadd.f32 1.0, %v3835_v17  ;;  %v3833_v42 = vmul.f32 9.0, %v3809_v41  ;;  %v3788_v52 = vmul.f32 %v5424_v40, %v6930_v23  ;;  %5439 = vrcp.f32 %v3723_v28  ;;  %v7034_v20 = vpop.f32.mrf.mxu1 }
 0x2bb   : > { %v7036_v26 = vpop.eup %5427  ;;  %4214 = vst [vmem:[%s6774_s8 + $0x44] sm:$0xf] %v4717_v47  ;;  %v3786_v1 = vmul.f32 %v5426_v36, %v6938_v48  ;;  %v3626_v10 = vand.u32 2147483647, %v7026_v38  ;;  %3413 = vmax.xlane.f32.xlu0 %v7030_v14  ;;  %v3631_v17 = vand.u32 2147483647, %v7043_v57  ;;  %v3378_v28 = vpop.f32.mrf.mxu0  ;;  %v3212_v6 = vadd.f32 %v6993_v62, %v6751_v39 }
 0x2bc   : > { %v4722_v23 = vpack.c.bf16 %v3859_v37, %v3859_v37  ;;  %v3857_v45 = vadd.f32 1.0, %v3833_v42  ;;  %v3812_v21 = vsel %vm3764_vm13, %v5424_v40, %v3788_v52  ;;  %v3721_v0 = vadd.f32 1.0, %v7036_v26  ;;  %v7049_v63 = vpop.f32.mrf.mxu1 }
 0x2bd   : > { %v5430_v48 = vpop.eup %5429  ;;  %v3836_v61 = vmul.f32 9.0, %v3812_v21  ;;  %v3810_v13 = vsel %vm3762_vm14, %v5426_v36, %v3786_v1  ;;  %v3650_v15 = vsub.f32 0.0, %v3626_v10  ;;  %v3655_v37 = vsub.f32 0.0, %v3631_v17 }
 0x2be   : > { %4219 = vst [vmem:[%s6774_s8 + $0x80] sm:$0xf] %v4722_v23  ;;  %v4720_v8 = vpack.c.bf16 %v3857_v45, %v3857_v45  ;;  %v3834_v31 = vmul.f32 9.0, %v3810_v13  ;;  %v3791_v51 = vmul.f32 %v5430_v48, %v6956_v59  ;;  %5441 = vrcp.f32 %v3721_v0  ;;  %v7056_v40 = vpop.f32.mrf.mxu1  ;;  %v5173_v13 = vpop.f32.mrf.mxu0 }
 0x2bf   : > { %v3860_v47 = vadd.f32 1.0, %v3836_v61  ;;  %v3691_v41 = vmul.f32 1.442695, %v3650_v15  ;;  %v3198_v52 = vadd.f32 %v6925_v24, %v6751_v39  ;;  %v7065_v59 = vadd.f32 %v3378_v28, %v6749_v58 }
 0x2c0   : > { %v5432_v5 = vpop.eup %5431  ;;  %4217 = vst [vmem:[%s6774_s8 + $0x68] sm:$0xf] %v4720_v8  ;;  %v3858_v36 = vadd.f32 1.0, %v3834_v31  ;;  %v3815_v42 = vsel %vm3767_vm15, %v5430_v48, %v3791_v51  ;;  %v7067_v1 = vpop.f32.mrf.mxu1  ;;  %v3701_v4 = vmul.f32 1.442695, %v3655_v37  ;;  %v7092_v3 = vadd.f32 %v5173_v13, %v6749_v58 }
 0x2c1   : > { %v4723_v10 = vpack.c.bf16 %v3860_v47, %v3860_v47  ;;  %v3839_v23 = vmul.f32 9.0, %v3815_v42  ;;  %v3789_v45 = vmul.f32 %v5432_v5, %v6973_v55  ;;  %5443 = vpow2.f32 %v3691_v41 }
 0x2c2   : > { %v5434_v21 = vpop.eup %5433  ;;  %v4721_v0 = vpack.c.bf16 %v3858_v36, %v3858_v36  ;;  %v4698_v48 = vpack.c.bf16 %v3198_v52, %v3198_v52  ;;  %v3629_v61 = vand.u32 2147483647, %v7065_v59  ;;  %v7071_v24 = vpop.f32.mrf.mxu1  ;;  %5445 = vpow2.f32 %v3701_v4 }
 0x2c3   : > { %v5436_v15 = vpop.eup %5435  ;;  %4220 = vst [vmem:[%s6774_s8 + $0x8c] sm:$0xf] %v4723_v10  ;;  %v3863_v17 = vadd.f32 1.0, %v3839_v23  ;;  %v3813_v28 = vsel %vm3765_vm0, %v5432_v5, %v3789_v45  ;;  %v3792_v8 = vmul.f32 %v5434_v21, %v6988_v44  ;;  %v7089_v44 = vadd.f32 %v6936_v25, %v6746_v60  ;;  %v3381_v45 = vpop.f32.mrf.mxu0 }
 0x2c4   : > { %4218 = vst [vmem:[%s6774_s8 + $0x74] sm:$0xf] %v4721_v0  ;;  %v3837_v55 = vmul.f32 9.0, %v3813_v28  ;;  %v3790_v31 = vmul.f32 %v5436_v15, %v6995_v34  ;;  %4099 = vst [vmem:[%s6774_s8 + $0x7c] sm:$0xf] %v4698_v48  ;;  %v3653_v51 = vsub.f32 0.0, %v3629_v61  ;;  %v7081_v47 = vpop.f32.mrf.mxu1 }
 0x2c5   : > { %v7083_v41 = vpop.eup %5437  ;;  %v4726_v37 = vpack.c.bf16 %v3863_v17, %v3863_v17  ;;  %v3816_v16 = vsel %vm3768_vm1, %v5434_v21, %v3792_v8  ;;  %v3632_v25 = vand.u32 2147483647, %v7092_v3  ;;  %3415 = vmax.xlane.f32.xlu1 %v7089_v44  ;;  %v7110_v8 = vadd.f32 %v3381_v45, %v6749_v58 }
 0x2c6   : > { %v3861_v34 = vadd.f32 1.0, %v3837_v55  ;;  %v3840_v5 = vmul.f32 9.0, %v3816_v16  ;;  %v3814_v36 = vsel %vm3766_vm2, %v5436_v15, %v3790_v31  ;;  %v3724_v42 = vadd.f32 1.0, %v7083_v41  ;;  %v7095_v52 = vpop.f32.mrf.mxu1 }
 0x2c7   : > { %v5440_v10 = vpop.eup %5439  ;;  %4223 = vst [vmem:[%s6774_s8 + $0xb0] sm:$0xf] %v4726_v37  ;;  %v3838_v23 = vmul.f32 9.0, %v3814_v36  ;;  %v3697_v12 = vmul.f32 1.442695, %v3653_v51  ;;  %v3656_v13 = vsub.f32 0.0, %v3632_v25  ;;  %v3202_v15 = vadd.f32 %v6945_v9, %v6751_v39 }
 0x2c8   : > { %v4724_v21 = vpack.c.bf16 %v3861_v34, %v3861_v34  ;;  %v3864_v0 = vadd.f32 1.0, %v3840_v5  ;;  %v3795_v4 = vmul.f32 %v5440_v10, %v7010_v50  ;;  %5447 = vrcp.f32 %v3724_v42  ;;  %v7102_v48 = vpop.f32.mrf.mxu1 }
 0x2c9   : > { %v3862_v61 = vadd.f32 1.0, %v3838_v23  ;;  %5449 = vpow2.f32 %v3697_v12  ;;  %v7114_v50 = vadd.f32 %v6954_v35, %v6746_v60  ;;  %v3703_v9 = vmul.f32 1.442695, %v3656_v13 }
 0x2ca   : > { %4221 = vst [vmem:[%s6774_s8 + $0x98] sm:$0xf] %v4724_v21  ;;  %v4727_v17 = vpack.c.bf16 %v3864_v0, %v3864_v0  ;;  %v3819_v28 = vsel %vm3771_vm3, %v5440_v10, %v3795_v4  ;;  %v7116_v55 = vpop.f32.mrf.mxu1  ;;  %v4699_v16 = vpack.c.bf16 %v3202_v15, %v3202_v15  ;;  %v3630_v58 = vand.u32 2147483647, %v7110_v8 }
 0x2cb   : > { %v5442_v31 = vpop.eup %5441  ;;  %v4725_v51 = vpack.c.bf16 %v3862_v61, %v3862_v61  ;;  %v3843_v37 = vmul.f32 9.0, %v3819_v28  ;;  %v3208_v34 = vadd.f32 %v6966_v2, %v6751_v39  ;;  %3417 = vmax.xlane.f32.xlu0 %v7114_v50  ;;  %5451 = vpow2.f32 %v3703_v9 }
 0x2cc   : > { %4224 = vst [vmem:[%s6774_s8 + $0xbc] sm:$0xf] %v4727_v17  ;;  %v3793_v18 = vmul.f32 %v5442_v31, %v7036_v26  ;;  %v7125_v35 = vpop.f32.mrf.mxu1  ;;  %4100 = vst [vmem:[%s6774_s8 + $0x88] sm:$0xf] %v4699_v16  ;;  %v7131_v36 = vadd.f32 %v6981_v33, %v6746_v60  ;;  %v3654_v2 = vsub.f32 0.0, %v3630_v58  ;;  %v7139_v23 = vadd.f32 %v7003_v11, %v6746_v60 }
 0x2cd   : > { %4222 = vst [vmem:[%s6774_s8 + $0xa4] sm:$0xf] %v4725_v51  ;;  %v3867_v5 = vadd.f32 1.0, %v3843_v37  ;;  %v4700_v10 = vpack.c.bf16 %v3208_v34, %v3208_v34  ;;  %v4701_v21 = vpack.c.bf16 %v3212_v6, %v3212_v6  ;;  %v3218_v0 = vadd.f32 %v7008_v46, %v6751_v39 }
 0x2ce   : > { %v7135_v26 = vpop.eup %5443  ;;  %v3817_v42 = vsel %vm3769_vm4, %v5442_v31, %v3793_v18  ;;  %v3247_v12 = vpop.f32.mrf.mxu1  ;;  %3419 = vmax.xlane.f32.xlu1 %v7131_v36  ;;  %v3699_v62 = vmul.f32 1.442695, %v3654_v2  ;;  %v7149_v11 = vadd.f32 %v7020_v29, %v6746_v60  ;;  %v3222_v4 = vadd.f32 %v7034_v20, %v6751_v39 }
 0x2cf   : > { %v4730_v25 = vpack.c.bf16 %v3867_v5, %v3867_v5  ;;  %v3841_v45 = vmul.f32 9.0, %v3817_v42  ;;  %v3722_v33 = vadd.f32 1.0, %v7135_v26  ;;  %4101 = vst [vmem:[%s6774_s8 + $0x94] sm:$0xf] %v4700_v10  ;;  %3421 = vmax.xlane.f32.xlu0 %v7139_v23  ;;  %v7153_v13 = vpop.eup %5445  ;;  %4102 = vst [vmem:[%s6774_s8 + $0xa0] sm:$0xf] %v4701_v21  ;;  %v7159_v46 = vadd.f32 %v7049_v63, %v6746_v60 }
 0x2d0   : > { %v3249_v61 = vpop.f32.mrf.mxu1  ;;  %v3228_v29 = vadd.f32 %v7056_v40, %v6751_v39  ;;  %v3727_v17 = vadd.f32 1.0, %v7153_v13  ;;  %v4702_v20 = vpack.c.bf16 %v3218_v0, %v3218_v0  ;;  %v4703_v28 = vpack.c.bf16 %v3222_v4, %v3222_v4 }
 0x2d1   : > { %4227 = vst [vmem:[%s6774_s8 + $0xe0] sm:$0xf] %v4730_v25  ;;  %v3865_v15 = vadd.f32 1.0, %v3841_v45  ;;  %5453 = vrcp.f32 %v3722_v33  ;;  %v7167_v9 = vadd.f32 %v7067_v1, %v6746_v60  ;;  %v3232_v63 = vadd.f32 %v7071_v24, %v6751_v39 }
 0x2d2   : > { %5455 = vpow2.f32 %v3699_v62  ;;  %v3251_v31 = vpop.f32.mrf.mxu1  ;;  %3423 = vmax.xlane.f32.xlu1 %v7149_v11  ;;  %v4704_v37 = vpack.c.bf16 %v3228_v29, %v3228_v29  ;;  %4103 = vst [vmem:[%s6774_s8 + $0xac] sm:$0xf] %v4702_v20  ;;  %4104 = vst [vmem:[%s6774_s8 + $0xb8] sm:$0xf] %v4703_v28  ;;  %v7176_v40 = vadd.f32 %v7081_v47, %v6746_v60  ;;  %vm3772_vm5 = vcmp.ge.f32.partialorder %v6971_v32, 0.0 }
 0x2d3   : > { %v4728_v51 = vpack.c.bf16 %v3865_v15, %v3865_v15  ;;  %5457 = vrcp.f32 %v3727_v17  ;;  %3425 = vmax.xlane.f32.xlu0 %v7159_v46  ;;  %v3238_v16 = vadd.f32 %v7095_v52, %v6751_v39  ;;  %v4705_v1 = vpack.c.bf16 %v3232_v63, %v3232_v63 }
 0x2d4   : > { %v3255_v18 = vpop.f32.mrf.mxu1  ;;  %4105 = vst [vmem:[%s6774_s8 + $0xc4] sm:$0xf] %v4704_v37  ;;  %v3242_v24 = vadd.f32 %v7116_v55, %v6751_v39  ;;  %v3248_v34 = vadd.f32 %v3247_v12, %v6751_v39  ;;  %v3252_v42 = vadd.f32 %v3251_v31, %v6751_v39  ;;  %v7192_v55 = vadd.f32 %v7102_v48, %v6746_v60 }
 0x2d5   : > { %v5448_v58 = vpop.eup %5447  ;;  %4225 = vst [vmem:[%s6774_s8 + $0xc8] sm:$0xf] %v4728_v51  ;;  %v4706_v6 = vpack.c.bf16 %v3238_v16, %v3238_v16  ;;  %4106 = vst [vmem:[%s6774_s8 + $0xd0] sm:$0xf] %v4705_v1  ;;  %v7211_v17 = vadd.f32 %v3255_v18, %v6746_v60  ;;  %vm3770_vm6 = vcmp.ge.f32.partialorder %v7026_v38, 0.0  ;;  %vm3775_vm7 = vcmp.ge.f32.partialorder %v7043_v57, 0.0 }
 0x2d6   : > { %v5450_v5 = vpop.eup %5449  ;;  %v3796_v47 = vmul.f32 %v5448_v58, %v7083_v41  ;;  %v3257_v52 = vpop.f32.mrf.mxu1  ;;  %3427 = vmax.xlane.f32.xlu1 %v7167_v9  ;;  %v4707_v10 = vpack.c.bf16 %v3242_v24, %v3242_v24  ;;  %v4708_v12 = vpack.c.bf16 %v3248_v34, %v3248_v34  ;;  %v7198_v41 = vadd.f32 %v7125_v35, %v6746_v60 }
 0x2d7   : > { %v3725_v2 = vadd.f32 1.0, %v5450_v5  ;;  %4107 = vst [vmem:[%s6774_s8 + $0xdc] sm:$0xf] %v4706_v6  ;;  %3429 = vmax.xlane.f32.xlu0 %v7176_v40  ;;  %v4709_v25 = vpack.c.bf16 %v3252_v42, %v3252_v42  ;;  %v3258_v45 = vadd.f32 %v3257_v52, %v6751_v39  ;;  %v7206_v35 = vadd.f32 %v3249_v61, %v6746_v60 }
 0x2d8   : > { %v3820_v32 = vsel %vm3772_vm5, %v5448_v58, %v3796_v47  ;;  %v3259_v33 = vpop.f32.mrf.mxu1  ;;  %4108 = vst [vmem:[%s6774_s8 + $0xe8] sm:$0xf] %v4707_v10  ;;  %4109 = vst [vmem:[%s6774_s8 + $0xf4] sm:$0xf] %v4708_v12  ;;  %v5452_v48 = vpop.eup %5451  ;;  %vm3773_vm8 = vcmp.ge.f32.partialorder %v7065_v59, 0.0  ;;  %vm3776_vm9 = vcmp.ge.f32.partialorder %v7092_v3, 0.0 }
 0x2d9   : > { %v3844_v21 = vmul.f32 9.0, %v3820_v32  ;;  %5459 = vrcp.f32 %v3725_v2  ;;  %4110 = vst [vmem:[%s6774_s8 + $0x100] sm:$0xf] %v4709_v25  ;;  %v4710_v62 = vpack.c.bf16 %v3258_v45, %v3258_v45  ;;  %v3728_v15 = vadd.f32 1.0, %v5452_v48 }
 0x2da   : > { %v3261_v0 = vpop.f32.mrf.mxu1  ;;  %3431 = vmax.xlane.f32.xlu1 %v7192_v55  ;;  %v7218_v61 = vadd.f32 %v3259_v33, %v6746_v60  ;;  %vm3774_vm10 = vcmp.ge.f32.partialorder %v7110_v8, 0.0 }
 0x2db   : > { %v3868_v4 = vadd.f32 1.0, %v3844_v21  ;;  %v3262_v29 = vadd.f32 %v3261_v0, %v6751_v39  ;;  %3433 = vmax.xlane.f32.xlu0 %v7198_v41  ;;  %4111 = vst [vmem:[%s6774_s8 + $0x10c] sm:$0xf] %v4710_v62  ;;  %5461 = vrcp.f32 %v3728_v15 }
 0x2dd   : > { %v4731_v20 = vpack.c.bf16 %v3868_v4, %v3868_v4  ;;  %v4711_v28 = vpack.c.bf16 %v3262_v29, %v3262_v29 }
 0x2de   : > { %v5454_v31 = vpop.eup %5453  ;;  %3435 = vmax.xlane.f32.xlu1 %v7206_v35 }
 0x2df   : > { %v5456_v51 = vpop.eup %5455  ;;  %4228 = vst [vmem:[%s6774_s8 + $0xec] sm:$0xf] %v4731_v20  ;;  %v3794_v37 = vmul.f32 %v5454_v31, %v7135_v26  ;;  %4112 = vst [vmem:[%s6774_s8 + $0x118] sm:$0xf] %v4711_v28  ;;  %3437 = vmax.xlane.f32.xlu0 %v7211_v17 }
 0x2e0   : > { %v3726_v39 = vadd.f32 1.0, %v5456_v51  ;;  %v5458_v63 = vpop.eup %5457 }
 0x2e1   : > { %v3818_v16 = vsel %vm3770_vm6, %v5454_v31, %v3794_v37  ;;  %v3799_v58 = vmul.f32 %v5458_v63, %v7153_v13 }
 0x2e2   : > { %v3842_v18 = vmul.f32 9.0, %v3818_v16  ;;  %5463 = vrcp.f32 %v3726_v39  ;;  %3439 = vmax.xlane.f32.xlu1 %v7218_v61 }
 0x2e3   : > { %v3823_v26 = vsel %vm3775_vm7, %v5458_v63, %v3799_v58 }
 0x2e4   : > { %v3866_v60 = vadd.f32 1.0, %v3842_v18  ;;  %v3847_v1 = vmul.f32 9.0, %v3823_v26 }
 0x2e6   : > { %v5460_v24 = vpop.eup %5459  ;;  %v4729_v38 = vpack.c.bf16 %v3866_v60, %v3866_v60  ;;  %v3871_v34 = vadd.f32 1.0, %v3847_v1 }
 0x2e7   : > { %v3797_v47 = vmul.f32 %v5460_v24, %v5450_v5 }
 0x2e8   : > { %4226 = vst [vmem:[%s6774_s8 + $0xd4] sm:$0xf] %v4729_v38  ;;  %v4734_v6 = vpack.c.bf16 %v3871_v34, %v3871_v34  ;;  %v5462_v13 = vpop.eup %5461 }
 0x2e9   : > { %v3821_v42 = vsel %vm3773_vm8, %v5460_v24, %v3797_v47  ;;  %v3800_v57 = vmul.f32 %v5462_v13, %v5452_v48 }
 0x2ea   : > { %v3845_v52 = vmul.f32 9.0, %v3821_v42  ;;  %4231 = vst [vmem:[%s6774_s8 + $0x110] sm:$0xf] %v4734_v6 }
 0x2eb   : > { %v3824_v10 = vsel %vm3776_vm9, %v5462_v13, %v3800_v57 }
 0x2ec   : > { %v3869_v2 = vadd.f32 1.0, %v3845_v52  ;;  %v3848_v32 = vmul.f32 9.0, %v3824_v10 }
 0x2ee   : > { %v4732_v12 = vpack.c.bf16 %v3869_v2, %v3869_v2  ;;  %v3872_v5 = vadd.f32 1.0, %v3848_v32 }
 0x2ef   : > { %v5464_v25 = vpop.eup %5463 }
 0x2f0   : > { %4229 = vst [vmem:[%s6774_s8 + $0xf8] sm:$0xf] %v4732_v12  ;;  %v3798_v45 = vmul.f32 %v5464_v25, %v5456_v51  ;;  %v4735_v59 = vpack.c.bf16 %v3872_v5, %v3872_v5 }
 0x2f2   : > { %v3822_v33 = vsel %vm3774_vm10, %v5464_v25, %v3798_v45  ;;  %4232 = vst [vmem:[%s6774_s8 + $0x11c] sm:$0xf] %v4735_v59 }
 0x2f3   : > { %v3846_v21 = vmul.f32 9.0, %v3822_v33 }
 0x2f5   : > { %v3870_v62 = vadd.f32 1.0, %v3846_v21 }
 0x2f7   : > { %v4733_v0 = vpack.c.bf16 %v3870_v62, %v3870_v62 }
 0x2f9   : > { %4230 = vst [vmem:[%s6774_s8 + $0x104] sm:$0xf] %v4733_v0 }
 0x308   : > { %v3394_v48 = vpop.xlane.xlu0 %3393 }
 0x309   : > { %v3441_v4 = vsub.f32 %v6756_v27, %v3394_v48 }
 0x30b   : > { %v3465_v3 = vmul.f32 1.442695, %v3441_v4 }
 0x30c   : > { %v3396_v15 = vpop.xlane.xlu0 %3395 }
 0x30d   : > { %5465 = vpow2.f32 %v3465_v3  ;;  %v3442_v29 = vsub.f32 %v6768_v30, %v3396_v15 }
 0x30f   : > { %v3467_v20 = vmul.f32 1.442695, %v3442_v29 }
 0x310   : > { %v3398_v28 = vpop.xlane.xlu1 %3397 }
 0x311   : > { %5467 = vpow2.f32 %v3467_v20  ;;  %v3443_v8 = vsub.f32 %v6784_v22, %v3398_v28 }
 0x313   : > { %v3469_v31 = vmul.f32 1.442695, %v3443_v8 }
 0x314   : > { %v3400_v51 = vpop.xlane.xlu1 %3399 }
 0x315   : > { %5469 = vpow2.f32 %v3469_v31  ;;  %v3444_v37 = vsub.f32 %v6798_v56, %v3400_v51 }
 0x317   : > { %v3471_v39 = vmul.f32 1.442695, %v3444_v37 }
 0x318   : > { %v3402_v63 = vpop.xlane.xlu0 %3401 }
 0x319   : > { %5471 = vpow2.f32 %v3471_v39  ;;  %v3445_v27 = vsub.f32 %v6812_v49, %v3402_v63 }
 0x31a   : > { %v7239_v16 = vpop.eup %5465 }
 0x31b   : > { %v3473_v18 = vmul.f32 1.442695, %v3445_v27  ;;  %3513 = vadd.xlane.f32.xlu0 %v7239_v16 }
 0x31c   : > { %v3404_v58 = vpop.xlane.xlu1 %3403 }
 0x31d   : > { %5473 = vpow2.f32 %v3473_v18  ;;  %v3446_v22 = vsub.f32 %v6830_v19, %v3404_v58 }
 0x31e   : > { %v7242_v30 = vpop.eup %5467 }
 0x31f   : > { %3515 = vadd.xlane.f32.xlu1 %v7242_v30  ;;  %v3475_v60 = vmul.f32 1.442695, %v3446_v22 }
 0x320   : > { %v3406_v26 = vpop.xlane.xlu0 %3405 }
 0x321   : > { %5475 = vpow2.f32 %v3475_v60  ;;  %v3447_v49 = vsub.f32 %v6850_v53, %v3406_v26 }
 0x322   : > { %v7246_v56 = vpop.eup %5469 }
 0x323   : > { %3517 = vadd.xlane.f32.xlu0 %v7246_v56  ;;  %v3477_v1 = vmul.f32 1.442695, %v3447_v49 }
 0x325   : > { %5477 = vpow2.f32 %v3477_v1  ;;  %v3408_v38 = vpop.xlane.xlu1 %3407 }
 0x326   : > { %v7250_v24 = vpop.eup %5471  ;;  %v3448_v19 = vsub.f32 %v6872_v7, %v3408_v38 }
 0x327   : > { %3519 = vadd.xlane.f32.xlu1 %v7250_v24 }
 0x328   : > { %v3479_v47 = vmul.f32 1.442695, %v3448_v19 }
 0x32a   : > { %v7254_v34 = vpop.eup %5473  ;;  %v3410_v6 = vpop.xlane.xlu0 %3409  ;;  %5479 = vpow2.f32 %v3479_v47 }
 0x32b   : > { %3521 = vadd.xlane.f32.xlu0 %v7254_v34  ;;  %v3449_v53 = vsub.f32 %v6897_v43, %v3410_v6 }
 0x32d   : > { %v3481_v42 = vmul.f32 1.442695, %v3449_v53 }
 0x32e   : > { %v7258_v13 = vpop.eup %5475 }
 0x32f   : > { %5481 = vpow2.f32 %v3481_v42  ;;  %3523 = vadd.xlane.f32.xlu1 %v7258_v13 }
 0x332   : > { %v7261_v52 = vpop.eup %5477 }
 0x333   : > { %3525 = vadd.xlane.f32.xlu0 %v7261_v52  ;;  %v3412_v7 = vpop.xlane.xlu1 %3411 }
 0x334   : > { %v3450_v57 = vsub.f32 %v6952_v54, %v3412_v7 }
 0x336   : > { %v3483_v10 = vmul.f32 1.442695, %v3450_v57 }
 0x337   : > { %v7265_v2 = vpop.eup %5479 }
 0x338   : > { %3527 = vadd.xlane.f32.xlu1 %v7265_v2  ;;  %5483 = vpow2.f32 %v3483_v10 }
 0x33c   : > { %v7268_v43 = vpop.eup %5481 }
 0x33d   : > { %3529 = vadd.xlane.f32.xlu0 %v7268_v43 }
 0x344   : > { %v3414_v12 = vpop.xlane.xlu0 %3413 }
 0x345   : > { %v3451_v32 = vsub.f32 %v7030_v14, %v3414_v12  ;;  %v7272_v5 = vpop.eup %5483 }
 0x346   : > { %3531 = vadd.xlane.f32.xlu1 %v7272_v5 }
 0x347   : > { %v3485_v25 = vmul.f32 1.442695, %v3451_v32 }
 0x349   : > { %5485 = vpow2.f32 %v3485_v25 }
 0x34e   : > { %v3416_v54 = vpop.xlane.xlu1 %3415 }
 0x34f   : > { %v3452_v45 = vsub.f32 %v7089_v44, %v3416_v54 }
 0x351   : > { %v3487_v59 = vmul.f32 1.442695, %v3452_v45 }
 0x353   : > { %5487 = vpow2.f32 %v3487_v59 }
 0x354   : > { %v3418_v33 = vpop.xlane.xlu0 %3417 }
 0x355   : > { %v3453_v62 = vsub.f32 %v7114_v50, %v3418_v33 }
 0x356   : > { %v7276_v21 = vpop.eup %5485 }
 0x357   : > { %3533 = vadd.xlane.f32.xlu0 %v7276_v21  ;;  %v3489_v0 = vmul.f32 1.442695, %v3453_v62  ;;  %v3420_v14 = vpop.xlane.xlu1 %3419 }
 0x358   : > { %v3454_v48 = vsub.f32 %v7131_v36, %v3420_v14  ;;  %v3422_v4 = vpop.xlane.xlu0 %3421 }
 0x359   : > { %5489 = vpow2.f32 %v3489_v0  ;;  %v3455_v3 = vsub.f32 %v7139_v23, %v3422_v4 }
 0x35a   : > { %v3491_v15 = vmul.f32 1.442695, %v3454_v48 }
 0x35b   : > { %v3493_v29 = vmul.f32 1.442695, %v3455_v3  ;;  %v3424_v44 = vpop.xlane.xlu1 %3423 }
 0x35c   : > { %5491 = vpow2.f32 %v3491_v15  ;;  %v3456_v20 = vsub.f32 %v7149_v11, %v3424_v44  ;;  %v3426_v28 = vpop.xlane.xlu0 %3425 }
 0x35d   : > { %5493 = vpow2.f32 %v3493_v29  ;;  %v3457_v50 = vsub.f32 %v7159_v46, %v3426_v28 }
 0x35e   : > { %v3495_v8 = vmul.f32 1.442695, %v3456_v20 }
 0x35f   : > { %v3497_v31 = vmul.f32 1.442695, %v3457_v50  ;;  %v3428_v51 = vpop.xlane.xlu1 %3427 }
 0x360   : > { %5495 = vpow2.f32 %v3495_v8  ;;  %v3458_v36 = vsub.f32 %v7167_v9, %v3428_v51  ;;  %v3430_v37 = vpop.xlane.xlu0 %3429  ;;  %v7285_v39 = vpop.eup %5487 }
 0x361   : > { %5497 = vpow2.f32 %v3497_v31  ;;  %v3459_v23 = vsub.f32 %v7176_v40, %v3430_v37  ;;  %3535 = vadd.xlane.f32.xlu1 %v7285_v39 }
 0x362   : > { %v3499_v63 = vmul.f32 1.442695, %v3458_v36 }
 0x363   : > { %v3501_v11 = vmul.f32 1.442695, %v3459_v23  ;;  %v3432_v27 = vpop.xlane.xlu1 %3431 }
 0x364   : > { %5499 = vpow2.f32 %v3499_v63  ;;  %v3460_v46 = vsub.f32 %v7192_v55, %v3432_v27  ;;  %v3434_v18 = vpop.xlane.xlu0 %3433 }
 0x365   : > { %5501 = vpow2.f32 %v3501_v11  ;;  %v3461_v58 = vsub.f32 %v7198_v41, %v3434_v18 }
 0x366   : > { %v7291_v22 = vpop.eup %5489  ;;  %v3503_v9 = vmul.f32 1.442695, %v3460_v46 }
 0x367   : > { %3537 = vadd.xlane.f32.xlu0 %v7291_v22  ;;  %v3505_v60 = vmul.f32 1.442695, %v3461_v58  ;;  %v3436_v26 = vpop.xlane.xlu1 %3435 }
 0x368   : > { %5503 = vpow2.f32 %v3503_v9  ;;  %v3462_v40 = vsub.f32 %v7206_v35, %v3436_v26  ;;  %v3438_v49 = vpop.xlane.xlu0 %3437 }
 0x369   : > { %v7295_v1 = vpop.eup %5491  ;;  %5505 = vpow2.f32 %v3505_v60  ;;  %v3463_v55 = vsub.f32 %v7211_v17, %v3438_v49 }
 0x36a   : > { %v7298_v38 = vpop.eup %5493  ;;  %3539 = vadd.xlane.f32.xlu1 %v7295_v1  ;;  %v3507_v41 = vmul.f32 1.442695, %v3462_v40 }
 0x36b   : > { %3541 = vadd.xlane.f32.xlu0 %v7298_v38  ;;  %v3509_v19 = vmul.f32 1.442695, %v3463_v55  ;;  %v3440_v47 = vpop.xlane.xlu1 %3439 }
 0x36c   : > { %5507 = vpow2.f32 %v3507_v41  ;;  %v3464_v6 = vsub.f32 %v7218_v61, %v3440_v47 }
 0x36d   : > { %v7303_v53 = vpop.eup %5495  ;;  %5509 = vpow2.f32 %v3509_v19 }
 0x36e   : > { %v7305_v35 = vpop.eup %5497  ;;  %3543 = vadd.xlane.f32.xlu1 %v7303_v53  ;;  %v3511_v17 = vmul.f32 1.442695, %v3464_v6 }
 0x36f   : > { %3545 = vadd.xlane.f32.xlu0 %v7305_v35 }
 0x370   : > { %5511 = vpow2.f32 %v3511_v17 }
 0x371   : > { %v7309_v42 = vpop.eup %5499 }
 0x372   : > { %v7311_v7 = vpop.eup %5501  ;;  %3547 = vadd.xlane.f32.xlu1 %v7309_v42 }
 0x373   : > { %3549 = vadd.xlane.f32.xlu0 %v7311_v7 }
 0x375   : > { %v7315_v61 = vpop.eup %5503 }
 0x376   : > { %v7317_v57 = vpop.eup %5505  ;;  %3551 = vadd.xlane.f32.xlu1 %v7315_v61 }
 0x377   : > { %3553 = vadd.xlane.f32.xlu0 %v7317_v57 }
 0x379   : > { %v7321_v10 = vpop.eup %5507 }
 0x37a   : > { %v7323_v12 = vpop.eup %5509  ;;  %3555 = vadd.xlane.f32.xlu1 %v7321_v10 }
 0x37b   : > { %3557 = vadd.xlane.f32.xlu0 %v7323_v12 }
 0x37d   : > { %v7327_v32 = vpop.eup %5511 }
 0x37e   : > { %3559 = vadd.xlane.f32.xlu1 %v7327_v32 }
 0x3a4   : > { %v3514_v25 = vpop.xlane.xlu0 %3513 }
 0x3a5   : > { %5513 = vrcp.f32 %v3514_v25 }
 0x3a8   : > { %v3516_v54 = vpop.xlane.xlu1 %3515 }
 0x3a9   : > { %5515 = vrcp.f32 %v3516_v54 }
 0x3ac   : > { %v3518_v45 = vpop.xlane.xlu0 %3517 }
 0x3ad   : > { %5517 = vrcp.f32 %v3518_v45 }
 0x3b0   : > { %v3520_v59 = vpop.xlane.xlu1 %3519 }
 0x3b1   : > { %5519 = vrcp.f32 %v3520_v59 }
 0x3b2   : > { %v5514_v33 = vpop.eup %5513 }
 0x3b3   : > { %v3562_v62 = vmul.f32 %v5514_v33, %v7239_v16 }
 0x3b4   : > { %v3522_v0 = vpop.xlane.xlu0 %3521 }
 0x3b5   : > { %v4664_v14 = vpack.c.bf16 %v3562_v62, %v3562_v62  ;;  %5521 = vrcp.f32 %v3522_v0 }
 0x3b6   : > { %v5516_v48 = vpop.eup %5515 }
 0x3b7   : > { %3969 = vst [vmem:[%s6774_s8] sm:$0xf] %v4664_v14  ;;  %v3564_v4 = vmul.f32 %v5516_v48, %v7242_v30 }
 0x3b8   : > { %v3524_v29 = vpop.xlane.xlu1 %3523 }
 0x3b9   : > { %v4665_v3 = vpack.c.bf16 %v3564_v4, %v3564_v4  ;;  %5523 = vrcp.f32 %v3524_v29 }
 0x3ba   : > { %v5518_v15 = vpop.eup %5517 }
 0x3bb   : > { %3970 = vst [vmem:[%s6774_s8 + $0xc] sm:$0xf] %v4665_v3  ;;  %v3566_v44 = vmul.f32 %v5518_v15, %v7246_v56 }
 0x3bc   : > { %v3526_v16 = vpop.xlane.xlu0 %3525 }
 0x3bd   : > { %v4666_v20 = vpack.c.bf16 %v3566_v44, %v3566_v44  ;;  %5525 = vrcp.f32 %v3526_v16 }
 0x3be   : > { %v5520_v28 = vpop.eup %5519 }
 0x3bf   : > { %3971 = vst [vmem:[%s6774_s8 + $0x18] sm:$0xf] %v4666_v20  ;;  %v3568_v50 = vmul.f32 %v5520_v28, %v7250_v24 }
 0x3c1   : > { %v4667_v8 = vpack.c.bf16 %v3568_v50, %v3568_v50  ;;  %v3528_v51 = vpop.xlane.xlu1 %3527 }
 0x3c2   : > { %v5522_v31 = vpop.eup %5521  ;;  %5527 = vrcp.f32 %v3528_v51 }
 0x3c3   : > { %3972 = vst [vmem:[%s6774_s8 + $0x24] sm:$0xf] %v4667_v8  ;;  %v3570_v30 = vmul.f32 %v5522_v31, %v7254_v34 }
 0x3c5   : > { %v4668_v36 = vpack.c.bf16 %v3570_v30, %v3570_v30 }
 0x3c6   : > { %v5524_v56 = vpop.eup %5523  ;;  %v3530_v37 = vpop.xlane.xlu0 %3529 }
 0x3c7   : > { %3973 = vst [vmem:[%s6774_s8 + $0x30] sm:$0xf] %v4668_v36  ;;  %v3572_v23 = vmul.f32 %v5524_v56, %v7258_v13  ;;  %5529 = vrcp.f32 %v3530_v37 }
 0x3c9   : > { %v4669_v24 = vpack.c.bf16 %v3572_v23, %v3572_v23 }
 0x3ca   : > { %v5526_v63 = vpop.eup %5525 }
 0x3cb   : > { %3974 = vst [vmem:[%s6774_s8 + $0x3c] sm:$0xf] %v4669_v24  ;;  %v3574_v11 = vmul.f32 %v5526_v63, %v7261_v52 }
 0x3cd   : > { %v4670_v27 = vpack.c.bf16 %v3574_v11, %v3574_v11 }
 0x3cf   : > { %3975 = vst [vmem:[%s6774_s8 + $0x48] sm:$0xf] %v4670_v27  ;;  %v5528_v34 = vpop.eup %5527  ;;  %v3532_v18 = vpop.xlane.xlu1 %3531 }
 0x3d0   : > { %v3576_v46 = vmul.f32 %v5528_v34, %v7265_v2  ;;  %5531 = vrcp.f32 %v3532_v18 }
 0x3d2   : > { %v4671_v58 = vpack.c.bf16 %v3576_v46, %v3576_v46 }
 0x3d4   : > { %v5530_v9 = vpop.eup %5529  ;;  %3976 = vst [vmem:[%s6774_s8 + $0x54] sm:$0xf] %v4671_v58 }
 0x3d5   : > { %v3578_v13 = vmul.f32 %v5530_v9, %v7268_v43 }
 0x3d7   : > { %v4672_v60 = vpack.c.bf16 %v3578_v13, %v3578_v13 }
 0x3d9   : > { %3977 = vst [vmem:[%s6774_s8 + $0x60] sm:$0xf] %v4672_v60 }
 0x3dd   : > { %v5532_v40 = vpop.eup %5531 }
 0x3de   : > { %v3580_v52 = vmul.f32 %v5532_v40, %v7272_v5 }
 0x3e0   : > { %v3534_v26 = vpop.xlane.xlu0 %3533  ;;  %v4673_v49 = vpack.c.bf16 %v3580_v52, %v3580_v52 }
 0x3e1   : > { %5533 = vrcp.f32 %v3534_v26 }
 0x3e2   : > { %3978 = vst [vmem:[%s6774_s8 + $0x6c] sm:$0xf] %v4673_v49 }
 0x3ea   : > { %v3536_v55 = vpop.xlane.xlu1 %3535 }
 0x3eb   : > { %5535 = vrcp.f32 %v3536_v55 }
 0x3ee   : > { %v5534_v2 = vpop.eup %5533 }
 0x3ef   : > { %v3582_v41 = vmul.f32 %v5534_v2, %v7276_v21 }
 0x3f0   : > { %v3538_v47 = vpop.xlane.xlu0 %3537 }
 0x3f1   : > { %v4674_v19 = vpack.c.bf16 %v3582_v41, %v3582_v41  ;;  %5537 = vrcp.f32 %v3538_v47 }
 0x3f3   : > { %3979 = vst [vmem:[%s6774_s8 + $0x78] sm:$0xf] %v4674_v19  ;;  %v3540_v43 = vpop.xlane.xlu1 %3539 }
 0x3f4   : > { %5539 = vrcp.f32 %v3540_v43  ;;  %v3542_v6 = vpop.xlane.xlu0 %3541 }
 0x3f5   : > { %5541 = vrcp.f32 %v3542_v6 }
 0x3f7   : > { %v3544_v17 = vpop.xlane.xlu1 %3543 }
 0x3f8   : > { %5543 = vrcp.f32 %v3544_v17  ;;  %v3546_v25 = vpop.xlane.xlu0 %3545  ;;  %v5536_v5 = vpop.eup %5535 }
 0x3f9   : > { %5545 = vrcp.f32 %v3546_v25  ;;  %v3584_v54 = vmul.f32 %v5536_v5, %v7285_v39 }
 0x3fb   : > { %v3548_v45 = vpop.xlane.xlu1 %3547  ;;  %v4675_v59 = vpack.c.bf16 %v3584_v54, %v3584_v54 }
 0x3fc   : > { %5547 = vrcp.f32 %v3548_v45  ;;  %v3550_v21 = vpop.xlane.xlu0 %3549 }
 0x3fd   : > { %5549 = vrcp.f32 %v3550_v21  ;;  %3980 = vst [vmem:[%s6774_s8 + $0x84] sm:$0xf] %v4675_v59 }
 0x3fe   : > { %v5538_v33 = vpop.eup %5537 }
 0x3ff   : > { %v3586_v62 = vmul.f32 %v5538_v33, %v7291_v22  ;;  %v3552_v0 = vpop.xlane.xlu1 %3551 }
 0x400   : > { %5551 = vrcp.f32 %v3552_v0  ;;  %v3554_v14 = vpop.xlane.xlu0 %3553 }
 0x401   : > { %v5540_v48 = vpop.eup %5539  ;;  %v4676_v4 = vpack.c.bf16 %v3586_v62, %v3586_v62  ;;  %5553 = vrcp.f32 %v3554_v14 }
 0x402   : > { %v5542_v3 = vpop.eup %5541  ;;  %v3588_v39 = vmul.f32 %v5540_v48, %v7295_v1 }
 0x403   : > { %3981 = vst [vmem:[%s6774_s8 + $0x90] sm:$0xf] %v4676_v4  ;;  %v3590_v15 = vmul.f32 %v5542_v3, %v7298_v38  ;;  %v3556_v29 = vpop.xlane.xlu1 %3555 }
 0x404   : > { %v4677_v44 = vpack.c.bf16 %v3588_v39, %v3588_v39  ;;  %5555 = vrcp.f32 %v3556_v29  ;;  %v3558_v20 = vpop.xlane.xlu0 %3557 }
 0x405   : > { %v5544_v22 = vpop.eup %5543  ;;  %v4678_v28 = vpack.c.bf16 %v3590_v15, %v3590_v15  ;;  %5557 = vrcp.f32 %v3558_v20 }
 0x406   : > { %v5546_v16 = vpop.eup %5545  ;;  %3982 = vst [vmem:[%s6774_s8 + $0x9c] sm:$0xf] %v4677_v44  ;;  %v3592_v50 = vmul.f32 %v5544_v22, %v7303_v53 }
 0x407   : > { %3983 = vst [vmem:[%s6774_s8 + $0xa8] sm:$0xf] %v4678_v28  ;;  %v3594_v1 = vmul.f32 %v5546_v16, %v7305_v35  ;;  %v3560_v8 = vpop.xlane.xlu1 %3559 }
 0x408   : > { %v4679_v38 = vpack.c.bf16 %v3592_v50, %v3592_v50  ;;  %5559 = vrcp.f32 %v3560_v8 }
 0x409   : > { %v5548_v31 = vpop.eup %5547  ;;  %v4680_v30 = vpack.c.bf16 %v3594_v1, %v3594_v1 }
 0x40a   : > { %v5550_v51 = vpop.eup %5549  ;;  %3984 = vst [vmem:[%s6774_s8 + $0xb4] sm:$0xf] %v4679_v38  ;;  %v3596_v36 = vmul.f32 %v5548_v31, %v7309_v42 }
 0x40b   : > { %3985 = vst [vmem:[%s6774_s8 + $0xc0] sm:$0xf] %v4680_v30  ;;  %v3598_v53 = vmul.f32 %v5550_v51, %v7311_v7 }
 0x40c   : > { %v4681_v56 = vpack.c.bf16 %v3596_v36, %v3596_v36 }
 0x40d   : > { %v5552_v37 = vpop.eup %5551  ;;  %v4682_v35 = vpack.c.bf16 %v3598_v53, %v3598_v53 }
 0x40e   : > { %v5554_v23 = vpop.eup %5553  ;;  %3986 = vst [vmem:[%s6774_s8 + $0xcc] sm:$0xf] %v4681_v56  ;;  %v3600_v24 = vmul.f32 %v5552_v37, %v7315_v61 }
 0x40f   : > { %3987 = vst [vmem:[%s6774_s8 + $0xd8] sm:$0xf] %v4682_v35  ;;  %v3602_v63 = vmul.f32 %v5554_v23, %v7317_v57 }
 0x410   : > { %v4683_v42 = vpack.c.bf16 %v3600_v24, %v3600_v24 }
 0x411   : > { %v5556_v11 = vpop.eup %5555  ;;  %v4684_v27 = vpack.c.bf16 %v3602_v63, %v3602_v63 }
 0x412   : > { %v5558_v7 = vpop.eup %5557  ;;  %3988 = vst [vmem:[%s6774_s8 + $0xe4] sm:$0xf] %v4683_v42  ;;  %v3604_v34 = vmul.f32 %v5556_v11, %v7321_v10 }
 0x413   : > { %3989 = vst [vmem:[%s6774_s8 + $0xf0] sm:$0xf] %v4684_v27  ;;  %v3606_v46 = vmul.f32 %v5558_v7, %v7323_v12 }
 0x414   : > { %v4685_v61 = vpack.c.bf16 %v3604_v34, %v3604_v34 }
 0x415   : > { %v5560_v18 = vpop.eup %5559  ;;  %v4686_v58 = vpack.c.bf16 %v3606_v46, %v3606_v46 }
 0x416   : > { %3990 = vst [vmem:[%s6774_s8 + $0xfc] sm:$0xf] %v4685_v61  ;;  %v3608_v57 = vmul.f32 %v5560_v18, %v7327_v32 }
 0x417   : > { %3991 = vst [vmem:[%s6774_s8 + $0x108] sm:$0xf] %v4686_v58 }
 0x418   : > { %v4687_v10 = vpack.c.bf16 %v3608_v57, %v3608_v57 }
 0x41a   : > { %3992 = vst [vmem:[%s6774_s8 + $0x114] sm:$0xf] %v4687_v10 }
 0x41b   : > { %5574 = shalt.err (!%p5571_p7)
}
 0x41c   : > { %s5575_s29 = scalar_lea.hbm %s7385_s15, 4608  ;;  %s5579_s10 = scalar_lea.hbm %s7446_s5, 18432 }
 0x41d   : > { %p5576_p9 = scmp.ne.s32.totalorder %s7385_s15, %s5575_s29  ;;  %p5580_p12 = scmp.lt.s32.totalorder %s7385_s15, %s7446_s5 }
 0x41e   : > { %p5581_p13 = scmp.lt.s32.totalorder %s5579_s10, %s5575_s29 }
 0x41f   : > { %p5577_p10 = pnand %p5576_p9, %p5740_p3 }
 0x420   : > { %p5582_p0 = por %p5581_p13, %p5580_p12 }
 0x421   : > { %p5578_p11 = pneg %p5577_p10 }
 0x423   : > { %p5583_p1 = pnand %p5582_p0, %p5578_p11 }
 0x425   : > { %5586 = shalt.err (!%p5583_p1)
}
 0x426   : > { %s5657_s13 = smov 192   ;;  %s5658_s14 = smov 12  }
 0x427   : > { %5179 = dma.vmem_to_hbm [thread:$0]  (%p5740_p3), %s7380_s22, 4608, %s7385_s15, %s7390_s16, %s5657_s13, %s5657_s13, %s5658_s14  }
 0x428 PF: > { %p5185_p2 = scmp.ge.s32.totalorder %s5653_s25, 2  ;;  %s4264_s17 = sand.u32 1, %s5625_s18  }
 0x429   : > { %s4265_s27 = scalar_lea.sflag [#allocation3], %s4264_s17 }
 0x42a   : > { %p5182_p4 = pnand %p5185_p2, %p5749_p8 }
 0x42c   : > { %p5183_p5 = pneg %p5182_p4 }
 0x42e   : > { %5620 = dma.done.wait (%p5183_p5), %s4265_s27, 4608  }
 0x42f   : > { %5622 = vsyncadd (%p5183_p5), %s4265_s27, 4294962688  ;;  %s18_s25 = sadd.s32 1, %s5653_s25   ;;  %s7510_s6 = sld [smem:[#allocation5_spill]] }
 0x430   : > { %p15_p6 = scmp.ge.s32.totalorder %s18_s25, 6   ;;  %s7511_s18 = smov %s5629_s19 }
 0x431   : > { %s7512_s19 = smov %s5633_s20  ;;  %s7513_s20 = smov %s5758_s11 }
 0x432   : > { %s7514_s21 = smov %s5645_s23  ;;  %s7515_s22 = smov %s5649_s24 }
 0x433   : > { %s7516_s23 = smov %s7519_s28  ;;  %17 = sbr.rel (!%p15_p6) target bundleno = 5 (0x5), region = 83 }
 0x435   : > { %s7517_s24 = smov %s7510_s6 }
 0x438   :  { %4270 = vsyncpa [#allocation3], 1 }
 0x439   :  { %4272 = vsyncpa [#allocation3 + $0x1], 1 }

</bundles_post_ra>
